<compile_context>
chip_gen: v7x
topology: tpu7x:2x2x1
jax: 0.10.0
libtpu: 0.0.40
codegen_flags: <defaults>
</compile_context>

<pallas_src>
import jax
import jax.numpy as jnp
from jax import lax
from jax.experimental import pallas as pl
from jax.experimental.pallas import tpu as pltpu


# ----------------------------------------------------------------------------
# In-kernel 2x2 max-pool helper.
#   y:     (H*W, C) f32 conv output, rows ordered r = h*W + w
#   s_ref: ((H//2)*W, C) f32 VMEM scratch
# returns (H//2 * W//2, C) f32 with rows ordered r' = h'*(W//2) + w'
# ----------------------------------------------------------------------------
def _maxpool2x2(y, s_ref, H, W, C):
    # H-direction: rows h=2a and h=2a+1 are the two W-long halves of each
    # 2W-row group -> aligned second-minor slices (W is a multiple of 8).
    y = y.reshape(H // 2, 2 * W, C)
    y = jnp.maximum(y[:, :W, :], y[:, W:, :])            # (H//2, W, C)
    # W-direction: adjacent rows are (w even, w odd) -> strided row loads.
    s_ref[...] = y.reshape((H // 2) * W, C)
    n = (H // 2) * (W // 2)
    return jnp.maximum(s_ref[pl.ds(0, n, stride=2), :],
                       s_ref[pl.ds(1, n, stride=2), :])  # (n, C)


# ----------------------------------------------------------------------------
# Fused conv1+conv2+conv3 (+bias+ReLU+pool each) kernel, one image per step.
# ----------------------------------------------------------------------------
def fused_convs_kernel(cols_ref, w1_ref, b1_ref, w2_ref, b2_ref, w3_ref, b3_ref,
                       o_ref, pad2_ref, pad3_ref, ps1_ref, ps2_ref, ps3_ref):
    f32 = jnp.float32
    # Zero the halo buffers each step (only their interiors are overwritten
    # below; the halo cells must read back as zero for SAME padding).
    pad2_ref[...] = jnp.zeros((18, 32, 32), f32)
    pad3_ref[...] = jnp.zeros((10, 24, 64), f32)

    # ---- conv1 (3->32): one im2col matmul, K=27 (LHS packed in wrapper) ----
    y1 = jnp.dot(cols_ref[0], w1_ref[...], preferred_element_type=f32)  # (1024, 32)
    y1 = jnp.maximum(y1 + b1_ref[...], 0.0)
    p1 = _maxpool2x2(y1, ps1_ref, 32, 32, 32)            # (256, 32)
    # Pooled 16x16x32 map into the zero-halo buffer; data columns start at the
    # sublane-aligned offset 8 (left halo = col 7, right halo = col 24).
    pad2_ref[1:17, 8:24, :] = p1.reshape(16, 16, 32)

    # ---- conv2 (32->64): 9 shifted-window matmuls (K=32) ----
    acc2 = jnp.zeros((256, 64), f32)
    for t in range(9):
        dy, dx = t // 3, t % 3
        win = pad2_ref[dy:dy + 16, 7 + dx:23 + dx, :].reshape(256, 32)
        acc2 = acc2 + jnp.dot(win.astype(jnp.bfloat16), w2_ref[t],
                              preferred_element_type=f32)
    y2 = jnp.maximum(acc2 + b2_ref[...], 0.0)            # (256, 64)
    p2 = _maxpool2x2(y2, ps2_ref, 16, 16, 64)            # (64, 64)
    pad3_ref[1:9, 8:16, :] = p2.reshape(8, 8, 64)

    # ---- conv3 (64->128): 9 shifted-window matmuls (K=64) ----
    acc3 = jnp.zeros((64, 128), f32)
    for t in range(9):
        dy, dx = t // 3, t % 3
        win = pad3_ref[dy:dy + 8, 7 + dx:15 + dx, :].reshape(64, 64)
        acc3 = acc3 + jnp.dot(win.astype(jnp.bfloat16), w3_ref[t],
                              preferred_element_type=f32)
    y3 = jnp.maximum(acc3 + b3_ref[...], 0.0)            # (64, 128)
    p3 = _maxpool2x2(y3, ps3_ref, 8, 8, 128)             # (16, 128), rows = h*4+w
    o_ref[0] = p3.astype(o_ref.dtype)                    # lane-dense (C=128) store


def fused_convs(cols, w1r, b1, w2r, b2, w3r, b3):
    N = cols.shape[0]
    return pl.pallas_call(
        fused_convs_kernel,
        out_shape=jax.ShapeDtypeStruct((N, 16, 128), jnp.bfloat16),
        grid_spec=pltpu.PrefetchScalarGridSpec(
            num_scalar_prefetch=0,
            grid=(N,),
            in_specs=[
                pl.BlockSpec((1, 1024, 27), lambda n: (n, 0, 0)),
                pl.BlockSpec((27, 32), lambda n: (0, 0)),
                pl.BlockSpec((1, 32), lambda n: (0, 0)),
                pl.BlockSpec((9, 32, 64), lambda n: (0, 0, 0)),
                pl.BlockSpec((1, 64), lambda n: (0, 0)),
                pl.BlockSpec((9, 64, 128), lambda n: (0, 0, 0)),
                pl.BlockSpec((1, 128), lambda n: (0, 0)),
            ],
            out_specs=pl.BlockSpec((1, 16, 128), lambda n: (n, 0, 0)),
            scratch_shapes=[
                pltpu.VMEM((18, 32, 32), jnp.float32),   # zero-halo input of conv2
                pltpu.VMEM((10, 24, 64), jnp.float32),   # zero-halo input of conv3
                pltpu.VMEM((512, 32), jnp.float32),      # pool scratch, layer 1
                pltpu.VMEM((128, 64), jnp.float32),      # pool scratch, layer 2
                pltpu.VMEM((32, 128), jnp.float32),      # pool scratch, layer 3
            ],
        ),
        compiler_params=pltpu.CompilerParams(dimension_semantics=("parallel",)),
    )(cols, w1r, b1, w2r, b2, w3r, b3)


# ----------------------------------------------------------------------------
# Fused fc1 + ReLU + fc2 kernel (batch-blocked; weights resident).
# ----------------------------------------------------------------------------
def mlp_kernel(x_ref, w1_ref, b1_ref, w2_ref, b2_ref, o_ref):
    h = jnp.dot(x_ref[...], w1_ref[...],
                preferred_element_type=jnp.float32) + b1_ref[...]
    h = jnp.maximum(h, 0.0).astype(jnp.bfloat16)
    o_ref[...] = (jnp.dot(h, w2_ref[...], preferred_element_type=jnp.float32)
                  + b2_ref[...]).astype(o_ref.dtype)


def mlp(xflat, w1, b1, w2, b2):
    N, D = xflat.shape
    Dh = w1.shape[1]
    Do = w2.shape[1]
    bm = N if N <= 256 else 128
    return pl.pallas_call(
        mlp_kernel,
        out_shape=jax.ShapeDtypeStruct((N, Do), jnp.float32),
        grid_spec=pltpu.PrefetchScalarGridSpec(
            num_scalar_prefetch=0,
            grid=(pl.cdiv(N, bm),),
            in_specs=[
                pl.BlockSpec((bm, D), lambda i: (i, 0)),
                pl.BlockSpec((D, Dh), lambda i: (0, 0)),
                pl.BlockSpec((1, Dh), lambda i: (0, 0)),
                pl.BlockSpec((Dh, Do), lambda i: (0, 0)),
                pl.BlockSpec((1, Do), lambda i: (0, 0)),
            ],
            out_specs=pl.BlockSpec((bm, Do), lambda i: (i, 0)),
        ),
        compiler_params=pltpu.CompilerParams(dimension_semantics=("parallel",)),
    )(xflat, w1, b1, w2, b2)


# ----------------------------------------------------------------------------
# Full forward pass (PyTorch Net.forward semantics, eval mode).
# ----------------------------------------------------------------------------
def net_forward(x_nchw, params):
    N = x_nchw.shape[0]
    (cw1, cb1), (cw2, cb2), (cw3, cb3) = params["convs"]

    # glue: NCHW -> NHWC, then pack the layer-1 im2col LHS, columns ordered
    # (dy, dx, c) to match conv1's HWIO weights reshaped to (27, 32).
    x = jnp.transpose(x_nchw, (0, 2, 3, 1))
    xp = jnp.pad(x, ((0, 0), (1, 1), (1, 1), (0, 0)))
    cols = jnp.concatenate(
        [xp[:, dy:dy + 32, dx:dx + 32, :] for dy in range(3) for dx in range(3)],
        axis=-1).reshape(N, 32 * 32, 27).astype(jnp.bfloat16)

    feat = fused_convs(
        cols,
        cw1.reshape(27, 32).astype(jnp.bfloat16), cb1.reshape(1, 32),
        cw2.reshape(9, 32, 64).astype(jnp.bfloat16), cb2.reshape(1, 64),
        cw3.reshape(9, 64, 128).astype(jnp.bfloat16), cb3.reshape(1, 128),
    )                                                     # (N, 16, 128) bf16

    # feat rows are (h*4 + w), lanes are c, so a plain flatten is (h, w, c)
    # ordered; permute fc1's input dim (stored (c, h, w) to mirror PyTorch's
    # NCHW flatten) to match.
    xflat = feat.reshape(N, 16 * 128)
    w1m = params["w1"].reshape(128, 4, 4, 512).transpose(1, 2, 0, 3).reshape(2048, 512)
    # TODO(synk): nn.Dropout(0.25) is stochastic only in training; identity here (eval).
    return mlp(xflat, w1m.astype(jnp.bfloat16), params["b1"].reshape(1, 512),
               params["w2"].astype(jnp.bfloat16), params["b2"].reshape(1, 10))


# ----------------------------------------------------------------------------
# Pure-JAX f32 reference for verification.
# ----------------------------------------------------------------------------
def reference_forward(x_nchw, params):
    x = jnp.transpose(x_nchw, (0, 2, 3, 1))
    for w, b in params["convs"]:
        y = lax.conv_general_dilated(
            x, w, window_strides=(1, 1), padding="SAME",
            dimension_numbers=("NHWC", "HWIO", "NHWC"))
        y = jax.nn.relu(y + b)
        N, H, W, C = y.shape
        x = jnp.max(y.reshape(N, H // 2, 2, W // 2, 2, C), axis=(2, 4))
    xflat = jnp.transpose(x, (0, 3, 1, 2)).reshape(x.shape[0], -1)
    h = jax.nn.relu(xflat @ params["w1"] + params["b1"])
    return h @ params["w2"] + params["b2"]


def init_params(key):
    ks = jax.random.split(key, 10)
    def conv_init(k, cin, cout):
        scale = 1.0 / (3.0 * (cin ** 0.5))                # ~1/sqrt(9*cin)
        return jax.random.normal(k, (3, 3, cin, cout), jnp.float32) * scale
    def fc_init(k, din, dout):
        return jax.random.normal(k, (din, dout), jnp.float32) / (din ** 0.5)
    return {
        "convs": [
            (conv_init(ks[0], 3, 32),   jax.random.normal(ks[1], (32,)) * 0.05),
            (conv_init(ks[2], 32, 64),  jax.random.normal(ks[3], (64,)) * 0.05),
            (conv_init(ks[4], 64, 128), jax.random.normal(ks[5], (128,)) * 0.05),
        ],
        # fc1 weight stored (in=2048, out=512); the 2048 axis is ordered
        # (c, h, w) to match the PyTorch flatten of the NCHW feature map.
        "w1": fc_init(ks[6], 128 * 4 * 4, 512),
        "b1": jax.random.normal(ks[7], (512,)) * 0.05,
        "w2": fc_init(ks[8], 512, 10),
        "b2": jax.random.normal(ks[9], (10,)) * 0.05,
    }


if __name__ == "__main__":
    key = jax.random.PRNGKey(0)
    kx, kp = jax.random.split(key)
    # batch=2, NCHW input; 32x32 spatial implied by fc1 = Linear(128*4*4, 512).
    x = jax.random.normal(kx, (2, 3, 32, 32), jnp.float32)
    params = init_params(kp)

    out = jax.jit(net_forward)(x, params)
    out = jax.block_until_ready(out)
    assert out.shape == (2, 10), out.shape

    ref = reference_forward(x, params)
    max_err = float(jnp.max(jnp.abs(out - ref)))
    # bf16 matmul operands (f32 accumulation) -> scale-aware tolerance.
    tol = 5e-2 * (1.0 + float(jnp.max(jnp.abs(ref))))
    assert max_err < tol, f"mismatch vs reference: max abs err = {max_err} (tol {tol})"

    print("KERNEL_OK")
</pallas_src>

<mosaic_0001>
module attributes {stable_mosaic.version = 11 : i64} {
  func.func @fused_convs_kernel(%arg0: i32, %arg1: memref<1x1024x27xbf16, #tpu.memory_space<vmem>>, %arg2: memref<27x32xbf16, #tpu.memory_space<vmem>>, %arg3: memref<1x32xf32, #tpu.memory_space<vmem>>, %arg4: memref<9x32x64xbf16, #tpu.memory_space<vmem>>, %arg5: memref<1x64xf32, #tpu.memory_space<vmem>>, %arg6: memref<9x64x128xbf16, #tpu.memory_space<vmem>>, %arg7: memref<1x128xf32, #tpu.memory_space<vmem>>, %arg8: memref<1x16x128xbf16, #tpu.memory_space<vmem>>, %arg9: memref<18x32x32xf32, #tpu.memory_space<vmem>>, %arg10: memref<10x24x64xf32, #tpu.memory_space<vmem>>, %arg11: memref<512x32xf32, #tpu.memory_space<vmem>>, %arg12: memref<128x64xf32, #tpu.memory_space<vmem>>, %arg13: memref<32x128xf32, #tpu.memory_space<vmem>>) attributes {dimension_semantics = [#tpu.dimension_semantics<parallel>], iteration_bounds = array<i64: 2>, scalar_prefetch = 0 : i64, scratch_operands = 5 : i64, tpu.core_type = #tpu.core_type<tc>, window_params = [{transform_indices = @transform_0, window_bounds = array<i64: 1, 1024, 27>}, {pipeline_mode = #tpu.pipeline_mode<synchronous>, transform_indices = @transform_1, window_bounds = array<i64: 27, 32>}, {pipeline_mode = #tpu.pipeline_mode<synchronous>, transform_indices = @transform_2, window_bounds = array<i64: 1, 32>}, {pipeline_mode = #tpu.pipeline_mode<synchronous>, transform_indices = @transform_3, window_bounds = array<i64: 9, 32, 64>}, {pipeline_mode = #tpu.pipeline_mode<synchronous>, transform_indices = @transform_4, window_bounds = array<i64: 1, 64>}, {pipeline_mode = #tpu.pipeline_mode<synchronous>, transform_indices = @transform_5, window_bounds = array<i64: 9, 64, 128>}, {pipeline_mode = #tpu.pipeline_mode<synchronous>, transform_indices = @transform_6, window_bounds = array<i64: 1, 128>}, {transform_indices = @transform_7, window_bounds = array<i64: 1, 16, 128>}]} {
    %cst = arith.constant 0.000000e+00 : f32
    %0 = vector.broadcast %cst : f32 to vector<18x32x32xf32>
    %c0 = arith.constant 0 : index
    %c0_0 = arith.constant 0 : index
    %c0_1 = arith.constant 0 : index
    %1 = vector.load %arg9[%c0, %c0_0, %c0_1] : memref<18x32x32xf32, #tpu.memory_space<vmem>>, vector<18x32x32xf32>
    tpu.vector_store %arg9[%c0, %c0_0, %c0_1], %0 {strides = array<i32>} : memref<18x32x32xf32, #tpu.memory_space<vmem>>, vector<18x32x32xf32>,
    %cst_2 = arith.constant 0.000000e+00 : f32
    %2 = vector.broadcast %cst_2 : f32 to vector<10x24x64xf32>
    %c0_3 = arith.constant 0 : index
    %c0_4 = arith.constant 0 : index
    %c0_5 = arith.constant 0 : index
    %3 = vector.load %arg10[%c0_3, %c0_4, %c0_5] : memref<10x24x64xf32, #tpu.memory_space<vmem>>, vector<10x24x64xf32>
    tpu.vector_store %arg10[%c0_3, %c0_4, %c0_5], %2 {strides = array<i32>} : memref<10x24x64xf32, #tpu.memory_space<vmem>>, vector<10x24x64xf32>,
    %c0_6 = arith.constant 0 : index
    %c0_7 = arith.constant 0 : index
    %c0_8 = arith.constant 0 : index
    %4 = vector.load %arg1[%c0_6, %c0_7, %c0_8] : memref<1x1024x27xbf16, #tpu.memory_space<vmem>>, vector<1x1024x27xbf16>
    %5 = vector.shape_cast %4 : vector<1x1024x27xbf16> to vector<1024x27xbf16>
    %c0_9 = arith.constant 0 : index
    %c0_10 = arith.constant 0 : index
    %6 = vector.load %arg2[%c0_9, %c0_10] : memref<27x32xbf16, #tpu.memory_space<vmem>>, vector<27x32xbf16>
    %cst_11 = arith.constant dense<0.000000e+00> : vector<1024x32xf32>
    %7 = tpu.matmul %5, %6, %cst_11 {dimension_numbers = #tpu.dot_dimension_numbers<[1], [0], [0], [1], [0, 0, 1, 1], [], []>} : vector<1024x27xbf16>, vector<27x32xbf16>, vector<1024x32xf32> -> vector<1024x32xf32>
    %c0_12 = arith.constant 0 : index
    %c0_13 = arith.constant 0 : index
    %8 = vector.load %arg3[%c0_12, %c0_13] : memref<1x32xf32, #tpu.memory_space<vmem>>, vector<1x32xf32>
    %9 = vector.broadcast %8 : vector<1x32xf32> to vector<1024x32xf32>
    %10 = arith.addf %7, %9 : vector<1024x32xf32>
    %cst_14 = arith.constant 0.000000e+00 : f32
    %11 = vector.broadcast %cst_14 : f32 to vector<1024x32xf32>
    %12 = arith.maximumf %10, %11 : vector<1024x32xf32>
    %13 = vector.shape_cast %12 : vector<1024x32xf32> to vector<16x64x32xf32>
    %14 = vector.extract_strided_slice %13 {offsets = [0, 0, 0], sizes = [16, 32, 32], strides = [1, 1, 1]} : vector<16x64x32xf32> to vector<16x32x32xf32>
    %15 = vector.extract_strided_slice %13 {offsets = [0, 32, 0], sizes = [16, 32, 32], strides = [1, 1, 1]} : vector<16x64x32xf32> to vector<16x32x32xf32>
    %16 = arith.maximumf %14, %15 : vector<16x32x32xf32>
    %17 = vector.shape_cast %16 : vector<16x32x32xf32> to vector<512x32xf32>
    %c0_15 = arith.constant 0 : index
    %c0_16 = arith.constant 0 : index
    %18 = vector.load %arg11[%c0_15, %c0_16] : memref<512x32xf32, #tpu.memory_space<vmem>>, vector<512x32xf32>
    tpu.vector_store %arg11[%c0_15, %c0_16], %17 {strides = array<i32>} : memref<512x32xf32, #tpu.memory_space<vmem>>, vector<512x32xf32>,
    %c0_17 = arith.constant 0 : index
    %c0_18 = arith.constant 0 : index
    %19 = tpu.strided_load %arg11[%c0_17, %c0_18] {strides = array<i32: 2, 1>} : memref<512x32xf32, #tpu.memory_space<vmem>>, vector<256x32xf32>
    %c1 = arith.constant 1 : index
    %c0_19 = arith.constant 0 : index
    %20 = tpu.strided_load %arg11[%c1, %c0_19] {strides = array<i32: 2, 1>} : memref<512x32xf32, #tpu.memory_space<vmem>>, vector<256x32xf32>
    %21 = arith.maximumf %19, %20 : vector<256x32xf32>
    %22 = vector.shape_cast %21 : vector<256x32xf32> to vector<16x16x32xf32>
    %c1_20 = arith.constant 1 : index
    %c8 = arith.constant 8 : index
    %c0_21 = arith.constant 0 : index
    %23 = vector.load %arg9[%c1_20, %c8, %c0_21] : memref<18x32x32xf32, #tpu.memory_space<vmem>>, vector<16x16x32xf32>
    tpu.vector_store %arg9[%c1_20, %c8, %c0_21], %22 {strides = array<i32>} : memref<18x32x32xf32, #tpu.memory_space<vmem>>, vector<16x16x32xf32>,
    %cst_22 = arith.constant 0.000000e+00 : f32
    %24 = vector.broadcast %cst_22 : f32 to vector<256x64xf32>
    %c0_23 = arith.constant 0 : index
    %c7 = arith.constant 7 : index
    %c0_24 = arith.constant 0 : index
    %25 = vector.load %arg9[%c0_23, %c7, %c0_24] : memref<18x32x32xf32, #tpu.memory_space<vmem>>, vector<16x16x32xf32>
    %26 = vector.shape_cast %25 : vector<16x16x32xf32> to vector<256x32xf32>
    %27 = arith.truncf %26 : vector<256x32xf32> to vector<256x32xbf16>
    %c0_25 = arith.constant 0 : index
    %c0_26 = arith.constant 0 : index
    %c0_27 = arith.constant 0 : index
    %28 = vector.load %arg4[%c0_25, %c0_26, %c0_27] : memref<9x32x64xbf16, #tpu.memory_space<vmem>>, vector<1x32x64xbf16>
    %29 = vector.shape_cast %28 : vector<1x32x64xbf16> to vector<32x64xbf16>
    %cst_28 = arith.constant dense<0.000000e+00> : vector<256x64xf32>
    %30 = tpu.matmul %27, %29, %cst_28 {dimension_numbers = #tpu.dot_dimension_numbers<[1], [0], [0], [1], [0, 0, 1, 1], [], []>} : vector<256x32xbf16>, vector<32x64xbf16>, vector<256x64xf32> -> vector<256x64xf32>
    %31 = arith.addf %24, %30 : vector<256x64xf32>
    %c0_29 = arith.constant 0 : index
    %c8_30 = arith.constant 8 : index
    %c0_31 = arith.constant 0 : index
    %32 = vector.load %arg9[%c0_29, %c8_30, %c0_31] : memref<18x32x32xf32, #tpu.memory_space<vmem>>, vector<16x16x32xf32>
    %33 = vector.shape_cast %32 : vector<16x16x32xf32> to vector<256x32xf32>
    %34 = arith.truncf %33 : vector<256x32xf32> to vector<256x32xbf16>
    %c1_32 = arith.constant 1 : index
    %c0_33 = arith.constant 0 : index
    %c0_34 = arith.constant 0 : index
    %35 = vector.load %arg4[%c1_32, %c0_33, %c0_34] : memref<9x32x64xbf16, #tpu.memory_space<vmem>>, vector<1x32x64xbf16>
    %36 = vector.shape_cast %35 : vector<1x32x64xbf16> to vector<32x64xbf16>
    %cst_35 = arith.constant dense<0.000000e+00> : vector<256x64xf32>
    %37 = tpu.matmul %34, %36, %cst_35 {dimension_numbers = #tpu.dot_dimension_numbers<[1], [0], [0], [1], [0, 0, 1, 1], [], []>} : vector<256x32xbf16>, vector<32x64xbf16>, vector<256x64xf32> -> vector<256x64xf32>
    %38 = arith.addf %31, %37 : vector<256x64xf32>
    %c0_36 = arith.constant 0 : index
    %c9 = arith.constant 9 : index
    %c0_37 = arith.constant 0 : index
    %39 = vector.load %arg9[%c0_36, %c9, %c0_37] : memref<18x32x32xf32, #tpu.memory_space<vmem>>, vector<16x16x32xf32>
    %40 = vector.shape_cast %39 : vector<16x16x32xf32> to vector<256x32xf32>
    %41 = arith.truncf %40 : vector<256x32xf32> to vector<256x32xbf16>
    %c2 = arith.constant 2 : index
    %c0_38 = arith.constant 0 : index
    %c0_39 = arith.constant 0 : index
    %42 = vector.load %arg4[%c2, %c0_38, %c0_39] : memref<9x32x64xbf16, #tpu.memory_space<vmem>>, vector<1x32x64xbf16>
    %43 = vector.shape_cast %42 : vector<1x32x64xbf16> to vector<32x64xbf16>
    %cst_40 = arith.constant dense<0.000000e+00> : vector<256x64xf32>
    %44 = tpu.matmul %41, %43, %cst_40 {dimension_numbers = #tpu.dot_dimension_numbers<[1], [0], [0], [1], [0, 0, 1, 1], [], []>} : vector<256x32xbf16>, vector<32x64xbf16>, vector<256x64xf32> -> vector<256x64xf32>
    %45 = arith.addf %38, %44 : vector<256x64xf32>
    %c1_41 = arith.constant 1 : index
    %c7_42 = arith.constant 7 : index
    %c0_43 = arith.constant 0 : index
    %46 = vector.load %arg9[%c1_41, %c7_42, %c0_43] : memref<18x32x32xf32, #tpu.memory_space<vmem>>, vector<16x16x32xf32>
    %47 = vector.shape_cast %46 : vector<16x16x32xf32> to vector<256x32xf32>
    %48 = arith.truncf %47 : vector<256x32xf32> to vector<256x32xbf16>
    %c3 = arith.constant 3 : index
    %c0_44 = arith.constant 0 : index
    %c0_45 = arith.constant 0 : index
    %49 = vector.load %arg4[%c3, %c0_44, %c0_45] : memref<9x32x64xbf16, #tpu.memory_space<vmem>>, vector<1x32x64xbf16>
    %50 = vector.shape_cast %49 : vector<1x32x64xbf16> to vector<32x64xbf16>
    %cst_46 = arith.constant dense<0.000000e+00> : vector<256x64xf32>
    %51 = tpu.matmul %48, %50, %cst_46 {dimension_numbers = #tpu.dot_dimension_numbers<[1], [0], [0], [1], [0, 0, 1, 1], [], []>} : vector<256x32xbf16>, vector<32x64xbf16>, vector<256x64xf32> -> vector<256x64xf32>
    %52 = arith.addf %45, %51 : vector<256x64xf32>
    %c1_47 = arith.constant 1 : index
    %c8_48 = arith.constant 8 : index
    %c0_49 = arith.constant 0 : index
    %53 = vector.load %arg9[%c1_47, %c8_48, %c0_49] : memref<18x32x32xf32, #tpu.memory_space<vmem>>, vector<16x16x32xf32>
    %54 = vector.shape_cast %53 : vector<16x16x32xf32> to vector<256x32xf32>
    %55 = arith.truncf %54 : vector<256x32xf32> to vector<256x32xbf16>
    %c4 = arith.constant 4 : index
    %c0_50 = arith.constant 0 : index
    %c0_51 = arith.constant 0 : index
    %56 = vector.load %arg4[%c4, %c0_50, %c0_51] : memref<9x32x64xbf16, #tpu.memory_space<vmem>>, vector<1x32x64xbf16>
    %57 = vector.shape_cast %56 : vector<1x32x64xbf16> to vector<32x64xbf16>
    %cst_52 = arith.constant dense<0.000000e+00> : vector<256x64xf32>
    %58 = tpu.matmul %55, %57, %cst_52 {dimension_numbers = #tpu.dot_dimension_numbers<[1], [0], [0], [1], [0, 0, 1, 1], [], []>} : vector<256x32xbf16>, vector<32x64xbf16>, vector<256x64xf32> -> vector<256x64xf32>
    %59 = arith.addf %52, %58 : vector<256x64xf32>
    %c1_53 = arith.constant 1 : index
    %c9_54 = arith.constant 9 : index
    %c0_55 = arith.constant 0 : index
    %60 = vector.load %arg9[%c1_53, %c9_54, %c0_55] : memref<18x32x32xf32, #tpu.memory_space<vmem>>, vector<16x16x32xf32>
    %61 = vector.shape_cast %60 : vector<16x16x32xf32> to vector<256x32xf32>
    %62 = arith.truncf %61 : vector<256x32xf32> to vector<256x32xbf16>
    %c5 = arith.constant 5 : index
    %c0_56 = arith.constant 0 : index
    %c0_57 = arith.constant 0 : index
    %63 = vector.load %arg4[%c5, %c0_56, %c0_57] : memref<9x32x64xbf16, #tpu.memory_space<vmem>>, vector<1x32x64xbf16>
    %64 = vector.shape_cast %63 : vector<1x32x64xbf16> to vector<32x64xbf16>
    %cst_58 = arith.constant dense<0.000000e+00> : vector<256x64xf32>
    %65 = tpu.matmul %62, %64, %cst_58 {dimension_numbers = #tpu.dot_dimension_numbers<[1], [0], [0], [1], [0, 0, 1, 1], [], []>} : vector<256x32xbf16>, vector<32x64xbf16>, vector<256x64xf32> -> vector<256x64xf32>
    %66 = arith.addf %59, %65 : vector<256x64xf32>
    %c2_59 = arith.constant 2 : index
    %c7_60 = arith.constant 7 : index
    %c0_61 = arith.constant 0 : index
    %67 = vector.load %arg9[%c2_59, %c7_60, %c0_61] : memref<18x32x32xf32, #tpu.memory_space<vmem>>, vector<16x16x32xf32>
    %68 = vector.shape_cast %67 : vector<16x16x32xf32> to vector<256x32xf32>
    %69 = arith.truncf %68 : vector<256x32xf32> to vector<256x32xbf16>
    %c6 = arith.constant 6 : index
    %c0_62 = arith.constant 0 : index
    %c0_63 = arith.constant 0 : index
    %70 = vector.load %arg4[%c6, %c0_62, %c0_63] : memref<9x32x64xbf16, #tpu.memory_space<vmem>>, vector<1x32x64xbf16>
    %71 = vector.shape_cast %70 : vector<1x32x64xbf16> to vector<32x64xbf16>
    %cst_64 = arith.constant dense<0.000000e+00> : vector<256x64xf32>
    %72 = tpu.matmul %69, %71, %cst_64 {dimension_numbers = #tpu.dot_dimension_numbers<[1], [0], [0], [1], [0, 0, 1, 1], [], []>} : vector<256x32xbf16>, vector<32x64xbf16>, vector<256x64xf32> -> vector<256x64xf32>
    %73 = arith.addf %66, %72 : vector<256x64xf32>
    %c2_65 = arith.constant 2 : index
    %c8_66 = arith.constant 8 : index
    %c0_67 = arith.constant 0 : index
    %74 = vector.load %arg9[%c2_65, %c8_66, %c0_67] : memref<18x32x32xf32, #tpu.memory_space<vmem>>, vector<16x16x32xf32>
    %75 = vector.shape_cast %74 : vector<16x16x32xf32> to vector<256x32xf32>
    %76 = arith.truncf %75 : vector<256x32xf32> to vector<256x32xbf16>
    %c7_68 = arith.constant 7 : index
    %c0_69 = arith.constant 0 : index
    %c0_70 = arith.constant 0 : index
    %77 = vector.load %arg4[%c7_68, %c0_69, %c0_70] : memref<9x32x64xbf16, #tpu.memory_space<vmem>>, vector<1x32x64xbf16>
    %78 = vector.shape_cast %77 : vector<1x32x64xbf16> to vector<32x64xbf16>
    %cst_71 = arith.constant dense<0.000000e+00> : vector<256x64xf32>
    %79 = tpu.matmul %76, %78, %cst_71 {dimension_numbers = #tpu.dot_dimension_numbers<[1], [0], [0], [1], [0, 0, 1, 1], [], []>} : vector<256x32xbf16>, vector<32x64xbf16>, vector<256x64xf32> -> vector<256x64xf32>
    %80 = arith.addf %73, %79 : vector<256x64xf32>
    %c2_72 = arith.constant 2 : index
    %c9_73 = arith.constant 9 : index
    %c0_74 = arith.constant 0 : index
    %81 = vector.load %arg9[%c2_72, %c9_73, %c0_74] : memref<18x32x32xf32, #tpu.memory_space<vmem>>, vector<16x16x32xf32>
    %82 = vector.shape_cast %81 : vector<16x16x32xf32> to vector<256x32xf32>
    %83 = arith.truncf %82 : vector<256x32xf32> to vector<256x32xbf16>
    %c8_75 = arith.constant 8 : index
    %c0_76 = arith.constant 0 : index
    %c0_77 = arith.constant 0 : index
    %84 = vector.load %arg4[%c8_75, %c0_76, %c0_77] : memref<9x32x64xbf16, #tpu.memory_space<vmem>>, vector<1x32x64xbf16>
    %85 = vector.shape_cast %84 : vector<1x32x64xbf16> to vector<32x64xbf16>
    %cst_78 = arith.constant dense<0.000000e+00> : vector<256x64xf32>
    %86 = tpu.matmul %83, %85, %cst_78 {dimension_numbers = #tpu.dot_dimension_numbers<[1], [0], [0], [1], [0, 0, 1, 1], [], []>} : vector<256x32xbf16>, vector<32x64xbf16>, vector<256x64xf32> -> vector<256x64xf32>
    %87 = arith.addf %80, %86 : vector<256x64xf32>
    %c0_79 = arith.constant 0 : index
    %c0_80 = arith.constant 0 : index
    %88 = vector.load %arg5[%c0_79, %c0_80] : memref<1x64xf32, #tpu.memory_space<vmem>>, vector<1x64xf32>
    %89 = vector.broadcast %88 : vector<1x64xf32> to vector<256x64xf32>
    %90 = arith.addf %87, %89 : vector<256x64xf32>
    %cst_81 = arith.constant 0.000000e+00 : f32
    %91 = vector.broadcast %cst_81 : f32 to vector<256x64xf32>
    %92 = arith.maximumf %90, %91 : vector<256x64xf32>
    %93 = vector.shape_cast %92 : vector<256x64xf32> to vector<8x32x64xf32>
    %94 = vector.extract_strided_slice %93 {offsets = [0, 0, 0], sizes = [8, 16, 64], strides = [1, 1, 1]} : vector<8x32x64xf32> to vector<8x16x64xf32>
    %95 = vector.extract_strided_slice %93 {offsets = [0, 16, 0], sizes = [8, 16, 64], strides = [1, 1, 1]} : vector<8x32x64xf32> to vector<8x16x64xf32>
    %96 = arith.maximumf %94, %95 : vector<8x16x64xf32>
    %97 = vector.shape_cast %96 : vector<8x16x64xf32> to vector<128x64xf32>
    %c0_82 = arith.constant 0 : index
    %c0_83 = arith.constant 0 : index
    %98 = vector.load %arg12[%c0_82, %c0_83] : memref<128x64xf32, #tpu.memory_space<vmem>>, vector<128x64xf32>
    tpu.vector_store %arg12[%c0_82, %c0_83], %97 {strides = array<i32>} : memref<128x64xf32, #tpu.memory_space<vmem>>, vector<128x64xf32>,
    %c0_84 = arith.constant 0 : index
    %c0_85 = arith.constant 0 : index
    %99 = tpu.strided_load %arg12[%c0_84, %c0_85] {strides = array<i32: 2, 1>} : memref<128x64xf32, #tpu.memory_space<vmem>>, vector<64x64xf32>
    %c1_86 = arith.constant 1 : index
    %c0_87 = arith.constant 0 : index
    %100 = tpu.strided_load %arg12[%c1_86, %c0_87] {strides = array<i32: 2, 1>} : memref<128x64xf32, #tpu.memory_space<vmem>>, vector<64x64xf32>
    %101 = arith.maximumf %99, %100 : vector<64x64xf32>
    %102 = vector.shape_cast %101 : vector<64x64xf32> to vector<8x8x64xf32>
    %c1_88 = arith.constant 1 : index
    %c8_89 = arith.constant 8 : index
    %c0_90 = arith.constant 0 : index
    %103 = vector.load %arg10[%c1_88, %c8_89, %c0_90] : memref<10x24x64xf32, #tpu.memory_space<vmem>>, vector<8x8x64xf32>
    tpu.vector_store %arg10[%c1_88, %c8_89, %c0_90], %102 {strides = array<i32>} : memref<10x24x64xf32, #tpu.memory_space<vmem>>, vector<8x8x64xf32>,
    %cst_91 = arith.constant 0.000000e+00 : f32
    %104 = vector.broadcast %cst_91 : f32 to vector<64x128xf32>
    %c0_92 = arith.constant 0 : index
    %c7_93 = arith.constant 7 : index
    %c0_94 = arith.constant 0 : index
    %105 = vector.load %arg10[%c0_92, %c7_93, %c0_94] : memref<10x24x64xf32, #tpu.memory_space<vmem>>, vector<8x8x64xf32>
    %106 = vector.shape_cast %105 : vector<8x8x64xf32> to vector<64x64xf32>
    %107 = arith.truncf %106 : vector<64x64xf32> to vector<64x64xbf16>
    %c0_95 = arith.constant 0 : index
    %c0_96 = arith.constant 0 : index
    %c0_97 = arith.constant 0 : index
    %108 = vector.load %arg6[%c0_95, %c0_96, %c0_97] : memref<9x64x128xbf16, #tpu.memory_space<vmem>>, vector<1x64x128xbf16>
    %109 = vector.shape_cast %108 : vector<1x64x128xbf16> to vector<64x128xbf16>
    %cst_98 = arith.constant dense<0.000000e+00> : vector<64x128xf32>
    %110 = tpu.matmul %107, %109, %cst_98 {dimension_numbers = #tpu.dot_dimension_numbers<[1], [0], [0], [1], [0, 0, 1, 1], [], []>} : vector<64x64xbf16>, vector<64x128xbf16>, vector<64x128xf32> -> vector<64x128xf32>
    %111 = arith.addf %104, %110 : vector<64x128xf32>
    %c0_99 = arith.constant 0 : index
    %c8_100 = arith.constant 8 : index
    %c0_101 = arith.constant 0 : index
    %112 = vector.load %arg10[%c0_99, %c8_100, %c0_101] : memref<10x24x64xf32, #tpu.memory_space<vmem>>, vector<8x8x64xf32>
    %113 = vector.shape_cast %112 : vector<8x8x64xf32> to vector<64x64xf32>
    %114 = arith.truncf %113 : vector<64x64xf32> to vector<64x64xbf16>
    %c1_102 = arith.constant 1 : index
    %c0_103 = arith.constant 0 : index
    %c0_104 = arith.constant 0 : index
    %115 = vector.load %arg6[%c1_102, %c0_103, %c0_104] : memref<9x64x128xbf16, #tpu.memory_space<vmem>>, vector<1x64x128xbf16>
    %116 = vector.shape_cast %115 : vector<1x64x128xbf16> to vector<64x128xbf16>
    %cst_105 = arith.constant dense<0.000000e+00> : vector<64x128xf32>
    %117 = tpu.matmul %114, %116, %cst_105 {dimension_numbers = #tpu.dot_dimension_numbers<[1], [0], [0], [1], [0, 0, 1, 1], [], []>} : vector<64x64xbf16>, vector<64x128xbf16>, vector<64x128xf32> -> vector<64x128xf32>
    %118 = arith.addf %111, %117 : vector<64x128xf32>
    %c0_106 = arith.constant 0 : index
    %c9_107 = arith.constant 9 : index
    %c0_108 = arith.constant 0 : index
    %119 = vector.load %arg10[%c0_106, %c9_107, %c0_108] : memref<10x24x64xf32, #tpu.memory_space<vmem>>, vector<8x8x64xf32>
    %120 = vector.shape_cast %119 : vector<8x8x64xf32> to vector<64x64xf32>
    %121 = arith.truncf %120 : vector<64x64xf32> to vector<64x64xbf16>
    %c2_109 = arith.constant 2 : index
    %c0_110 = arith.constant 0 : index
    %c0_111 = arith.constant 0 : index
    %122 = vector.load %arg6[%c2_109, %c0_110, %c0_111] : memref<9x64x128xbf16, #tpu.memory_space<vmem>>, vector<1x64x128xbf16>
    %123 = vector.shape_cast %122 : vector<1x64x128xbf16> to vector<64x128xbf16>
    %cst_112 = arith.constant dense<0.000000e+00> : vector<64x128xf32>
    %124 = tpu.matmul %121, %123, %cst_112 {dimension_numbers = #tpu.dot_dimension_numbers<[1], [0], [0], [1], [0, 0, 1, 1], [], []>} : vector<64x64xbf16>, vector<64x128xbf16>, vector<64x128xf32> -> vector<64x128xf32>
    %125 = arith.addf %118, %124 : vector<64x128xf32>
    %c1_113 = arith.constant 1 : index
    %c7_114 = arith.constant 7 : index
    %c0_115 = arith.constant 0 : index
    %126 = vector.load %arg10[%c1_113, %c7_114, %c0_115] : memref<10x24x64xf32, #tpu.memory_space<vmem>>, vector<8x8x64xf32>
    %127 = vector.shape_cast %126 : vector<8x8x64xf32> to vector<64x64xf32>
    %128 = arith.truncf %127 : vector<64x64xf32> to vector<64x64xbf16>
    %c3_116 = arith.constant 3 : index
    %c0_117 = arith.constant 0 : index
    %c0_118 = arith.constant 0 : index
    %129 = vector.load %arg6[%c3_116, %c0_117, %c0_118] : memref<9x64x128xbf16, #tpu.memory_space<vmem>>, vector<1x64x128xbf16>
    %130 = vector.shape_cast %129 : vector<1x64x128xbf16> to vector<64x128xbf16>
    %cst_119 = arith.constant dense<0.000000e+00> : vector<64x128xf32>
    %131 = tpu.matmul %128, %130, %cst_119 {dimension_numbers = #tpu.dot_dimension_numbers<[1], [0], [0], [1], [0, 0, 1, 1], [], []>} : vector<64x64xbf16>, vector<64x128xbf16>, vector<64x128xf32> -> vector<64x128xf32>
    %132 = arith.addf %125, %131 : vector<64x128xf32>
    %c1_120 = arith.constant 1 : index
    %c8_121 = arith.constant 8 : index
    %c0_122 = arith.constant 0 : index
    %133 = vector.load %arg10[%c1_120, %c8_121, %c0_122] : memref<10x24x64xf32, #tpu.memory_space<vmem>>, vector<8x8x64xf32>
    %134 = vector.shape_cast %133 : vector<8x8x64xf32> to vector<64x64xf32>
    %135 = arith.truncf %134 : vector<64x64xf32> to vector<64x64xbf16>
    %c4_123 = arith.constant 4 : index
    %c0_124 = arith.constant 0 : index
    %c0_125 = arith.constant 0 : index
    %136 = vector.load %arg6[%c4_123, %c0_124, %c0_125] : memref<9x64x128xbf16, #tpu.memory_space<vmem>>, vector<1x64x128xbf16>
    %137 = vector.shape_cast %136 : vector<1x64x128xbf16> to vector<64x128xbf16>
    %cst_126 = arith.constant dense<0.000000e+00> : vector<64x128xf32>
    %138 = tpu.matmul %135, %137, %cst_126 {dimension_numbers = #tpu.dot_dimension_numbers<[1], [0], [0], [1], [0, 0, 1, 1], [], []>} : vector<64x64xbf16>, vector<64x128xbf16>, vector<64x128xf32> -> vector<64x128xf32>
    %139 = arith.addf %132, %138 : vector<64x128xf32>
    %c1_127 = arith.constant 1 : index
    %c9_128 = arith.constant 9 : index
    %c0_129 = arith.constant 0 : index
    %140 = vector.load %arg10[%c1_127, %c9_128, %c0_129] : memref<10x24x64xf32, #tpu.memory_space<vmem>>, vector<8x8x64xf32>
    %141 = vector.shape_cast %140 : vector<8x8x64xf32> to vector<64x64xf32>
    %142 = arith.truncf %141 : vector<64x64xf32> to vector<64x64xbf16>
    %c5_130 = arith.constant 5 : index
    %c0_131 = arith.constant 0 : index
    %c0_132 = arith.constant 0 : index
    %143 = vector.load %arg6[%c5_130, %c0_131, %c0_132] : memref<9x64x128xbf16, #tpu.memory_space<vmem>>, vector<1x64x128xbf16>
    %144 = vector.shape_cast %143 : vector<1x64x128xbf16> to vector<64x128xbf16>
    %cst_133 = arith.constant dense<0.000000e+00> : vector<64x128xf32>
    %145 = tpu.matmul %142, %144, %cst_133 {dimension_numbers = #tpu.dot_dimension_numbers<[1], [0], [0], [1], [0, 0, 1, 1], [], []>} : vector<64x64xbf16>, vector<64x128xbf16>, vector<64x128xf32> -> vector<64x128xf32>
    %146 = arith.addf %139, %145 : vector<64x128xf32>
    %c2_134 = arith.constant 2 : index
    %c7_135 = arith.constant 7 : index
    %c0_136 = arith.constant 0 : index
    %147 = vector.load %arg10[%c2_134, %c7_135, %c0_136] : memref<10x24x64xf32, #tpu.memory_space<vmem>>, vector<8x8x64xf32>
    %148 = vector.shape_cast %147 : vector<8x8x64xf32> to vector<64x64xf32>
    %149 = arith.truncf %148 : vector<64x64xf32> to vector<64x64xbf16>
    %c6_137 = arith.constant 6 : index
    %c0_138 = arith.constant 0 : index
    %c0_139 = arith.constant 0 : index
    %150 = vector.load %arg6[%c6_137, %c0_138, %c0_139] : memref<9x64x128xbf16, #tpu.memory_space<vmem>>, vector<1x64x128xbf16>
    %151 = vector.shape_cast %150 : vector<1x64x128xbf16> to vector<64x128xbf16>
    %cst_140 = arith.constant dense<0.000000e+00> : vector<64x128xf32>
    %152 = tpu.matmul %149, %151, %cst_140 {dimension_numbers = #tpu.dot_dimension_numbers<[1], [0], [0], [1], [0, 0, 1, 1], [], []>} : vector<64x64xbf16>, vector<64x128xbf16>, vector<64x128xf32> -> vector<64x128xf32>
    %153 = arith.addf %146, %152 : vector<64x128xf32>
    %c2_141 = arith.constant 2 : index
    %c8_142 = arith.constant 8 : index
    %c0_143 = arith.constant 0 : index
    %154 = vector.load %arg10[%c2_141, %c8_142, %c0_143] : memref<10x24x64xf32, #tpu.memory_space<vmem>>, vector<8x8x64xf32>
    %155 = vector.shape_cast %154 : vector<8x8x64xf32> to vector<64x64xf32>
    %156 = arith.truncf %155 : vector<64x64xf32> to vector<64x64xbf16>
    %c7_144 = arith.constant 7 : index
    %c0_145 = arith.constant 0 : index
    %c0_146 = arith.constant 0 : index
    %157 = vector.load %arg6[%c7_144, %c0_145, %c0_146] : memref<9x64x128xbf16, #tpu.memory_space<vmem>>, vector<1x64x128xbf16>
    %158 = vector.shape_cast %157 : vector<1x64x128xbf16> to vector<64x128xbf16>
    %cst_147 = arith.constant dense<0.000000e+00> : vector<64x128xf32>
    %159 = tpu.matmul %156, %158, %cst_147 {dimension_numbers = #tpu.dot_dimension_numbers<[1], [0], [0], [1], [0, 0, 1, 1], [], []>} : vector<64x64xbf16>, vector<64x128xbf16>, vector<64x128xf32> -> vector<64x128xf32>
    %160 = arith.addf %153, %159 : vector<64x128xf32>
    %c2_148 = arith.constant 2 : index
    %c9_149 = arith.constant 9 : index
    %c0_150 = arith.constant 0 : index
    %161 = vector.load %arg10[%c2_148, %c9_149, %c0_150] : memref<10x24x64xf32, #tpu.memory_space<vmem>>, vector<8x8x64xf32>
    %162 = vector.shape_cast %161 : vector<8x8x64xf32> to vector<64x64xf32>
    %163 = arith.truncf %162 : vector<64x64xf32> to vector<64x64xbf16>
    %c8_151 = arith.constant 8 : index
    %c0_152 = arith.constant 0 : index
    %c0_153 = arith.constant 0 : index
    %164 = vector.load %arg6[%c8_151, %c0_152, %c0_153] : memref<9x64x128xbf16, #tpu.memory_space<vmem>>, vector<1x64x128xbf16>
    %165 = vector.shape_cast %164 : vector<1x64x128xbf16> to vector<64x128xbf16>
    %cst_154 = arith.constant dense<0.000000e+00> : vector<64x128xf32>
    %166 = tpu.matmul %163, %165, %cst_154 {dimension_numbers = #tpu.dot_dimension_numbers<[1], [0], [0], [1], [0, 0, 1, 1], [], []>} : vector<64x64xbf16>, vector<64x128xbf16>, vector<64x128xf32> -> vector<64x128xf32>
    %167 = arith.addf %160, %166 : vector<64x128xf32>
    %c0_155 = arith.constant 0 : index
    %c0_156 = arith.constant 0 : index
    %168 = vector.load %arg7[%c0_155, %c0_156] : memref<1x128xf32, #tpu.memory_space<vmem>>, vector<1x128xf32>
    %169 = vector.broadcast %168 : vector<1x128xf32> to vector<64x128xf32>
    %170 = arith.addf %167, %169 : vector<64x128xf32>
    %cst_157 = arith.constant 0.000000e+00 : f32
    %171 = vector.broadcast %cst_157 : f32 to vector<64x128xf32>
    %172 = arith.maximumf %170, %171 : vector<64x128xf32>
    %173 = vector.shape_cast %172 : vector<64x128xf32> to vector<4x16x128xf32>
    %174 = vector.extract_strided_slice %173 {offsets = [0, 0, 0], sizes = [4, 8, 128], strides = [1, 1, 1]} : vector<4x16x128xf32> to vector<4x8x128xf32>
    %175 = vector.extract_strided_slice %173 {offsets = [0, 8, 0], sizes = [4, 8, 128], strides = [1, 1, 1]} : vector<4x16x128xf32> to vector<4x8x128xf32>
    %176 = arith.maximumf %174, %175 : vector<4x8x128xf32>
    %177 = vector.shape_cast %176 : vector<4x8x128xf32> to vector<32x128xf32>
    %c0_158 = arith.constant 0 : index
    %c0_159 = arith.constant 0 : index
    %178 = vector.load %arg13[%c0_158, %c0_159] : memref<32x128xf32, #tpu.memory_space<vmem>>, vector<32x128xf32>
    tpu.vector_store %arg13[%c0_158, %c0_159], %177 {strides = array<i32>} : memref<32x128xf32, #tpu.memory_space<vmem>>, vector<32x128xf32>,
    %c0_160 = arith.constant 0 : index
    %c0_161 = arith.constant 0 : index
    %179 = tpu.strided_load %arg13[%c0_160, %c0_161] {strides = array<i32: 2, 1>} : memref<32x128xf32, #tpu.memory_space<vmem>>, vector<16x128xf32>
    %c1_162 = arith.constant 1 : index
    %c0_163 = arith.constant 0 : index
    %180 = tpu.strided_load %arg13[%c1_162, %c0_163] {strides = array<i32: 2, 1>} : memref<32x128xf32, #tpu.memory_space<vmem>>, vector<16x128xf32>
    %181 = arith.maximumf %179, %180 : vector<16x128xf32>
    %182 = arith.truncf %181 : vector<16x128xf32> to vector<16x128xbf16>
    %c0_164 = arith.constant 0 : index
    %c0_165 = arith.constant 0 : index
    %c0_166 = arith.constant 0 : index
    %183 = vector.load %arg8[%c0_164, %c0_165, %c0_166] : memref<1x16x128xbf16, #tpu.memory_space<vmem>>, vector<1x16x128xbf16>
    %184 = vector.shape_cast %183 : vector<1x16x128xbf16> to vector<16x128xbf16>
    %185 = vector.shape_cast %182 : vector<16x128xbf16> to vector<1x16x128xbf16>
    tpu.vector_store %arg8[%c0_164, %c0_165, %c0_166], %185 {strides = array<i32>} : memref<1x16x128xbf16, #tpu.memory_space<vmem>>, vector<1x16x128xbf16>,
    return
  }
  func.func @transform_0(%arg0: i32) -> (i32, i32, i32) {
    %c0_i32 = arith.constant 0 : i32
    %c0_i32_0 = arith.constant 0 : i32
    %c0_i32_1 = arith.constant 0 : i32
    return %arg0, %c0_i32, %c0_i32_0 : i32, i32, i32
  }
  func.func @transform_1(%arg0: i32) -> (i32, i32) {
    %c0_i32 = arith.constant 0 : i32
    %c0_i32_0 = arith.constant 0 : i32
    %c0_i32_1 = arith.constant 0 : i32
    return %c0_i32, %c0_i32_0 : i32, i32
  }
  func.func @transform_2(%arg0: i32) -> (i32, i32) {
    %c0_i32 = arith.constant 0 : i32
    %c0_i32_0 = arith.constant 0 : i32
    %c0_i32_1 = arith.constant 0 : i32
    return %c0_i32, %c0_i32_0 : i32, i32
  }
  func.func @transform_3(%arg0: i32) -> (i32, i32, i32) {
    %c0_i32 = arith.constant 0 : i32
    %c0_i32_0 = arith.constant 0 : i32
    %c0_i32_1 = arith.constant 0 : i32
    %c0_i32_2 = arith.constant 0 : i32
    return %c0_i32, %c0_i32_0, %c0_i32_1 : i32, i32, i32
  }
  func.func @transform_4(%arg0: i32) -> (i32, i32) {
    %c0_i32 = arith.constant 0 : i32
    %c0_i32_0 = arith.constant 0 : i32
    %c0_i32_1 = arith.constant 0 : i32
    return %c0_i32, %c0_i32_0 : i32, i32
  }
  func.func @transform_5(%arg0: i32) -> (i32, i32, i32) {
    %c0_i32 = arith.constant 0 : i32
    %c0_i32_0 = arith.constant 0 : i32
    %c0_i32_1 = arith.constant 0 : i32
    %c0_i32_2 = arith.constant 0 : i32
    return %c0_i32, %c0_i32_0, %c0_i32_1 : i32, i32, i32
  }
  func.func @transform_6(%arg0: i32) -> (i32, i32) {
    %c0_i32 = arith.constant 0 : i32
    %c0_i32_0 = arith.constant 0 : i32
    %c0_i32_1 = arith.constant 0 : i32
    return %c0_i32, %c0_i32_0 : i32, i32
  }
  func.func @transform_7(%arg0: i32) -> (i32, i32, i32) {
    %c0_i32 = arith.constant 0 : i32
    %c0_i32_0 = arith.constant 0 : i32
    %c0_i32_1 = arith.constant 0 : i32
    return %arg0, %c0_i32, %c0_i32_0 : i32, i32, i32
  }
}

module attributes {stable_mosaic.version = 11 : i64} {
  func.func @mlp_kernel(%arg0: i32, %arg1: memref<2x2048xbf16, #tpu.memory_space<vmem>>, %arg2: memref<2048x512xbf16, #tpu.memory_space<vmem>>, %arg3: memref<1x512xf32, #tpu.memory_space<vmem>>, %arg4: memref<512x10xbf16, #tpu.memory_space<vmem>>, %arg5: memref<1x10xf32, #tpu.memory_space<vmem>>, %arg6: memref<2x10xf32, #tpu.memory_space<vmem>>) attributes {dimension_semantics = [#tpu.dimension_semantics<parallel>], iteration_bounds = array<i64: 1>, scalar_prefetch = 0 : i64, scratch_operands = 0 : i64, tpu.core_type = #tpu.core_type<tc>, window_params = [{transform_indices = @transform_0, window_bounds = array<i64: 2, 2048>}, {pipeline_mode = #tpu.pipeline_mode<synchronous>, transform_indices = @transform_1, window_bounds = array<i64: 2048, 512>}, {pipeline_mode = #tpu.pipeline_mode<synchronous>, transform_indices = @transform_2, window_bounds = array<i64: 1, 512>}, {pipeline_mode = #tpu.pipeline_mode<synchronous>, transform_indices = @transform_3, window_bounds = array<i64: 512, 10>}, {pipeline_mode = #tpu.pipeline_mode<synchronous>, transform_indices = @transform_4, window_bounds = array<i64: 1, 10>}, {transform_indices = @transform_5, window_bounds = array<i64: 2, 10>}]} {
    %c0 = arith.constant 0 : index
    %c0_0 = arith.constant 0 : index
    %0 = vector.load %arg1[%c0, %c0_0] : memref<2x2048xbf16, #tpu.memory_space<vmem>>, vector<2x2048xbf16>
    %c0_1 = arith.constant 0 : index
    %c0_2 = arith.constant 0 : index
    %1 = vector.load %arg2[%c0_1, %c0_2] : memref<2048x512xbf16, #tpu.memory_space<vmem>>, vector<2048x512xbf16>
    %cst = arith.constant dense<0.000000e+00> : vector<2x512xf32>
    %2 = tpu.matmul %0, %1, %cst {dimension_numbers = #tpu.dot_dimension_numbers<[1], [0], [0], [1], [0, 0, 1, 1], [], []>} : vector<2x2048xbf16>, vector<2048x512xbf16>, vector<2x512xf32> -> vector<2x512xf32>
    %c0_3 = arith.constant 0 : index
    %c0_4 = arith.constant 0 : index
    %3 = vector.load %arg3[%c0_3, %c0_4] : memref<1x512xf32, #tpu.memory_space<vmem>>, vector<1x512xf32>
    %4 = vector.broadcast %3 : vector<1x512xf32> to vector<2x512xf32>
    %5 = arith.addf %2, %4 : vector<2x512xf32>
    %cst_5 = arith.constant 0.000000e+00 : f32
    %6 = vector.broadcast %cst_5 : f32 to vector<2x512xf32>
    %7 = arith.maximumf %5, %6 : vector<2x512xf32>
    %8 = arith.truncf %7 : vector<2x512xf32> to vector<2x512xbf16>
    %c0_6 = arith.constant 0 : index
    %c0_7 = arith.constant 0 : index
    %9 = vector.load %arg4[%c0_6, %c0_7] : memref<512x10xbf16, #tpu.memory_space<vmem>>, vector<512x10xbf16>
    %cst_8 = arith.constant dense<0.000000e+00> : vector<2x10xf32>
    %10 = tpu.matmul %8, %9, %cst_8 {dimension_numbers = #tpu.dot_dimension_numbers<[1], [0], [0], [1], [0, 0, 1, 1], [], []>} : vector<2x512xbf16>, vector<512x10xbf16>, vector<2x10xf32> -> vector<2x10xf32>
    %c0_9 = arith.constant 0 : index
    %c0_10 = arith.constant 0 : index
    %11 = vector.load %arg5[%c0_9, %c0_10] : memref<1x10xf32, #tpu.memory_space<vmem>>, vector<1x10xf32>
    %12 = vector.broadcast %11 : vector<1x10xf32> to vector<2x10xf32>
    %13 = arith.addf %10, %12 : vector<2x10xf32>
    %c0_11 = arith.constant 0 : index
    %c0_12 = arith.constant 0 : index
    %14 = vector.load %arg6[%c0_11, %c0_12] : memref<2x10xf32, #tpu.memory_space<vmem>>, vector<2x10xf32>
    tpu.vector_store %arg6[%c0_11, %c0_12], %13 {strides = array<i32>} : memref<2x10xf32, #tpu.memory_space<vmem>>, vector<2x10xf32>,
    return
  }
  func.func @transform_0(%arg0: i32) -> (i32, i32) {
    %c0_i32 = arith.constant 0 : i32
    %c0_i32_0 = arith.constant 0 : i32
    return %arg0, %c0_i32 : i32, i32
  }
  func.func @transform_1(%arg0: i32) -> (i32, i32) {
    %c0_i32 = arith.constant 0 : i32
    %c0_i32_0 = arith.constant 0 : i32
    %c0_i32_1 = arith.constant 0 : i32
    return %c0_i32, %c0_i32_0 : i32, i32
  }
  func.func @transform_2(%arg0: i32) -> (i32, i32) {
    %c0_i32 = arith.constant 0 : i32
    %c0_i32_0 = arith.constant 0 : i32
    %c0_i32_1 = arith.constant 0 : i32
    return %c0_i32, %c0_i32_0 : i32, i32
  }
  func.func @transform_3(%arg0: i32) -> (i32, i32) {
    %c0_i32 = arith.constant 0 : i32
    %c0_i32_0 = arith.constant 0 : i32
    %c0_i32_1 = arith.constant 0 : i32
    return %c0_i32, %c0_i32_0 : i32, i32
  }
  func.func @transform_4(%arg0: i32) -> (i32, i32) {
    %c0_i32 = arith.constant 0 : i32
    %c0_i32_0 = arith.constant 0 : i32
    %c0_i32_1 = arith.constant 0 : i32
    return %c0_i32, %c0_i32_0 : i32, i32
  }
  func.func @transform_5(%arg0: i32) -> (i32, i32) {
    %c0_i32 = arith.constant 0 : i32
    %c0_i32_0 = arith.constant 0 : i32
    return %arg0, %c0_i32 : i32, i32
  }
}

</mosaic_0001>

<bundles_post_ra>
// kernel: net_forward.2
= control target key start
LH: loop header
LB: loop body
LE: loop exit
PB: predicated region body
PF: predicated region fallthrough
CT: control target
= control target key end

     0   :  { %s8037_s24 = smov 0   ;;  %s9471_s0 = inlined_call_operand.vmem [shape: bf16[2,1024,27], index: 0, kind: input, shape index: {}]   ;;  %s9472_s1 = inlined_call_operand.vmem [shape: bf16[27,32], index: 1, kind: input, shape index: {}]   ;;  %s9473_s2 = inlined_call_operand.vmem [shape: f32[1,32], index: 2, kind: input, shape index: {}]   ;;  %s9474_s3 = inlined_call_operand.vmem [shape: bf16[9,32,64], index: 3, kind: input, shape index: {}]   ;;  %s9475_s4 = inlined_call_operand.vmem [shape: f32[1,64], index: 4, kind: input, shape index: {}]   ;;  %s9476_s5 = inlined_call_operand.vmem [shape: bf16[9,64,128], index: 5, kind: input, shape index: {}]   ;;  %s9477_s6 = inlined_call_operand.vmem [shape: f32[1,128], index: 6, kind: input, shape index: {}]   ;;  %s9478_s7 = inlined_call_operand.vmem [shape: bf16[2,16,128], index: 7, kind: output, shape index: {}]  }
   0x1 LB: > { %s6147_s25 = sadd.s32 4294967295, %s7993_s24   ;;  %p6151_p0 = scmp.ge.s32.totalorder %s7993_s24, 1  ;;  %s7993_s24 = sphi %s8037_s24, %s17_s24  }
   0x2   : > { %p237_p1 = scmp.lt.s32.totalorder %s7993_s24, 3 }
   0x4   : > { %p238_p2 = pnand %p6151_p0, %p237_p1 }
   0x6   : > { %241 = sbr.rel (%p238_p2) target bundleno = 1542 (0x606), region = 48 }
   0xd   : > { %v7866_v0 = vld [vmem:[%s9472_s1] sm:$0xff]   ;;  %vm1047_vm0 = vcmask 1044480   ;;  %v7867_v1 = vld [vmem:[%s9472_s1 + $0x8] sm:$0x3f]   ;;  %vm1048_vm1 = vcmask 1045504   ;;  %p269_p3 = scmp.lt.s32.totalorder %s6147_s25, 1 }
   0xe   : > { %6932 = vmatprep.subr.bf16.mxu0 %v7866_v0  ;;  %v7995_v2 = vmov 65535   ;;  %vm854_vm2 = vcmask 220160   ;;  %vm280_vm3 = vcmask 261120   ;;  %v9479_v34 = vmov 0.0   ;;  %v7932_v40 = vld [vmem:[%s9474_s3 + $0x10] sm:$0xff]   ;;  %v7933_v41 = vld [vmem:[%s9474_s3 + $0x18] sm:$0xff]  }
   0xf   : > { %6933 = vmatpush3.bf16.msra.mxu0 %v7866_v0  ;;  %v1049_v3 = vsel %vm1047_vm0, 4294967295, %v7995_v2  ;;  %s9503_s25 = smov (!%p269_p3, %s6147_s25), 1  ;;  %287 = vst.msk [vmem:[#allocation2 + $0x30] sm:$0xff] %vm280_vm3, %v9479_v34  ;;  %281 = vst.msk [vmem:[#allocation2] sm:$0xff] %vm280_vm3, %v9479_v34  ;;  %v8323_v0 = vld [vmem:[%s9474_s3] sm:$0xff]   ;;  %v8333_v2 = vld [vmem:[%s9474_s3 + $0x8] sm:$0xff]  }
  0x10   : > { %v1050_v4 = vsel %vm1048_vm1, %v1049_v3, 0  ;;  %s6623_s30 = sshll.u32 %s9503_s25, 9  ;;  %282 = vst.msk [vmem:[#allocation2 + $0x8] sm:$0xff] %vm280_vm3, %v9479_v34  ;;  %283 = vst.msk [vmem:[#allocation2 + $0x10] sm:$0xff] %vm280_vm3, %v9479_v34  ;;  %7532 = vmatprep.subr.bf16.mxu1 %v8323_v0  ;;  %vm353_vm4 = vcmask 523264   ;;  %s6624_s22 = sshll.u32 %s9503_s25, 3 }
  0x11   : > { %v1052_v5 = vand.u32 %v7867_v1, %v1050_v4  ;;  %s8057_s10 = scalar_lea.vmem %s9471_s0, %s6623_s30  ;;  %284 = vst.msk [vmem:[#allocation2 + $0x18] sm:$0xff] %vm280_vm3, %v9479_v34  ;;  %285 = vst.msk [vmem:[#allocation2 + $0x20] sm:$0xff] %vm280_vm3, %v9479_v34  ;;  %7534 = vmatpush3.bf16.msra.mxu1 %v8323_v0  ;;  %s278_s27 = scalar_lea.vmem %s9478_s7, %s6624_s22 }
  0x12   : > { %v7868_v6 = vld [vmem:[%s8057_s10] sm:$0xff]   ;;  %v7869_v7 = vld [vmem:[%s8057_s10 + $0x8] sm:$0xff]   ;;  %v7870_v8 = vld [vmem:[%s8057_s10 + $0x10] sm:$0xff]   ;;  %286 = vst.msk [vmem:[#allocation2 + $0x28] sm:$0xff] %vm280_vm3, %v9479_v34  ;;  %7533 = vmatprep.subr.bf16.mxu1 %v8333_v2 }
  0x13   : > { %6934 = vmatprep.subr.bf16.mxu0 %v1052_v5  ;;  %6936 = vmatprep.mubr.msk.bf16.mxu0 %vm854_vm2, %v7868_v6  ;;  %v7871_v9 = vld [vmem:[%s8057_s10 + $0x18] sm:$0xff]   ;;  %v7872_v10 = vld [vmem:[%s8057_s10 + $0x20] sm:$0xff]   ;;  %v7873_v11 = vld [vmem:[%s8057_s10 + $0x28] sm:$0xff]   ;;  %288 = vst.msk [vmem:[#allocation2 + $0x38] sm:$0xff] %vm280_vm3, %v9479_v34 }
  0x14   : > { %6935 = vmatpush3.bf16.msra.mxu0 %v1052_v5  ;;  %v7874_v12 = vld [vmem:[%s8057_s10 + $0x30] sm:$0xff]   ;;  %v7875_v13 = vld [vmem:[%s8057_s10 + $0x38] sm:$0xff]   ;;  %v7876_v14 = vld [vmem:[%s8057_s10 + $0x40] sm:$0xff]   ;;  %289 = vst.msk [vmem:[#allocation2 + $0x40] sm:$0xff] %vm280_vm3, %v9479_v34 }
  0x15   : > { %v7877_v15 = vld [vmem:[%s8057_s10 + $0x48] sm:$0xff]   ;;  %v7878_v16 = vld [vmem:[%s8057_s10 + $0x50] sm:$0xff]   ;;  %v7879_v17 = vld [vmem:[%s8057_s10 + $0x58] sm:$0xff]   ;;  %290 = vst.msk [vmem:[#allocation2 + $0x48] sm:$0xff] %vm280_vm3, %v9479_v34  ;;  %7064 = vmatprep.subr.bf16.mxu0 %v7932_v40  ;;  %7535 = vmatpush3.bf16.msra.mxu1 %v8333_v2 }
  0x16   : > { %v7880_v18 = vld [vmem:[%s8057_s10 + $0x60] sm:$0xff]   ;;  %v7881_v19 = vld [vmem:[%s8057_s10 + $0x68] sm:$0xff]   ;;  %v7882_v20 = vld [vmem:[%s8057_s10 + $0x70] sm:$0xff]   ;;  %291 = vst.msk [vmem:[#allocation2 + $0x50] sm:$0xff] %vm280_vm3, %v9479_v34 }
  0x17   : > { %6937 = vmatmul.mubr.msk.bf16.vlgmr.msra.gmra.mrb[0].mxu0 %vm854_vm2, %v7869_v7  ;;  %v7883_v21 = vld [vmem:[%s8057_s10 + $0x78] sm:$0xff]   ;;  %v7884_v22 = vld [vmem:[%s8057_s10 + $0x80] sm:$0xff]   ;;  %v7885_v23 = vld [vmem:[%s8057_s10 + $0x88] sm:$0xff]   ;;  %292 = vst.msk [vmem:[#allocation2 + $0x58] sm:$0xff] %vm280_vm3, %v9479_v34 }
  0x18   : > { %6940 = vmatprep.mubr.msk.bf16.mxu0 %vm854_vm2, %v7870_v8  ;;  %v7886_v24 = vld [vmem:[%s8057_s10 + $0x90] sm:$0xff]   ;;  %v7887_v25 = vld [vmem:[%s8057_s10 + $0x98] sm:$0xff]   ;;  %v7888_v26 = vld [vmem:[%s8057_s10 + $0xa0] sm:$0xff]   ;;  %293 = vst.msk [vmem:[#allocation2 + $0x60] sm:$0xff] %vm280_vm3, %v9479_v34  ;;  %7065 = vmatpush3.bf16.msra.mxu0 %v7932_v40 }
  0x19   : > { %v7889_v27 = vld [vmem:[%s8057_s10 + $0xa8] sm:$0xff]   ;;  %v7890_v28 = vld [vmem:[%s8057_s10 + $0xb0] sm:$0xff]   ;;  %v7891_v29 = vld [vmem:[%s8057_s10 + $0xb8] sm:$0xff]   ;;  %294 = vst.msk [vmem:[#allocation2 + $0x68] sm:$0xff] %vm280_vm3, %v9479_v34  ;;  %7066 = vmatprep.subr.bf16.mxu0 %v7933_v41 }
  0x1a   : > { %v7892_v30 = vld [vmem:[%s8057_s10 + $0xc0] sm:$0xff]   ;;  %v7893_v31 = vld [vmem:[%s8057_s10 + $0xc8] sm:$0xff]   ;;  %v7894_v32 = vld [vmem:[%s8057_s10 + $0xd0] sm:$0xff]   ;;  %295 = vst.msk [vmem:[#allocation2 + $0x70] sm:$0xff] %vm280_vm3, %v9479_v34 }
  0x1b   : > { %v8114_v33 = vld [vmem:[%s8057_s10 + $0xd8] sm:$0xff]   ;;  %296 = vst.msk [vmem:[#allocation2 + $0x78] sm:$0xff] %vm280_vm3, %v9479_v34  ;;  %297 = vst.msk [vmem:[#allocation2 + $0x80] sm:$0xff] %vm280_vm3, %v9479_v34  ;;  %v7896_v35 = vld [vmem:[%s8057_s10 + $0xe0] sm:$0xff]  }
  0x1c   : > { %298 = vst.msk [vmem:[#allocation2 + $0x88] sm:$0xff] %vm280_vm3, %v9479_v34  ;;  %299 = vst.msk [vmem:[#allocation2 + $0x90] sm:$0xff] %vm280_vm3, %v9479_v34  ;;  %v7897_v36 = vld [vmem:[%s8057_s10 + $0xe8] sm:$0xff]   ;;  %v7898_v37 = vld [vmem:[%s8057_s10 + $0xf0] sm:$0xff]   ;;  %7067 = vmatpush3.bf16.msra.mxu0 %v7933_v41 }
  0x1d   : > { %300 = vst.msk [vmem:[#allocation2 + $0x98] sm:$0xff] %vm280_vm3, %v9479_v34  ;;  %301 = vst.msk [vmem:[#allocation2 + $0xa0] sm:$0xff] %vm280_vm3, %v9479_v34  ;;  %v7899_v38 = vld [vmem:[%s8057_s10 + $0xf8] sm:$0xff]   ;;  %v7900_v39 = vld [vmem:[%s8057_s10 + $0x100] sm:$0xff]   ;;  %7100 = vmatprep.subr.bf16.mxu0 %v8323_v0 }
  0x1e   : > { %302 = vst.msk [vmem:[#allocation2 + $0xa8] sm:$0xff] %vm280_vm3, %v9479_v34  ;;  %303 = vst.msk [vmem:[#allocation2 + $0xb0] sm:$0xff] %vm280_vm3, %v9479_v34  ;;  %v7901_v42 = vld [vmem:[%s8057_s10 + $0x108] sm:$0xff]   ;;  %v7902_v43 = vld [vmem:[%s8057_s10 + $0x110] sm:$0xff]  }
  0x1f   : > { %6941 = vmatmul.mubr.msk.bf16.gmra.mrb[4].mxu0 %vm854_vm2, %v7871_v9  ;;  %304 = vst.msk [vmem:[#allocation2 + $0xb8] sm:$0xff] %vm280_vm3, %v9479_v34  ;;  %305 = vst.msk [vmem:[#allocation2 + $0xc0] sm:$0xff] %vm280_vm3, %v9479_v34  ;;  %v7903_v44 = vld [vmem:[%s8057_s10 + $0x118] sm:$0xff]   ;;  %v7904_v45 = vld [vmem:[%s8057_s10 + $0x120] sm:$0xff]  }
  0x20   : > { %6944 = vmatprep.mubr.msk.bf16.mxu0 %vm854_vm2, %v7872_v10  ;;  %306 = vst.msk [vmem:[#allocation2 + $0xc8] sm:$0xff] %vm280_vm3, %v9479_v34  ;;  %307 = vst.msk [vmem:[#allocation2 + $0xd0] sm:$0xff] %vm280_vm3, %v9479_v34  ;;  %v7905_v46 = vld [vmem:[%s8057_s10 + $0x128] sm:$0xff]   ;;  %v7906_v47 = vld [vmem:[%s8057_s10 + $0x130] sm:$0xff]  }
  0x21   : > { %308 = vst.msk [vmem:[#allocation2 + $0xd8] sm:$0xff] %vm280_vm3, %v9479_v34  ;;  %309 = vst.msk [vmem:[#allocation2 + $0xe0] sm:$0xff] %vm280_vm3, %v9479_v34  ;;  %v7907_v48 = vld [vmem:[%s8057_s10 + $0x138] sm:$0xff]   ;;  %v7908_v49 = vld [vmem:[%s8057_s10 + $0x140] sm:$0xff]  }
  0x22   : > { %310 = vst.msk [vmem:[#allocation2 + $0xe8] sm:$0xff] %vm280_vm3, %v9479_v34  ;;  %311 = vst.msk [vmem:[#allocation2 + $0xf0] sm:$0xff] %vm280_vm3, %v9479_v34  ;;  %v7909_v50 = vld [vmem:[%s8057_s10 + $0x148] sm:$0xff]   ;;  %v7910_v51 = vld [vmem:[%s8057_s10 + $0x150] sm:$0xff]  }
  0x23   : > { %312 = vst.msk [vmem:[#allocation2 + $0xf8] sm:$0xff] %vm280_vm3, %v9479_v34  ;;  %313 = vst.msk [vmem:[#allocation2 + $0x100] sm:$0xff] %vm280_vm3, %v9479_v34  ;;  %v7911_v52 = vld [vmem:[%s8057_s10 + $0x158] sm:$0xff]   ;;  %v7912_v53 = vld [vmem:[%s8057_s10 + $0x160] sm:$0xff]  }
  0x24   : > { %314 = vst.msk [vmem:[#allocation2 + $0x108] sm:$0xff] %vm280_vm3, %v9479_v34  ;;  %315 = vst.msk [vmem:[#allocation2 + $0x110] sm:$0xff] %vm280_vm3, %v9479_v34  ;;  %v7913_v54 = vld [vmem:[%s8057_s10 + $0x168] sm:$0xff]   ;;  %v7914_v55 = vld [vmem:[%s8057_s10 + $0x170] sm:$0xff]  }
  0x25   : > { %316 = vst.msk [vmem:[#allocation2 + $0x118] sm:$0xff] %vm280_vm3, %v9479_v34  ;;  %317 = vst.msk [vmem:[#allocation2 + $0x120] sm:$0xff] %vm280_vm3, %v9479_v34  ;;  %v7915_v56 = vld [vmem:[%s8057_s10 + $0x178] sm:$0xff]   ;;  %v7916_v57 = vld [vmem:[%s8057_s10 + $0x180] sm:$0xff]  }
  0x26   : > { %318 = vst.msk [vmem:[#allocation2 + $0x128] sm:$0xff] %vm280_vm3, %v9479_v34  ;;  %319 = vst.msk [vmem:[#allocation2 + $0x130] sm:$0xff] %vm280_vm3, %v9479_v34  ;;  %v7917_v58 = vld [vmem:[%s8057_s10 + $0x188] sm:$0xff]   ;;  %v7918_v59 = vld [vmem:[%s8057_s10 + $0x190] sm:$0xff]  }
  0x27   : > { %6945 = vmatmul.mubr.msk.bf16.gmra.mrb[8].mxu0 %vm854_vm2, %v7873_v11  ;;  %320 = vst.msk [vmem:[#allocation2 + $0x138] sm:$0xff] %vm280_vm3, %v9479_v34  ;;  %321 = vst.msk [vmem:[#allocation2 + $0x140] sm:$0xff] %vm280_vm3, %v9479_v34  ;;  %v7919_v60 = vld [vmem:[%s8057_s10 + $0x198] sm:$0xff]   ;;  %v7920_v61 = vld [vmem:[%s8057_s10 + $0x1a0] sm:$0xff]  }
  0x28   : > { %6948 = vmatprep.mubr.msk.bf16.mxu0 %vm854_vm2, %v7874_v12  ;;  %322 = vst.msk [vmem:[#allocation2 + $0x148] sm:$0xff] %vm280_vm3, %v9479_v34  ;;  %323 = vst.msk [vmem:[#allocation2 + $0x150] sm:$0xff] %vm280_vm3, %v9479_v34  ;;  %v7921_v62 = vld [vmem:[%s8057_s10 + $0x1a8] sm:$0xff]   ;;  %v7922_v63 = vld [vmem:[%s8057_s10 + $0x1b0] sm:$0xff]  }
  0x29   : > { %324 = vst.msk [vmem:[#allocation2 + $0x158] sm:$0xff] %vm280_vm3, %v9479_v34  ;;  %325 = vst.msk [vmem:[#allocation2 + $0x160] sm:$0xff] %vm280_vm3, %v9479_v34  ;;  %v7923_v4 = vld [vmem:[%s8057_s10 + $0x1b8] sm:$0xff]   ;;  %v7924_v6 = vld [vmem:[%s8057_s10 + $0x1c0] sm:$0xff]  }
  0x2a   : > { %326 = vst.msk [vmem:[#allocation2 + $0x168] sm:$0xff] %vm280_vm3, %v9479_v34  ;;  %327 = vst.msk [vmem:[#allocation2 + $0x170] sm:$0xff] %vm280_vm3, %v9479_v34  ;;  %v8342_v8 = vld [vmem:[%s9473_s2] ss:$0 sm:$0xff] }
  0x2b   : > { %328 = vst.msk [vmem:[#allocation2 + $0x178] sm:$0xff] %vm280_vm3, %v9479_v34  ;;  %329 = vst.msk [vmem:[#allocation2 + $0x180] sm:$0xff] %vm280_vm3, %v9479_v34  ;;  %v7928_v40 = vld [vmem:[%s8057_s10 + $0x1e0] sm:$0xff]  }
  0x2c   : > { %330 = vst.msk [vmem:[#allocation2 + $0x188] sm:$0xff] %vm280_vm3, %v9479_v34  ;;  %331 = vst.msk [vmem:[#allocation2 + $0x190] sm:$0xff] %vm280_vm3, %v9479_v34 }
  0x2d   : > { %332 = vst.msk [vmem:[#allocation2 + $0x198] sm:$0xff] %vm280_vm3, %v9479_v34  ;;  %333 = vst.msk [vmem:[#allocation2 + $0x1a0] sm:$0xff] %vm280_vm3, %v9479_v34 }
  0x2e   : > { %334 = vst.msk [vmem:[#allocation2 + $0x1a8] sm:$0xff] %vm280_vm3, %v9479_v34  ;;  %335 = vst.msk [vmem:[#allocation2 + $0x1b0] sm:$0xff] %vm280_vm3, %v9479_v34 }
  0x2f   : > { %6949 = vmatmul.mubr.msk.bf16.gmra.mrb[12].mxu0 %vm854_vm2, %v7875_v13  ;;  %336 = vst.msk [vmem:[#allocation2 + $0x1b8] sm:$0xff] %vm280_vm3, %v9479_v34  ;;  %337 = vst.msk [vmem:[#allocation2 + $0x1c0] sm:$0xff] %vm280_vm3, %v9479_v34 }
  0x30   : > { %6952 = vmatprep.mubr.msk.bf16.mxu0 %vm854_vm2, %v7876_v14  ;;  %338 = vst.msk [vmem:[#allocation2 + $0x1c8] sm:$0xff] %vm280_vm3, %v9479_v34  ;;  %339 = vst.msk [vmem:[#allocation2 + $0x1d0] sm:$0xff] %vm280_vm3, %v9479_v34 }
  0x31   : > { %340 = vst.msk [vmem:[#allocation2 + $0x1d8] sm:$0xff] %vm280_vm3, %v9479_v34  ;;  %341 = vst.msk [vmem:[#allocation2 + $0x1e0] sm:$0xff] %vm280_vm3, %v9479_v34 }
  0x32   : > { %342 = vst.msk [vmem:[#allocation2 + $0x1e8] sm:$0xff] %vm280_vm3, %v9479_v34  ;;  %343 = vst.msk [vmem:[#allocation2 + $0x1f0] sm:$0xff] %vm280_vm3, %v9479_v34 }
  0x33   : > { %344 = vst.msk [vmem:[#allocation2 + $0x1f8] sm:$0xff] %vm280_vm3, %v9479_v34  ;;  %345 = vst.msk [vmem:[#allocation2 + $0x200] sm:$0xff] %vm280_vm3, %v9479_v34 }
  0x34   : > { %346 = vst.msk [vmem:[#allocation2 + $0x208] sm:$0xff] %vm280_vm3, %v9479_v34  ;;  %347 = vst.msk [vmem:[#allocation2 + $0x210] sm:$0xff] %vm280_vm3, %v9479_v34 }
  0x35   : > { %348 = vst.msk [vmem:[#allocation2 + $0x218] sm:$0xff] %vm280_vm3, %v9479_v34  ;;  %349 = vst.msk [vmem:[#allocation2 + $0x220] sm:$0xff] %vm280_vm3, %v9479_v34 }
  0x36   : > { %350 = vst.msk [vmem:[#allocation2 + $0x228] sm:$0xff] %vm280_vm3, %v9479_v34  ;;  %351 = vst.msk [vmem:[#allocation2 + $0x230] sm:$0xff] %vm280_vm3, %v9479_v34 }
  0x37   : > { %6953 = vmatmul.mubr.msk.bf16.gmra.mrb[16].mxu0 %vm854_vm2, %v7877_v15  ;;  %352 = vst.msk [vmem:[#allocation2 + $0x238] sm:$0xff] %vm280_vm3, %v9479_v34  ;;  %v7925_v15 = vld [vmem:[%s8057_s10 + $0x1c8] sm:$0xff]  }
  0x38   : > { %6956 = vmatprep.mubr.msk.bf16.mxu0 %vm854_vm2, %v7878_v16 }
  0x3f   : > { %6957 = vmatmul.mubr.msk.bf16.gmra.mrb[20].mxu0 %vm854_vm2, %v7879_v17 }
  0x40   : > { %6960 = vmatprep.mubr.msk.bf16.mxu0 %vm854_vm2, %v7880_v18 }
  0x47   : > { %6961 = vmatmul.mubr.msk.bf16.gmra.mrb[24].mxu0 %vm854_vm2, %v7881_v19  ;;  %v7926_v19 = vld [vmem:[%s8057_s10 + $0x1d0] sm:$0xff]  }
  0x48   : > { %6964 = vmatprep.mubr.msk.bf16.mxu0 %vm854_vm2, %v7882_v20 }
  0x4f   : > { %6965 = vmatmul.mubr.msk.bf16.gmra.mrb[28].mxu0 %vm854_vm2, %v7883_v21 }
  0x50   : > { %6968 = vmatprep.mubr.msk.bf16.mxu0 %vm854_vm2, %v7884_v22 }
  0x57   : > { %6969 = vmatmul.mubr.msk.bf16.gmra.mrb[32].mxu0 %vm854_vm2, %v7885_v23 }
  0x58   : > { %6972 = vmatprep.mubr.msk.bf16.mxu0 %vm854_vm2, %v7886_v24 }
  0x5f   : > { %6973 = vmatmul.mubr.msk.bf16.gmra.mrb[36].mxu0 %vm854_vm2, %v7887_v25 }
  0x60   : > { %6976 = vmatprep.mubr.msk.bf16.mxu0 %vm854_vm2, %v7888_v26 }
  0x67   : > { %6977 = vmatmul.mubr.msk.bf16.gmra.mrb[40].mxu0 %vm854_vm2, %v7889_v27 }
  0x68   : > { %6980 = vmatprep.mubr.msk.bf16.mxu0 %vm854_vm2, %v7890_v28 }
  0x6f   : > { %6981 = vmatmul.mubr.msk.bf16.gmra.mrb[44].mxu0 %vm854_vm2, %v7891_v29 }
  0x70   : > { %6984 = vmatprep.mubr.msk.bf16.mxu0 %vm854_vm2, %v7892_v30 }
  0x77   : > { %6985 = vmatmul.mubr.msk.bf16.gmra.mrb[48].mxu0 %vm854_vm2, %v7893_v31 }
  0x78   : > { %6988 = vmatprep.mubr.msk.bf16.mxu0 %vm854_vm2, %v7894_v32 }
  0x7f   : > { %6989 = vmatmul.mubr.msk.bf16.gmra.mrb[52].mxu0 %vm854_vm2, %v8114_v33 }
  0x80   : > { %6992 = vmatprep.mubr.msk.bf16.mxu0 %vm854_vm2, %v7896_v35 }
  0x87   : > { %6993 = vmatmul.mubr.msk.bf16.gmra.mrb[56].mxu0 %vm854_vm2, %v7897_v36 }
  0x88   : > { %6996 = vmatprep.mubr.msk.bf16.mxu0 %vm854_vm2, %v7898_v37 }
  0x8f   : > { %6997 = vmatmul.mubr.msk.bf16.gmra.mrb[60].mxu0 %vm854_vm2, %v7899_v38  ;;  %v7927_v38 = vld [vmem:[%s8057_s10 + $0x1d8] sm:$0xff]  }
  0x90   : > { %7000 = vmatprep.mubr.msk.bf16.mxu0 %vm854_vm2, %v7900_v39 }
  0x97   : > { %7001 = vmatmul.mubr.msk.bf16.gmra.mrb[64].mxu0 %vm854_vm2, %v7901_v42 }
  0x98   : > { %7004 = vmatprep.mubr.msk.bf16.mxu0 %vm854_vm2, %v7902_v43 }
  0x9f   : > { %7005 = vmatmul.mubr.msk.bf16.gmra.mrb[68].mxu0 %vm854_vm2, %v7903_v44 }
  0xa0   : > { %7008 = vmatprep.mubr.msk.bf16.mxu0 %vm854_vm2, %v7904_v45 }
  0xa7   : > { %7009 = vmatmul.mubr.msk.bf16.gmra.mrb[72].mxu0 %vm854_vm2, %v7905_v46 }
  0xa8   : > { %7012 = vmatprep.mubr.msk.bf16.mxu0 %vm854_vm2, %v7906_v47 }
  0xaf   : > { %7013 = vmatmul.mubr.msk.bf16.gmra.mrb[76].mxu0 %vm854_vm2, %v7907_v48 }
  0xb0   : > { %7016 = vmatprep.mubr.msk.bf16.mxu0 %vm854_vm2, %v7908_v49 }
  0xb7   : > { %7017 = vmatmul.mubr.msk.bf16.gmra.mrb[80].mxu0 %vm854_vm2, %v7909_v50 }
  0xb8   : > { %7020 = vmatprep.mubr.msk.bf16.mxu0 %vm854_vm2, %v7910_v51 }
  0xbf   : > { %7021 = vmatmul.mubr.msk.bf16.gmra.mrb[84].mxu0 %vm854_vm2, %v7911_v52 }
  0xc0   : > { %7024 = vmatprep.mubr.msk.bf16.mxu0 %vm854_vm2, %v7912_v53  ;;  %v7929_v53 = vld [vmem:[%s8057_s10 + $0x1e8] sm:$0xff]  }
  0xc7   : > { %7025 = vmatmul.mubr.msk.bf16.gmra.mrb[88].mxu0 %vm854_vm2, %v7913_v54 }
  0xc8   : > { %7028 = vmatprep.mubr.msk.bf16.mxu0 %vm854_vm2, %v7914_v55 }
  0xcf   : > { %7029 = vmatmul.mubr.msk.bf16.gmra.mrb[92].mxu0 %vm854_vm2, %v7915_v56 }
  0xd0   : > { %7032 = vmatprep.mubr.msk.bf16.mxu0 %vm854_vm2, %v7916_v57 }
  0xd7   : > { %7033 = vmatmul.mubr.msk.bf16.gmra.mrb[96].mxu0 %vm854_vm2, %v7917_v58  ;;  %v7930_v58 = vld [vmem:[%s8057_s10 + $0x1f0] sm:$0xff]  }
  0xd8   : > { %7036 = vmatprep.mubr.msk.bf16.mxu0 %vm854_vm2, %v7918_v59 }
  0xdf   : > { %7037 = vmatmul.mubr.msk.bf16.gmra.mrb[100].mxu0 %vm854_vm2, %v7919_v60 }
  0xe0   : > { %7040 = vmatprep.mubr.msk.bf16.mxu0 %vm854_vm2, %v7920_v61 }
  0xe7   : > { %7041 = vmatmul.mubr.msk.bf16.gmra.mrb[104].mxu0 %vm854_vm2, %v7921_v62 }
  0xe8   : > { %7044 = vmatprep.mubr.msk.bf16.mxu0 %vm854_vm2, %v7922_v63 }
  0xea   : > { %v6938_v1 = vpop.f32.mrb[0].mxu0 }
  0xeb   : > { %v1088_v3 = vpop.f32.mrb[1].mxu0  ;;  %v1097_v9 = vadd.f32 %v6938_v1, %v8342_v8 }
  0xec   : > { %v6939_v5 = vpop.f32.mrb[2].mxu0  ;;  %v1089_v10 = vadd.f32 %v8342_v8, %v1088_v3 }
  0xed   : > { %v1091_v7 = vpop.f32.mrb[3].mxu0  ;;  %v1100_v12 = vadd.f32 %v6939_v5, %v8342_v8  ;;  %v1601_v20 = vmax.f32 %v1097_v9, 0.0 }
  0xee   : > { %v1092_v16 = vadd.f32 %v8342_v8, %v1091_v7  ;;  %v1599_v24 = vmax.f32 %v1089_v10, 0.0 }
  0xef   : > { %7045 = vmatmul.mubr.msk.bf16.gmra.mrb[108].mxu0 %vm854_vm2, %v7923_v4  ;;  %v1602_v27 = vmax.f32 %v1100_v12, 0.0  ;;  %v2099_v12 = vld [vmem:[#allocation2 + $0x8] sm:$0xff] }
  0xf0   : > { %7048 = vmatprep.mubr.msk.bf16.mxu0 %vm854_vm2, %v7924_v6  ;;  %v1600_v30 = vmax.f32 %v1092_v16, 0.0 }
  0xf2   : > { %v6942_v11 = vpop.f32.mrb[4].mxu0 }
  0xf3   : > { %v1113_v13 = vadd.f32 %v6942_v11, %v8342_v8  ;;  %v1104_v14 = vpop.f32.mrb[5].mxu0 }
  0xf4   : > { %v1105_v17 = vadd.f32 %v8342_v8, %v1104_v14  ;;  %v6943_v18 = vpop.f32.mrb[6].mxu0 }
  0xf5   : > { %v1605_v21 = vmax.f32 %v1113_v13, 0.0  ;;  %v1116_v22 = vadd.f32 %v6943_v18, %v8342_v8  ;;  %v1107_v23 = vpop.f32.mrb[7].mxu0  ;;  %v2100_v13 = vld [vmem:[#allocation2 + $0x10] sm:$0xff] }
  0xf6   : > { %v1603_v25 = vmax.f32 %v1105_v17, 0.0  ;;  %v1108_v26 = vadd.f32 %v8342_v8, %v1107_v23  ;;  %v7931_v17 = vld [vmem:[%s8057_s10 + $0x1f8] sm:$0xff]  }
  0xf7   : > { %v1729_v28 = vmax.f32 %v1601_v20, %v1605_v21  ;;  %v1606_v29 = vmax.f32 %v1116_v22, 0.0  ;;  %7049 = vmatmul.mubr.msk.bf16.gmra.mrb[112].mxu0 %vm854_vm2, %v7925_v15 }
  0xf8   : > { %v1727_v31 = vmax.f32 %v1599_v24, %v1603_v25  ;;  %v1604_v32 = vmax.f32 %v1108_v26, 0.0  ;;  %7052 = vmatprep.mubr.msk.bf16.mxu0 %vm854_vm2, %v7926_v19  ;;  %v2131_v19 = vpack.c.bf16 %v2100_v13, %v2099_v12 }
  0xf9   : > { %1793 = vst.msk [vmem:[#allocation4 + $0x10] sm:$0xff] %vm280_vm3, %v1729_v28  ;;  %v1730_v33 = vmax.f32 %v1602_v27, %v1606_v29 }
  0xfa   : > { %1791 = vst.msk [vmem:[#allocation4] sm:$0xff] %vm280_vm3, %v1727_v31  ;;  %v1728_v35 = vmax.f32 %v1600_v30, %v1604_v32  ;;  %v6946_v36 = vpop.f32.mrb[8].mxu0 }
  0xfb   : > { %1794 = vst.msk [vmem:[#allocation4 + $0x18] sm:$0xff] %vm280_vm3, %v1730_v33  ;;  %v1120_v37 = vpop.f32.mrb[9].mxu0  ;;  %v1129_v42 = vadd.f32 %v6946_v36, %v8342_v8 }
  0xfc   : > { %1792 = vst.msk [vmem:[#allocation4 + $0x8] sm:$0xff] %vm280_vm3, %v1728_v35  ;;  %v6947_v39 = vpop.f32.mrb[10].mxu0  ;;  %v1121_v45 = vadd.f32 %v8342_v8, %v1120_v37 }
  0xfd   : > { %v1123_v41 = vpop.f32.mrb[11].mxu0  ;;  %v1132_v50 = vadd.f32 %v6947_v39, %v8342_v8  ;;  %v1609_v59 = vmax.f32 %v1129_v42, 0.0 }
  0xfe   : > { %v1124_v55 = vadd.f32 %v8342_v8, %v1123_v41  ;;  %v1607_v63 = vmax.f32 %v1121_v45, 0.0 }
  0xff   : > { %7053 = vmatmul.mubr.msk.bf16.gmra.mrb[116].mxu0 %vm854_vm2, %v7927_v38  ;;  %v1610_v4 = vmax.f32 %v1132_v50, 0.0 }
 0x100   : > { %7056 = vmatprep.mubr.msk.bf16.mxu0 %vm854_vm2, %v7928_v40  ;;  %v1608_v7 = vmax.f32 %v1124_v55, 0.0 }
 0x102   : > { %v1857_v43 = vld [vmem:[#allocation4 + $0x10] ss:$2 sm:$0xff]  ;;  %v1921_v44 = vld [vmem:[#allocation4 + $0x11] ss:$2 sm:$0xff]  ;;  %v6950_v46 = vpop.f32.mrb[12].mxu0 }
 0x103   : > { %v1983_v47 = vmax.f32 %v1857_v43, %v1921_v44  ;;  %v1855_v48 = vld [vmem:[#allocation4] ss:$2 sm:$0xff]  ;;  %v1919_v49 = vld [vmem:[#allocation4 + $0x1] ss:$2 sm:$0xff]  ;;  %v1145_v51 = vadd.f32 %v6950_v46, %v8342_v8  ;;  %v1136_v52 = vpop.f32.mrb[13].mxu0 }
 0x104   : > { %v1982_v54 = vmax.f32 %v1855_v48, %v1919_v49  ;;  %v1137_v56 = vadd.f32 %v8342_v8, %v1136_v52  ;;  %v6951_v57 = vpop.f32.mrb[14].mxu0 }
 0x105   : > { %2016 = vst.msk [vmem:[#allocation2 + $0x30] sm:$0xff] %vm280_vm3, %v1983_v47  ;;  %v1613_v60 = vmax.f32 %v1145_v51, 0.0  ;;  %v1148_v61 = vadd.f32 %v6951_v57, %v8342_v8  ;;  %v1139_v62 = vpop.f32.mrb[15].mxu0 }
 0x106   : > { %2015 = vst.msk [vmem:[#allocation2 + $0x28] sm:$0xff] %vm280_vm3, %v1982_v54  ;;  %v1611_v1 = vmax.f32 %v1137_v56, 0.0  ;;  %v1140_v3 = vadd.f32 %v8342_v8, %v1139_v62 }
 0x107   : > { %v1733_v5 = vmax.f32 %v1609_v59, %v1613_v60  ;;  %v1614_v6 = vmax.f32 %v1148_v61, 0.0  ;;  %7057 = vmatmul.mubr.msk.bf16.gmra.mrb[120].mxu0 %vm854_vm2, %v7929_v53 }
 0x108   : > { %v1731_v9 = vmax.f32 %v1607_v63, %v1611_v1  ;;  %v1612_v10 = vmax.f32 %v1140_v3, 0.0  ;;  %7060 = vmatprep.mubr.msk.bf16.mxu0 %vm854_vm2, %v7930_v58 }
 0x109   : > { %1797 = vst.msk [vmem:[#allocation4 + $0x30] sm:$0xff] %vm280_vm3, %v1733_v5  ;;  %v1734_v11 = vmax.f32 %v1610_v4, %v1614_v6 }
 0x10a   : > { %1795 = vst.msk [vmem:[#allocation4 + $0x20] sm:$0xff] %vm280_vm3, %v1731_v9  ;;  %v1732_v14 = vmax.f32 %v1608_v7, %v1612_v10  ;;  %v6954_v15 = vpop.f32.mrb[16].mxu0 }
 0x10b   : > { %1798 = vst.msk [vmem:[#allocation4 + $0x38] sm:$0xff] %vm280_vm3, %v1734_v11  ;;  %v1152_v16 = vpop.f32.mrb[17].mxu0  ;;  %v1161_v21 = vadd.f32 %v6954_v15, %v8342_v8 }
 0x10c   : > { %1796 = vst.msk [vmem:[#allocation4 + $0x28] sm:$0xff] %vm280_vm3, %v1732_v14  ;;  %v6955_v18 = vpop.f32.mrb[18].mxu0  ;;  %v2102_v22 = vld [vmem:[#allocation2 + $0x30] sm:$0xff]  ;;  %v1153_v25 = vadd.f32 %v8342_v8, %v1152_v16 }
 0x10d   : > { %v1155_v20 = vpop.f32.mrb[19].mxu0  ;;  %v2101_v27 = vld [vmem:[#allocation2 + $0x28] sm:$0xff]  ;;  %v1164_v31 = vadd.f32 %v6955_v18, %v8342_v8  ;;  %v1617_v39 = vmax.f32 %v1161_v21, 0.0 }
 0x10e   : > { %v1156_v36 = vadd.f32 %v8342_v8, %v1155_v20  ;;  %v2132_v43 = vpack.c.bf16 %v2102_v22, %v2101_v27  ;;  %v1615_v44 = vmax.f32 %v1153_v25, 0.0 }
 0x10f   : > { %7061 = vmatmul.mubr.msk.bf16.gmra.mrb[124].mxu0 %vm854_vm2, %v7931_v17  ;;  %v1618_v47 = vmax.f32 %v1164_v31, 0.0 }
 0x110   : > { %7068 = vmatprep.mubr.msk.bf16.mxu0 %vm280_vm3, %v2131_v19  ;;  %v1616_v50 = vmax.f32 %v1156_v36, 0.0 }
 0x112   : > { %v1861_v23 = vld [vmem:[#allocation4 + $0x30] ss:$2 sm:$0xff]  ;;  %v1925_v24 = vld [vmem:[#allocation4 + $0x31] ss:$2 sm:$0xff]  ;;  %v6958_v26 = vpop.f32.mrb[20].mxu0 }
 0x113   : > { %v1985_v28 = vmax.f32 %v1861_v23, %v1925_v24  ;;  %v1859_v29 = vld [vmem:[#allocation4 + $0x20] ss:$2 sm:$0xff]  ;;  %v1923_v30 = vld [vmem:[#allocation4 + $0x21] ss:$2 sm:$0xff]  ;;  %v1177_v32 = vadd.f32 %v6958_v26, %v8342_v8  ;;  %v1168_v33 = vpop.f32.mrb[21].mxu0 }
 0x114   : > { %v1984_v35 = vmax.f32 %v1859_v29, %v1923_v30  ;;  %v1169_v37 = vadd.f32 %v8342_v8, %v1168_v33  ;;  %v6959_v38 = vpop.f32.mrb[22].mxu0 }
 0x115   : > { %2018 = vst.msk [vmem:[#allocation2 + $0x50] sm:$0xff] %vm280_vm3, %v1985_v28  ;;  %v1621_v40 = vmax.f32 %v1177_v32, 0.0  ;;  %v1180_v41 = vadd.f32 %v6959_v38, %v8342_v8  ;;  %v1171_v42 = vpop.f32.mrb[23].mxu0 }
 0x116   : > { %2017 = vst.msk [vmem:[#allocation2 + $0x48] sm:$0xff] %vm280_vm3, %v1984_v35  ;;  %v1619_v45 = vmax.f32 %v1169_v37, 0.0  ;;  %v1172_v46 = vadd.f32 %v8342_v8, %v1171_v42 }
 0x117   : > { %v1737_v48 = vmax.f32 %v1617_v39, %v1621_v40  ;;  %v1622_v49 = vmax.f32 %v1180_v41, 0.0  ;;  %7069 = vmatmul.mubr.msk.bf16.vlgmr.msra.gmra.mrb[128].mxu0 %vm280_vm3, %v2132_v43 }
 0x118   : > { %v1735_v51 = vmax.f32 %v1615_v44, %v1619_v45  ;;  %v1620_v52 = vmax.f32 %v1172_v46, 0.0  ;;  %7101 = vmatpush3.bf16.msra.mxu0 %v8323_v0 }
 0x119   : > { %1801 = vst.msk [vmem:[#allocation4 + $0x50] sm:$0xff] %vm280_vm3, %v1737_v48  ;;  %v1738_v53 = vmax.f32 %v1618_v47, %v1622_v49  ;;  %7102 = vmatprep.subr.bf16.mxu0 %v8333_v2 }
 0x11a   : > { %1799 = vst.msk [vmem:[#allocation4 + $0x40] sm:$0xff] %vm280_vm3, %v1735_v51  ;;  %v1736_v54 = vmax.f32 %v1616_v50, %v1620_v52  ;;  %v6962_v55 = vpop.f32.mrb[24].mxu0 }
 0x11b   : > { %1802 = vst.msk [vmem:[#allocation4 + $0x58] sm:$0xff] %vm280_vm3, %v1738_v53  ;;  %v1184_v56 = vpop.f32.mrb[25].mxu0  ;;  %v1193_v61 = vadd.f32 %v6962_v55, %v8342_v8 }
 0x11c   : > { %1800 = vst.msk [vmem:[#allocation4 + $0x48] sm:$0xff] %vm280_vm3, %v1736_v54  ;;  %v6963_v57 = vpop.f32.mrb[26].mxu0  ;;  %v2104_v58 = vld [vmem:[#allocation2 + $0x50] sm:$0xff]  ;;  %7103 = vmatpush3.bf16.msra.mxu0 %v8333_v2  ;;  %v1185_v1 = vadd.f32 %v8342_v8, %v1184_v56 }
 0x11d   : > { %v1187_v59 = vpop.f32.mrb[27].mxu0  ;;  %v2103_v0 = vld [vmem:[#allocation2 + $0x48] sm:$0xff]  ;;  %v1196_v7 = vadd.f32 %v6963_v57, %v8342_v8  ;;  %v1625_v14 = vmax.f32 %v1193_v61, 0.0 }
 0x11e   : > { %v2133_v60 = vpack.c.bf16 %v2104_v58, %v2103_v0  ;;  %v1188_v11 = vadd.f32 %v8342_v8, %v1187_v59  ;;  %v1623_v18 = vmax.f32 %v1185_v1, 0.0 }
 0x11f   : > { %v1626_v21 = vmax.f32 %v1196_v7, 0.0 }
 0x120   : > { %7072 = vmatprep.mubr.msk.bf16.mxu0 %vm280_vm3, %v2133_v60  ;;  %v1624_v24 = vmax.f32 %v1188_v11, 0.0 }
 0x122   : > { %v1865_v62 = vld [vmem:[#allocation4 + $0x50] ss:$2 sm:$0xff]  ;;  %v1929_v63 = vld [vmem:[#allocation4 + $0x51] ss:$2 sm:$0xff]  ;;  %v6966_v3 = vpop.f32.mrb[28].mxu0 }
 0x123   : > { %v1987_v4 = vmax.f32 %v1865_v62, %v1929_v63  ;;  %v1863_v5 = vld [vmem:[#allocation4 + $0x40] ss:$2 sm:$0xff]  ;;  %v1927_v6 = vld [vmem:[#allocation4 + $0x41] ss:$2 sm:$0xff]  ;;  %v1209_v9 = vadd.f32 %v6966_v3, %v8342_v8  ;;  %v1200_v2 = vpop.f32.mrb[29].mxu0 }
 0x124   : > { %v1986_v10 = vmax.f32 %v1863_v5, %v1927_v6  ;;  %v1201_v12 = vadd.f32 %v8342_v8, %v1200_v2  ;;  %v6967_v13 = vpop.f32.mrb[30].mxu0 }
 0x125   : > { %2020 = vst.msk [vmem:[#allocation2 + $0x70] sm:$0xff] %vm280_vm3, %v1987_v4  ;;  %v1629_v15 = vmax.f32 %v1209_v9, 0.0  ;;  %v1212_v16 = vadd.f32 %v6967_v13, %v8342_v8  ;;  %v1203_v17 = vpop.f32.mrb[31].mxu0 }
 0x126   : > { %2019 = vst.msk [vmem:[#allocation2 + $0x68] sm:$0xff] %vm280_vm3, %v1986_v10  ;;  %v1627_v19 = vmax.f32 %v1201_v12, 0.0  ;;  %v1204_v20 = vadd.f32 %v8342_v8, %v1203_v17 }
 0x127   : > { %v1741_v22 = vmax.f32 %v1625_v14, %v1629_v15  ;;  %v1630_v23 = vmax.f32 %v1212_v16, 0.0 }
 0x128   : > { %v1739_v25 = vmax.f32 %v1623_v18, %v1627_v19  ;;  %v1628_v26 = vmax.f32 %v1204_v20, 0.0 }
 0x129   : > { %1805 = vst.msk [vmem:[#allocation4 + $0x70] sm:$0xff] %vm280_vm3, %v1741_v22  ;;  %v1742_v27 = vmax.f32 %v1626_v21, %v1630_v23 }
 0x12a   : > { %1803 = vst.msk [vmem:[#allocation4 + $0x60] sm:$0xff] %vm280_vm3, %v1739_v25  ;;  %v1740_v28 = vmax.f32 %v1624_v24, %v1628_v26  ;;  %v6970_v29 = vpop.f32.mrb[32].mxu0 }
 0x12b   : > { %1806 = vst.msk [vmem:[#allocation4 + $0x78] sm:$0xff] %vm280_vm3, %v1742_v27  ;;  %v1216_v30 = vpop.f32.mrb[33].mxu0  ;;  %v1225_v37 = vadd.f32 %v6970_v29, %v8342_v8 }
 0x12c   : > { %1804 = vst.msk [vmem:[#allocation4 + $0x68] sm:$0xff] %vm280_vm3, %v1740_v28  ;;  %v6971_v31 = vpop.f32.mrb[34].mxu0  ;;  %v2106_v32 = vld [vmem:[#allocation2 + $0x70] sm:$0xff]  ;;  %v1217_v40 = vadd.f32 %v8342_v8, %v1216_v30 }
 0x12d   : > { %v1219_v33 = vpop.f32.mrb[35].mxu0  ;;  %v2105_v35 = vld [vmem:[#allocation2 + $0x68] sm:$0xff]  ;;  %v1228_v45 = vadd.f32 %v6971_v31, %v8342_v8  ;;  %v1633_v52 = vmax.f32 %v1225_v37, 0.0 }
 0x12e   : > { %v2134_v36 = vpack.c.bf16 %v2106_v32, %v2105_v35  ;;  %v1220_v49 = vadd.f32 %v8342_v8, %v1219_v33  ;;  %v1631_v56 = vmax.f32 %v1217_v40, 0.0 }
 0x12f   : > { %v1634_v59 = vmax.f32 %v1228_v45, 0.0 }
 0x130   : > { %7073 = vmatmul.mubr.msk.bf16.gmra.mrb[132].mxu0 %vm280_vm3, %v2134_v36  ;;  %v1632_v61 = vmax.f32 %v1220_v49, 0.0 }
 0x132   : > { %v1869_v38 = vld [vmem:[#allocation4 + $0x70] ss:$2 sm:$0xff]  ;;  %v1933_v39 = vld [vmem:[#allocation4 + $0x71] ss:$2 sm:$0xff]  ;;  %v6974_v41 = vpop.f32.mrb[36].mxu0 }
 0x133   : > { %v1989_v42 = vmax.f32 %v1869_v38, %v1933_v39  ;;  %v1867_v43 = vld [vmem:[#allocation4 + $0x60] ss:$2 sm:$0xff]  ;;  %v1931_v44 = vld [vmem:[#allocation4 + $0x61] ss:$2 sm:$0xff]  ;;  %v1241_v46 = vadd.f32 %v6974_v41, %v8342_v8  ;;  %v1232_v47 = vpop.f32.mrb[37].mxu0 }
 0x134   : > { %v1988_v48 = vmax.f32 %v1867_v43, %v1931_v44  ;;  %v1233_v50 = vadd.f32 %v8342_v8, %v1232_v47  ;;  %v6975_v51 = vpop.f32.mrb[38].mxu0 }
 0x135   : > { %2022 = vst.msk [vmem:[#allocation2 + $0x90] sm:$0xff] %vm280_vm3, %v1989_v42  ;;  %v1637_v53 = vmax.f32 %v1241_v46, 0.0  ;;  %v1244_v54 = vadd.f32 %v6975_v51, %v8342_v8  ;;  %v1235_v55 = vpop.f32.mrb[39].mxu0 }
 0x136   : > { %2021 = vst.msk [vmem:[#allocation2 + $0x88] sm:$0xff] %vm280_vm3, %v1988_v48  ;;  %v1635_v57 = vmax.f32 %v1233_v50, 0.0  ;;  %v1236_v58 = vadd.f32 %v8342_v8, %v1235_v55 }
 0x137   : > { %v1745_v0 = vmax.f32 %v1633_v52, %v1637_v53  ;;  %v1638_v60 = vmax.f32 %v1244_v54, 0.0 }
 0x138   : > { %v1743_v62 = vmax.f32 %v1631_v56, %v1635_v57  ;;  %v1636_v63 = vmax.f32 %v1236_v58, 0.0 }
 0x139   : > { %1809 = vst.msk [vmem:[#allocation4 + $0x90] sm:$0xff] %vm280_vm3, %v1745_v0  ;;  %v1746_v1 = vmax.f32 %v1634_v59, %v1638_v60 }
 0x13a   : > { %1807 = vst.msk [vmem:[#allocation4 + $0x80] sm:$0xff] %vm280_vm3, %v1743_v62  ;;  %v1744_v3 = vmax.f32 %v1632_v61, %v1636_v63  ;;  %v6978_v4 = vpop.f32.mrb[40].mxu0 }
 0x13b   : > { %1810 = vst.msk [vmem:[#allocation4 + $0x98] sm:$0xff] %vm280_vm3, %v1746_v1  ;;  %v1248_v5 = vpop.f32.mrb[41].mxu0  ;;  %v1257_v11 = vadd.f32 %v6978_v4, %v8342_v8 }
 0x13c   : > { %1808 = vst.msk [vmem:[#allocation4 + $0x88] sm:$0xff] %vm280_vm3, %v1744_v3  ;;  %v6979_v6 = vpop.f32.mrb[42].mxu0  ;;  %v2108_v7 = vld [vmem:[#allocation2 + $0x90] sm:$0xff]  ;;  %v1249_v14 = vadd.f32 %v8342_v8, %v1248_v5 }
 0x13d   : > { %v1251_v9 = vpop.f32.mrb[43].mxu0  ;;  %v2107_v2 = vld [vmem:[#allocation2 + $0x88] sm:$0xff]  ;;  %v1260_v19 = vadd.f32 %v6979_v6, %v8342_v8  ;;  %v1641_v26 = vmax.f32 %v1257_v11, 0.0 }
 0x13e   : > { %v2135_v10 = vpack.c.bf16 %v2108_v7, %v2107_v2  ;;  %v1252_v23 = vadd.f32 %v8342_v8, %v1251_v9  ;;  %v1639_v30 = vmax.f32 %v1249_v14, 0.0  ;;  %v8464_v9 = vld [vmem:[%s9474_s3 + $0x20] sm:$0xff]  }
 0x13f   : > { %v1642_v33 = vmax.f32 %v1260_v19, 0.0  ;;  %7136 = vmatprep.subr.bf16.mxu1 %v8464_v9 }
 0x140   : > { %7076 = vmatprep.mubr.msk.bf16.mxu0 %vm280_vm3, %v2135_v10  ;;  %v1640_v37 = vmax.f32 %v1252_v23, 0.0 }
 0x142   : > { %v1873_v12 = vld [vmem:[#allocation4 + $0x90] ss:$2 sm:$0xff]  ;;  %v1937_v13 = vld [vmem:[#allocation4 + $0x91] ss:$2 sm:$0xff]  ;;  %v6982_v15 = vpop.f32.mrb[44].mxu0 }
 0x143   : > { %v1991_v16 = vmax.f32 %v1873_v12, %v1937_v13  ;;  %v1871_v17 = vld [vmem:[#allocation4 + $0x80] ss:$2 sm:$0xff]  ;;  %v1935_v18 = vld [vmem:[#allocation4 + $0x81] ss:$2 sm:$0xff]  ;;  %v1273_v20 = vadd.f32 %v6982_v15, %v8342_v8  ;;  %v1264_v21 = vpop.f32.mrb[45].mxu0 }
 0x144   : > { %v1990_v22 = vmax.f32 %v1871_v17, %v1935_v18  ;;  %v1265_v24 = vadd.f32 %v8342_v8, %v1264_v21  ;;  %v6983_v25 = vpop.f32.mrb[46].mxu0 }
 0x145   : > { %2024 = vst.msk [vmem:[#allocation2 + $0xb0] sm:$0xff] %vm280_vm3, %v1991_v16  ;;  %v1645_v27 = vmax.f32 %v1273_v20, 0.0  ;;  %v1276_v28 = vadd.f32 %v6983_v25, %v8342_v8  ;;  %v1267_v29 = vpop.f32.mrb[47].mxu0 }
 0x146   : > { %2023 = vst.msk [vmem:[#allocation2 + $0xa8] sm:$0xff] %vm280_vm3, %v1990_v22  ;;  %v1643_v31 = vmax.f32 %v1265_v24, 0.0  ;;  %v1268_v32 = vadd.f32 %v8342_v8, %v1267_v29 }
 0x147   : > { %v1749_v35 = vmax.f32 %v1641_v26, %v1645_v27  ;;  %v1646_v36 = vmax.f32 %v1276_v28, 0.0 }
 0x148   : > { %v1747_v38 = vmax.f32 %v1639_v30, %v1643_v31  ;;  %v1644_v39 = vmax.f32 %v1268_v32, 0.0 }
 0x149   : > { %1813 = vst.msk [vmem:[#allocation4 + $0xb0] sm:$0xff] %vm280_vm3, %v1749_v35  ;;  %v1750_v40 = vmax.f32 %v1642_v33, %v1646_v36 }
 0x14a   : > { %1811 = vst.msk [vmem:[#allocation4 + $0xa0] sm:$0xff] %vm280_vm3, %v1747_v38  ;;  %v1748_v41 = vmax.f32 %v1640_v37, %v1644_v39  ;;  %v6986_v42 = vpop.f32.mrb[48].mxu0 }
 0x14b   : > { %1814 = vst.msk [vmem:[#allocation4 + $0xb8] sm:$0xff] %vm280_vm3, %v1750_v40  ;;  %v1280_v43 = vpop.f32.mrb[49].mxu0  ;;  %v1289_v49 = vadd.f32 %v6986_v42, %v8342_v8 }
 0x14c   : > { %1812 = vst.msk [vmem:[#allocation4 + $0xa8] sm:$0xff] %vm280_vm3, %v1748_v41  ;;  %v6987_v44 = vpop.f32.mrb[50].mxu0  ;;  %v2110_v45 = vld [vmem:[#allocation2 + $0xb0] sm:$0xff]  ;;  %v1281_v52 = vadd.f32 %v8342_v8, %v1280_v43 }
 0x14d   : > { %v1283_v46 = vpop.f32.mrb[51].mxu0  ;;  %v2109_v47 = vld [vmem:[#allocation2 + $0xa8] sm:$0xff]  ;;  %v1292_v57 = vadd.f32 %v6987_v44, %v8342_v8  ;;  %v1649_v63 = vmax.f32 %v1289_v49, 0.0 }
 0x14e   : > { %v2136_v48 = vpack.c.bf16 %v2110_v45, %v2109_v47  ;;  %v1284_v60 = vadd.f32 %v8342_v8, %v1283_v46  ;;  %v1647_v5 = vmax.f32 %v1281_v52, 0.0 }
 0x14f   : > { %v1650_v2 = vmax.f32 %v1292_v57, 0.0 }
 0x150   : > { %7077 = vmatmul.mubr.msk.bf16.gmra.mrb[136].mxu0 %vm280_vm3, %v2136_v48  ;;  %v1648_v12 = vmax.f32 %v1284_v60, 0.0 }
 0x152   : > { %v1877_v50 = vld [vmem:[#allocation4 + $0xb0] ss:$2 sm:$0xff]  ;;  %v1941_v51 = vld [vmem:[#allocation4 + $0xb1] ss:$2 sm:$0xff]  ;;  %v6990_v53 = vpop.f32.mrb[52].mxu0 }
 0x153   : > { %v1993_v54 = vmax.f32 %v1877_v50, %v1941_v51  ;;  %v1875_v55 = vld [vmem:[#allocation4 + $0xa0] ss:$2 sm:$0xff]  ;;  %v1939_v56 = vld [vmem:[#allocation4 + $0xa1] ss:$2 sm:$0xff]  ;;  %v1305_v58 = vadd.f32 %v6990_v53, %v8342_v8  ;;  %v1296_v59 = vpop.f32.mrb[53].mxu0 }
 0x154   : > { %v1992_v0 = vmax.f32 %v1875_v55, %v1939_v56  ;;  %v1297_v61 = vadd.f32 %v8342_v8, %v1296_v59  ;;  %v6991_v62 = vpop.f32.mrb[54].mxu0 }
 0x155   : > { %2026 = vst.msk [vmem:[#allocation2 + $0xd0] sm:$0xff] %vm280_vm3, %v1993_v54  ;;  %v1653_v1 = vmax.f32 %v1305_v58, 0.0  ;;  %v1308_v3 = vadd.f32 %v6991_v62, %v8342_v8  ;;  %v1299_v4 = vpop.f32.mrb[55].mxu0 }
 0x156   : > { %2025 = vst.msk [vmem:[#allocation2 + $0xc8] sm:$0xff] %vm280_vm3, %v1992_v0  ;;  %v1651_v6 = vmax.f32 %v1297_v61, 0.0  ;;  %v1300_v7 = vadd.f32 %v8342_v8, %v1299_v4 }
 0x157   : > { %v1753_v10 = vmax.f32 %v1649_v63, %v1653_v1  ;;  %v1654_v11 = vmax.f32 %v1308_v3, 0.0 }
 0x158   : > { %v1751_v13 = vmax.f32 %v1647_v5, %v1651_v6  ;;  %v1652_v14 = vmax.f32 %v1300_v7, 0.0  ;;  %v7937_v5 = vld [vmem:[%s9474_s3 + $0x28] sm:$0xff]  }
 0x159   : > { %1817 = vst.msk [vmem:[#allocation4 + $0xd0] sm:$0xff] %vm280_vm3, %v1753_v10  ;;  %v1754_v15 = vmax.f32 %v1650_v2, %v1654_v11 }
 0x15a   : > { %1815 = vst.msk [vmem:[#allocation4 + $0xc0] sm:$0xff] %vm280_vm3, %v1751_v13  ;;  %v1752_v16 = vmax.f32 %v1648_v12, %v1652_v14  ;;  %v6994_v17 = vpop.f32.mrb[56].mxu0  ;;  %v8498_v12 = vld [vmem:[%s9474_s3 + $0x30] sm:$0xff]  }
 0x15b   : > { %1818 = vst.msk [vmem:[#allocation4 + $0xd8] sm:$0xff] %vm280_vm3, %v1754_v15  ;;  %v1312_v18 = vpop.f32.mrb[57].mxu0  ;;  %v1321_v27 = vadd.f32 %v6994_v17, %v8342_v8 }
 0x15c   : > { %1816 = vst.msk [vmem:[#allocation4 + $0xc8] sm:$0xff] %vm280_vm3, %v1752_v16  ;;  %v6995_v19 = vpop.f32.mrb[58].mxu0  ;;  %v2112_v20 = vld [vmem:[#allocation2 + $0xd0] sm:$0xff]  ;;  %v1313_v30 = vadd.f32 %v8342_v8, %v1312_v18 }
 0x15d   : > { %v1315_v21 = vpop.f32.mrb[59].mxu0  ;;  %v2111_v22 = vld [vmem:[#allocation2 + $0xc8] sm:$0xff]  ;;  %v1324_v36 = vadd.f32 %v6995_v19, %v8342_v8  ;;  %v1657_v43 = vmax.f32 %v1321_v27, 0.0 }
 0x15e   : > { %v2059_v23 = vld [vmem:[#allocation2 + $0xc7] sm:$0xff]  ;;  %v2060_v24 = vld [vmem:[#allocation2 + $0xcf] sm:$0xff]  ;;  %v2137_v25 = vpack.c.bf16 %v2112_v20, %v2111_v22  ;;  %v1316_v40 = vadd.f32 %v8342_v8, %v1315_v21  ;;  %v1655_v47 = vmax.f32 %v1313_v30, 0.0 }
 0x15f   : > { %v2085_v26 = vpack.c.bf16 %v2060_v24, %v2059_v23  ;;  %v1658_v50 = vmax.f32 %v1324_v36, 0.0 }
 0x160   : > { %7080 = vmatprep.mubr.msk.bf16.mxu0 %vm280_vm3, %v2137_v25  ;;  %v1656_v53 = vmax.f32 %v1316_v40, 0.0 }
 0x161   : > { %7116 = vmatprep.mubr.msk.bf16.mxu1 %vm280_vm3, %v2085_v26 }
 0x162   : > { %v1881_v28 = vld [vmem:[#allocation4 + $0xd0] ss:$2 sm:$0xff]  ;;  %v1945_v29 = vld [vmem:[#allocation4 + $0xd1] ss:$2 sm:$0xff]  ;;  %v6998_v31 = vpop.f32.mrb[60].mxu0 }
 0x163   : > { %v1995_v32 = vmax.f32 %v1881_v28, %v1945_v29  ;;  %v1879_v33 = vld [vmem:[#allocation4 + $0xc0] ss:$2 sm:$0xff]  ;;  %v1943_v35 = vld [vmem:[#allocation4 + $0xc1] ss:$2 sm:$0xff]  ;;  %v1337_v37 = vadd.f32 %v6998_v31, %v8342_v8  ;;  %v1328_v38 = vpop.f32.mrb[61].mxu0 }
 0x164   : > { %v1994_v39 = vmax.f32 %v1879_v33, %v1943_v35  ;;  %v1329_v41 = vadd.f32 %v8342_v8, %v1328_v38  ;;  %v6999_v42 = vpop.f32.mrb[62].mxu0 }
 0x165   : > { %2028 = vst.msk [vmem:[#allocation2 + $0xf0] sm:$0xff] %vm280_vm3, %v1995_v32  ;;  %v1661_v44 = vmax.f32 %v1337_v37, 0.0  ;;  %v1340_v45 = vadd.f32 %v6999_v42, %v8342_v8  ;;  %v1331_v46 = vpop.f32.mrb[63].mxu0 }
 0x166   : > { %2027 = vst.msk [vmem:[#allocation2 + $0xe8] sm:$0xff] %vm280_vm3, %v1994_v39  ;;  %v1659_v48 = vmax.f32 %v1329_v41, 0.0  ;;  %v1332_v49 = vadd.f32 %v8342_v8, %v1331_v46 }
 0x167   : > { %v1757_v51 = vmax.f32 %v1657_v43, %v1661_v44  ;;  %v1662_v52 = vmax.f32 %v1340_v45, 0.0 }
 0x168   : > { %v1755_v54 = vmax.f32 %v1655_v47, %v1659_v48  ;;  %v1660_v55 = vmax.f32 %v1332_v49, 0.0 }
 0x169   : > { %1821 = vst.msk [vmem:[#allocation4 + $0xf0] sm:$0xff] %vm280_vm3, %v1757_v51  ;;  %v1758_v56 = vmax.f32 %v1658_v50, %v1662_v52 }
 0x16a   : > { %1819 = vst.msk [vmem:[#allocation4 + $0xe0] sm:$0xff] %vm280_vm3, %v1755_v54  ;;  %v1756_v57 = vmax.f32 %v1656_v53, %v1660_v55  ;;  %v7002_v58 = vpop.f32.mrb[64].mxu0 }
 0x16b   : > { %1822 = vst.msk [vmem:[#allocation4 + $0xf8] sm:$0xff] %vm280_vm3, %v1758_v56  ;;  %v1344_v59 = vpop.f32.mrb[65].mxu0  ;;  %v1353_v6 = vadd.f32 %v7002_v58, %v8342_v8 }
 0x16c   : > { %1820 = vst.msk [vmem:[#allocation4 + $0xe8] sm:$0xff] %vm280_vm3, %v1756_v57  ;;  %v7003_v0 = vpop.f32.mrb[66].mxu0  ;;  %v2114_v60 = vld [vmem:[#allocation2 + $0xf0] sm:$0xff]  ;;  %v1345_v10 = vadd.f32 %v8342_v8, %v1344_v59 }
 0x16d   : > { %v1347_v61 = vpop.f32.mrb[67].mxu0  ;;  %v2113_v62 = vld [vmem:[#allocation2 + $0xe8] sm:$0xff]  ;;  %v1356_v16 = vadd.f32 %v7003_v0, %v8342_v8  ;;  %v1665_v22 = vmax.f32 %v1353_v6, 0.0 }
 0x16e   : > { %v2061_v63 = vld [vmem:[#allocation2 + $0xe7] sm:$0xff]  ;;  %v2062_v1 = vld [vmem:[#allocation2 + $0xef] sm:$0xff]  ;;  %v2138_v3 = vpack.c.bf16 %v2114_v60, %v2113_v62  ;;  %v1348_v19 = vadd.f32 %v8342_v8, %v1347_v61  ;;  %v1663_v26 = vmax.f32 %v1345_v10, 0.0 }
 0x16f   : > { %v2086_v4 = vpack.c.bf16 %v2062_v1, %v2061_v63  ;;  %v1666_v29 = vmax.f32 %v1356_v16, 0.0 }
 0x170   : > { %7081 = vmatmul.mubr.msk.bf16.gmra.mrb[140].mxu0 %vm280_vm3, %v2138_v3  ;;  %v1664_v32 = vmax.f32 %v1348_v19, 0.0 }
 0x171   : > { %7117 = vmatmul.mubr.msk.bf16.vlgmr.msra.gmra.mrb[0].mxu1 %vm280_vm3, %v2086_v4 }
 0x172   : > { %7137 = vmatpush3.bf16.msra.mxu1 %v8464_v9  ;;  %v1885_v7 = vld [vmem:[#allocation4 + $0xf0] ss:$2 sm:$0xff]  ;;  %v1949_v2 = vld [vmem:[#allocation4 + $0xf1] ss:$2 sm:$0xff]  ;;  %v7006_v11 = vpop.f32.mrb[68].mxu0 }
 0x173   : > { %7138 = vmatprep.subr.bf16.mxu1 %v7937_v5  ;;  %v1997_v13 = vmax.f32 %v1885_v7, %v1949_v2  ;;  %v1883_v14 = vld [vmem:[#allocation4 + $0xe0] ss:$2 sm:$0xff]  ;;  %v1947_v15 = vld [vmem:[#allocation4 + $0xe1] ss:$2 sm:$0xff]  ;;  %v1369_v17 = vadd.f32 %v7006_v11, %v8342_v8  ;;  %v1360_v18 = vpop.f32.mrb[69].mxu0 }
 0x174   : > { %v1996_v9 = vmax.f32 %v1883_v14, %v1947_v15  ;;  %v1361_v20 = vadd.f32 %v8342_v8, %v1360_v18  ;;  %v7007_v21 = vpop.f32.mrb[70].mxu0 }
 0x175   : > { %2030 = vst.msk [vmem:[#allocation2 + $0x110] sm:$0xff] %vm280_vm3, %v1997_v13  ;;  %v1669_v23 = vmax.f32 %v1369_v17, 0.0  ;;  %v1372_v24 = vadd.f32 %v7007_v21, %v8342_v8  ;;  %v1363_v25 = vpop.f32.mrb[71].mxu0 }
 0x176   : > { %7139 = vmatpush3.bf16.msra.mxu1 %v7937_v5  ;;  %2029 = vst.msk [vmem:[#allocation2 + $0x108] sm:$0xff] %vm280_vm3, %v1996_v9  ;;  %v1667_v27 = vmax.f32 %v1361_v20, 0.0  ;;  %v1364_v28 = vadd.f32 %v8342_v8, %v1363_v25 }
 0x177   : > { %7172 = vmatprep.subr.bf16.mxu1 %v8498_v12  ;;  %v1761_v30 = vmax.f32 %v1665_v22, %v1669_v23  ;;  %v1670_v31 = vmax.f32 %v1372_v24, 0.0 }
 0x178   : > { %v1759_v33 = vmax.f32 %v1663_v26, %v1667_v27  ;;  %v1668_v35 = vmax.f32 %v1364_v28, 0.0 }
 0x179   : > { %1825 = vst.msk [vmem:[#allocation4 + $0x110] sm:$0xff] %vm280_vm3, %v1761_v30  ;;  %v1762_v36 = vmax.f32 %v1666_v29, %v1670_v31 }
 0x17a   : > { %1823 = vst.msk [vmem:[#allocation4 + $0x100] sm:$0xff] %vm280_vm3, %v1759_v33  ;;  %v1760_v37 = vmax.f32 %v1664_v32, %v1668_v35  ;;  %v7010_v38 = vpop.f32.mrb[72].mxu0 }
 0x17b   : > { %1826 = vst.msk [vmem:[#allocation4 + $0x118] sm:$0xff] %vm280_vm3, %v1762_v36  ;;  %v1376_v39 = vpop.f32.mrb[73].mxu0  ;;  %v1385_v48 = vadd.f32 %v7010_v38, %v8342_v8 }
 0x17c   : > { %1824 = vst.msk [vmem:[#allocation4 + $0x108] sm:$0xff] %vm280_vm3, %v1760_v37  ;;  %v7011_v40 = vpop.f32.mrb[74].mxu0  ;;  %v2116_v41 = vld [vmem:[#allocation2 + $0x110] sm:$0xff]  ;;  %v1377_v51 = vadd.f32 %v8342_v8, %v1376_v39 }
 0x17d   : > { %v1379_v42 = vpop.f32.mrb[75].mxu0  ;;  %v2115_v43 = vld [vmem:[#allocation2 + $0x108] sm:$0xff]  ;;  %v1388_v56 = vadd.f32 %v7011_v40, %v8342_v8  ;;  %v1673_v62 = vmax.f32 %v1385_v48, 0.0 }
 0x17e   : > { %v2063_v44 = vld [vmem:[#allocation2 + $0x107] sm:$0xff]  ;;  %v2064_v45 = vld [vmem:[#allocation2 + $0x10f] sm:$0xff]  ;;  %v2139_v46 = vpack.c.bf16 %v2116_v41, %v2115_v43  ;;  %v1380_v0 = vadd.f32 %v8342_v8, %v1379_v42  ;;  %v1671_v4 = vmax.f32 %v1377_v51, 0.0 }
 0x17f   : > { %v8513_v47 = vpack.c.bf16 %v2064_v45, %v2063_v44  ;;  %v1674_v7 = vmax.f32 %v1388_v56, 0.0 }
 0x180   : > { %7084 = vmatprep.mubr.msk.bf16.mxu0 %vm280_vm3, %v2139_v46  ;;  %v1672_v11 = vmax.f32 %v1380_v0, 0.0 }
 0x181   : > { %7120 = vmatprep.mubr.msk.bf16.mxu1 %vm280_vm3, %v8513_v47 }
 0x182   : > { %v1889_v49 = vld [vmem:[#allocation4 + $0x110] ss:$2 sm:$0xff]  ;;  %v1953_v50 = vld [vmem:[#allocation4 + $0x111] ss:$2 sm:$0xff]  ;;  %v7014_v52 = vpop.f32.mrb[76].mxu0 }
 0x183   : > { %v1999_v53 = vmax.f32 %v1889_v49, %v1953_v50  ;;  %v1887_v54 = vld [vmem:[#allocation4 + $0x100] ss:$2 sm:$0xff]  ;;  %v1951_v55 = vld [vmem:[#allocation4 + $0x101] ss:$2 sm:$0xff]  ;;  %v1401_v57 = vadd.f32 %v7014_v52, %v8342_v8  ;;  %v1392_v58 = vpop.f32.mrb[77].mxu0 }
 0x184   : > { %v1998_v59 = vmax.f32 %v1887_v54, %v1951_v55  ;;  %v1393_v60 = vadd.f32 %v8342_v8, %v1392_v58  ;;  %v7015_v61 = vpop.f32.mrb[78].mxu0 }
 0x185   : > { %2032 = vst.msk [vmem:[#allocation2 + $0x130] sm:$0xff] %vm280_vm3, %v1999_v53  ;;  %v1677_v63 = vmax.f32 %v1401_v57, 0.0  ;;  %v1404_v1 = vadd.f32 %v7015_v61, %v8342_v8  ;;  %v1395_v3 = vpop.f32.mrb[79].mxu0 }
 0x186   : > { %2031 = vst.msk [vmem:[#allocation2 + $0x128] sm:$0xff] %vm280_vm3, %v1998_v59  ;;  %v1675_v5 = vmax.f32 %v1393_v60, 0.0  ;;  %v1396_v6 = vadd.f32 %v8342_v8, %v1395_v3 }
 0x187   : > { %v1765_v2 = vmax.f32 %v1673_v62, %v1677_v63  ;;  %v1678_v10 = vmax.f32 %v1404_v1, 0.0 }
 0x188   : > { %v1763_v13 = vmax.f32 %v1671_v4, %v1675_v5  ;;  %v1676_v14 = vmax.f32 %v1396_v6, 0.0  ;;  %v8562_v4 = vld [vmem:[%s9473_s2] ss:$0 sm:$0xff] }
 0x189   : > { %1829 = vst.msk [vmem:[#allocation4 + $0x130] sm:$0xff] %vm280_vm3, %v1765_v2  ;;  %v1766_v15 = vmax.f32 %v1674_v7, %v1678_v10 }
 0x18a   : > { %1827 = vst.msk [vmem:[#allocation4 + $0x120] sm:$0xff] %vm280_vm3, %v1763_v13  ;;  %v1764_v16 = vmax.f32 %v1672_v11, %v1676_v14  ;;  %v7018_v17 = vpop.f32.mrb[80].mxu0 }
 0x18b   : > { %1830 = vst.msk [vmem:[#allocation4 + $0x138] sm:$0xff] %vm280_vm3, %v1766_v15  ;;  %v1408_v18 = vpop.f32.mrb[81].mxu0  ;;  %v1417_v26 = vadd.f32 %v7018_v17, %v8342_v8 }
 0x18c   : > { %1828 = vst.msk [vmem:[#allocation4 + $0x128] sm:$0xff] %vm280_vm3, %v1764_v16  ;;  %v7019_v9 = vpop.f32.mrb[82].mxu0  ;;  %v2118_v19 = vld [vmem:[#allocation2 + $0x130] sm:$0xff]  ;;  %v1409_v29 = vadd.f32 %v8342_v8, %v1408_v18 }
 0x18d   : > { %v1411_v20 = vpop.f32.mrb[83].mxu0  ;;  %v2117_v21 = vld [vmem:[#allocation2 + $0x128] sm:$0xff]  ;;  %v1420_v35 = vadd.f32 %v7019_v9, %v8342_v8  ;;  %v1681_v42 = vmax.f32 %v1417_v26, 0.0 }
 0x18e   : > { %v2065_v22 = vld [vmem:[#allocation2 + $0x127] sm:$0xff]  ;;  %v2066_v23 = vld [vmem:[#allocation2 + $0x12f] sm:$0xff]  ;;  %v2140_v24 = vpack.c.bf16 %v2118_v19, %v2117_v21  ;;  %v1412_v39 = vadd.f32 %v8342_v8, %v1411_v20  ;;  %v1679_v46 = vmax.f32 %v1409_v29, 0.0 }
 0x18f   : > { %v8532_v25 = vpack.c.bf16 %v2066_v23, %v2065_v22  ;;  %v1682_v50 = vmax.f32 %v1420_v35, 0.0 }
 0x190   : > { %7085 = vmatmul.mubr.msk.bf16.gmra.mrb[144].mxu0 %vm280_vm3, %v2140_v24  ;;  %v1680_v53 = vmax.f32 %v1412_v39, 0.0 }
 0x191   : > { %7121 = vmatmul.mubr.msk.bf16.gmra.mrb[4].mxu1 %vm280_vm3, %v8532_v25 }
 0x192   : > { %v1893_v27 = vld [vmem:[#allocation4 + $0x130] ss:$2 sm:$0xff]  ;;  %v1957_v28 = vld [vmem:[#allocation4 + $0x131] ss:$2 sm:$0xff]  ;;  %v7022_v30 = vpop.f32.mrb[84].mxu0 }
 0x193   : > { %v2001_v31 = vmax.f32 %v1893_v27, %v1957_v28  ;;  %v1891_v32 = vld [vmem:[#allocation4 + $0x120] ss:$2 sm:$0xff]  ;;  %v1955_v33 = vld [vmem:[#allocation4 + $0x121] ss:$2 sm:$0xff]  ;;  %v1433_v36 = vadd.f32 %v7022_v30, %v8342_v8  ;;  %v1424_v37 = vpop.f32.mrb[85].mxu0 }
 0x194   : > { %v2000_v38 = vmax.f32 %v1891_v32, %v1955_v33  ;;  %v1425_v40 = vadd.f32 %v8342_v8, %v1424_v37  ;;  %v7023_v41 = vpop.f32.mrb[86].mxu0 }
 0x195   : > { %2034 = vst.msk [vmem:[#allocation2 + $0x150] sm:$0xff] %vm280_vm3, %v2001_v31  ;;  %v1685_v43 = vmax.f32 %v1433_v36, 0.0  ;;  %v1436_v44 = vadd.f32 %v7023_v41, %v8342_v8  ;;  %v1427_v45 = vpop.f32.mrb[87].mxu0 }
 0x196   : > { %2033 = vst.msk [vmem:[#allocation2 + $0x148] sm:$0xff] %vm280_vm3, %v2000_v38  ;;  %v1683_v48 = vmax.f32 %v1425_v40, 0.0  ;;  %v1428_v49 = vadd.f32 %v8342_v8, %v1427_v45 }
 0x197   : > { %v1769_v51 = vmax.f32 %v1681_v42, %v1685_v43  ;;  %v1686_v52 = vmax.f32 %v1436_v44, 0.0 }
 0x198   : > { %v1767_v54 = vmax.f32 %v1679_v46, %v1683_v48  ;;  %v1684_v55 = vmax.f32 %v1428_v49, 0.0 }
 0x199   : > { %1833 = vst.msk [vmem:[#allocation4 + $0x150] sm:$0xff] %vm280_vm3, %v1769_v51  ;;  %v1770_v56 = vmax.f32 %v1682_v50, %v1686_v52 }
 0x19a   : > { %1831 = vst.msk [vmem:[#allocation4 + $0x140] sm:$0xff] %vm280_vm3, %v1767_v54  ;;  %v1768_v57 = vmax.f32 %v1680_v53, %v1684_v55  ;;  %v7026_v58 = vpop.f32.mrb[88].mxu0 }
 0x19b   : > { %1834 = vst.msk [vmem:[#allocation4 + $0x158] sm:$0xff] %vm280_vm3, %v1770_v56  ;;  %v1440_v59 = vpop.f32.mrb[89].mxu0  ;;  %v1449_v5 = vadd.f32 %v8562_v4, %v7026_v58 }
 0x19c   : > { %1832 = vst.msk [vmem:[#allocation4 + $0x148] sm:$0xff] %vm280_vm3, %v1768_v57  ;;  %v7027_v0 = vpop.f32.mrb[90].mxu0  ;;  %v2120_v8 = vld [vmem:[#allocation2 + $0x150] sm:$0xff]  ;;  %v1441_v2 = vadd.f32 %v8562_v4, %v1440_v59 }
 0x19d   : > { %v1443_v60 = vpop.f32.mrb[91].mxu0  ;;  %v2119_v61 = vld [vmem:[#allocation2 + $0x148] sm:$0xff]  ;;  %v1452_v15 = vadd.f32 %v8562_v4, %v7027_v0  ;;  %v1689_v21 = vmax.f32 %v1449_v5, 0.0 }
 0x19e   : > { %v2067_v62 = vld [vmem:[#allocation2 + $0x147] sm:$0xff]  ;;  %v2068_v63 = vld [vmem:[#allocation2 + $0x14f] sm:$0xff]  ;;  %v8551_v1 = vpack.c.bf16 %v2120_v8, %v2119_v61  ;;  %v1444_v9 = vadd.f32 %v8562_v4, %v1443_v60  ;;  %v1687_v26 = vmax.f32 %v1441_v2, 0.0 }
 0x19f   : > { %v8553_v3 = vpack.c.bf16 %v2068_v63, %v2067_v62  ;;  %v1690_v29 = vmax.f32 %v1452_v15, 0.0 }
 0x1a0   : > { %7088 = vmatprep.mubr.msk.bf16.mxu0 %vm280_vm3, %v8551_v1  ;;  %v1688_v32 = vmax.f32 %v1444_v9, 0.0 }
 0x1a1   : > { %7124 = vmatprep.mubr.msk.bf16.mxu1 %vm280_vm3, %v8553_v3 }
 0x1a2   : > { %v1897_v6 = vld [vmem:[#allocation4 + $0x150] ss:$2 sm:$0xff]  ;;  %v1961_v7 = vld [vmem:[#allocation4 + $0x151] ss:$2 sm:$0xff]  ;;  %v7030_v10 = vpop.f32.mrb[92].mxu0 }
 0x1a3   : > { %v2003_v11 = vmax.f32 %v1897_v6, %v1961_v7  ;;  %v1895_v13 = vld [vmem:[#allocation4 + $0x140] ss:$2 sm:$0xff]  ;;  %v1959_v14 = vld [vmem:[#allocation4 + $0x141] ss:$2 sm:$0xff]  ;;  %v1465_v16 = vadd.f32 %v8562_v4, %v7030_v10  ;;  %v1456_v17 = vpop.f32.mrb[93].mxu0 }
 0x1a4   : > { %v2002_v18 = vmax.f32 %v1895_v13, %v1959_v14  ;;  %v1457_v19 = vadd.f32 %v8562_v4, %v1456_v17  ;;  %v7031_v20 = vpop.f32.mrb[94].mxu0 }
 0x1a5   : > { %2036 = vst.msk [vmem:[#allocation2 + $0x170] sm:$0xff] %vm280_vm3, %v2003_v11  ;;  %v1693_v22 = vmax.f32 %v1465_v16, 0.0  ;;  %v1468_v23 = vadd.f32 %v8562_v4, %v7031_v20  ;;  %v1459_v24 = vpop.f32.mrb[95].mxu0 }
 0x1a6   : > { %2035 = vst.msk [vmem:[#allocation2 + $0x168] sm:$0xff] %vm280_vm3, %v2002_v18  ;;  %v1691_v27 = vmax.f32 %v1457_v19, 0.0  ;;  %v1460_v28 = vadd.f32 %v8562_v4, %v1459_v24 }
 0x1a7   : > { %v1773_v30 = vmax.f32 %v1689_v21, %v1693_v22  ;;  %v1694_v31 = vmax.f32 %v1468_v23, 0.0 }
 0x1a8   : > { %v1771_v33 = vmax.f32 %v1687_v26, %v1691_v27  ;;  %v1692_v35 = vmax.f32 %v1460_v28, 0.0 }
 0x1a9   : > { %1837 = vst.msk [vmem:[#allocation4 + $0x170] sm:$0xff] %vm280_vm3, %v1773_v30  ;;  %v1774_v36 = vmax.f32 %v1690_v29, %v1694_v31 }
 0x1aa   : > { %1835 = vst.msk [vmem:[#allocation4 + $0x160] sm:$0xff] %vm280_vm3, %v1771_v33  ;;  %v1772_v37 = vmax.f32 %v1688_v32, %v1692_v35  ;;  %v7034_v38 = vpop.f32.mrb[96].mxu0 }
 0x1ab   : > { %1838 = vst.msk [vmem:[#allocation4 + $0x178] sm:$0xff] %vm280_vm3, %v1774_v36  ;;  %v1472_v39 = vpop.f32.mrb[97].mxu0  ;;  %v1481_v49 = vadd.f32 %v8562_v4, %v7034_v38 }
 0x1ac   : > { %1836 = vst.msk [vmem:[#allocation4 + $0x168] sm:$0xff] %vm280_vm3, %v1772_v37  ;;  %v7035_v40 = vpop.f32.mrb[98].mxu0  ;;  %v2122_v41 = vld [vmem:[#allocation2 + $0x170] sm:$0xff]  ;;  %v1473_v52 = vadd.f32 %v8562_v4, %v1472_v39 }
 0x1ad   : > { %v1475_v42 = vpop.f32.mrb[99].mxu0  ;;  %v2121_v43 = vld [vmem:[#allocation2 + $0x168] sm:$0xff]  ;;  %v1484_v57 = vadd.f32 %v8562_v4, %v7035_v40  ;;  %v1697_v62 = vmax.f32 %v1481_v49, 0.0 }
 0x1ae   : > { %v2069_v44 = vld [vmem:[#allocation2 + $0x167] sm:$0xff]  ;;  %v2070_v45 = vld [vmem:[#allocation2 + $0x16f] sm:$0xff]  ;;  %v8578_v46 = vpack.c.bf16 %v2122_v41, %v2121_v43  ;;  %v1476_v8 = vadd.f32 %v8562_v4, %v1475_v42  ;;  %v1695_v7 = vmax.f32 %v1473_v52, 0.0 }
 0x1af   : > { %v8580_v48 = vpack.c.bf16 %v2070_v45, %v2069_v44  ;;  %v1698_v11 = vmax.f32 %v1484_v57, 0.0 }
 0x1b0   : > { %7089 = vmatmul.mubr.msk.bf16.gmra.mrb[148].mxu0 %vm280_vm3, %v8578_v46  ;;  %v1696_v15 = vmax.f32 %v1476_v8, 0.0 }
 0x1b1   : > { %7125 = vmatmul.mubr.msk.bf16.gmra.mrb[8].mxu1 %vm280_vm3, %v8580_v48 }
 0x1b2   : > { %v1901_v50 = vld [vmem:[#allocation4 + $0x170] ss:$2 sm:$0xff]  ;;  %v1965_v51 = vld [vmem:[#allocation4 + $0x171] ss:$2 sm:$0xff]  ;;  %v7038_v53 = vpop.f32.mrb[100].mxu0 }
 0x1b3   : > { %v2005_v54 = vmax.f32 %v1901_v50, %v1965_v51  ;;  %v1899_v55 = vld [vmem:[#allocation4 + $0x160] ss:$2 sm:$0xff]  ;;  %v1963_v56 = vld [vmem:[#allocation4 + $0x161] ss:$2 sm:$0xff]  ;;  %v1497_v58 = vadd.f32 %v8562_v4, %v7038_v53  ;;  %v1488_v59 = vpop.f32.mrb[101].mxu0 }
 0x1b4   : > { %v2004_v0 = vmax.f32 %v1899_v55, %v1963_v56  ;;  %v1489_v60 = vadd.f32 %v8562_v4, %v1488_v59  ;;  %v7039_v61 = vpop.f32.mrb[102].mxu0 }
 0x1b5   : > { %2038 = vst.msk [vmem:[#allocation2 + $0x190] sm:$0xff] %vm280_vm3, %v2005_v54  ;;  %v1701_v63 = vmax.f32 %v1497_v58, 0.0  ;;  %v1500_v5 = vadd.f32 %v8562_v4, %v7039_v61  ;;  %v1491_v6 = vpop.f32.mrb[103].mxu0 }
 0x1b6   : > { %2037 = vst.msk [vmem:[#allocation2 + $0x188] sm:$0xff] %vm280_vm3, %v2004_v0  ;;  %v1699_v2 = vmax.f32 %v1489_v60, 0.0  ;;  %v1492_v10 = vadd.f32 %v8562_v4, %v1491_v6 }
 0x1b7   : > { %v1777_v13 = vmax.f32 %v1697_v62, %v1701_v63  ;;  %v1702_v14 = vmax.f32 %v1500_v5, 0.0 }
 0x1b8   : > { %v1775_v16 = vmax.f32 %v1695_v7, %v1699_v2  ;;  %v1700_v17 = vmax.f32 %v1492_v10, 0.0 }
 0x1b9   : > { %1841 = vst.msk [vmem:[#allocation4 + $0x190] sm:$0xff] %vm280_vm3, %v1777_v13  ;;  %v1778_v18 = vmax.f32 %v1698_v11, %v1702_v14 }
 0x1ba   : > { %1839 = vst.msk [vmem:[#allocation4 + $0x180] sm:$0xff] %vm280_vm3, %v1775_v16  ;;  %v1776_v9 = vmax.f32 %v1696_v15, %v1700_v17  ;;  %v7042_v19 = vpop.f32.mrb[104].mxu0 }
 0x1bb   : > { %1842 = vst.msk [vmem:[#allocation4 + $0x198] sm:$0xff] %vm280_vm3, %v1778_v18  ;;  %v1504_v20 = vpop.f32.mrb[105].mxu0  ;;  %v1513_v30 = vadd.f32 %v8562_v4, %v7042_v19 }
 0x1bc   : > { %1840 = vst.msk [vmem:[#allocation4 + $0x188] sm:$0xff] %vm280_vm3, %v1776_v9  ;;  %v7043_v21 = vpop.f32.mrb[106].mxu0  ;;  %v2124_v22 = vld [vmem:[#allocation2 + $0x190] sm:$0xff]  ;;  %v1505_v33 = vadd.f32 %v8562_v4, %v1504_v20 }
 0x1bd   : > { %v1507_v23 = vpop.f32.mrb[107].mxu0  ;;  %v2123_v24 = vld [vmem:[#allocation2 + $0x188] sm:$0xff]  ;;  %v1516_v39 = vadd.f32 %v8562_v4, %v7043_v21  ;;  %v1705_v49 = vmax.f32 %v1513_v30, 0.0 }
 0x1be   : > { %v2071_v26 = vld [vmem:[#allocation2 + $0x187] sm:$0xff]  ;;  %v2072_v27 = vld [vmem:[#allocation2 + $0x18f] sm:$0xff]  ;;  %v8600_v28 = vpack.c.bf16 %v2124_v22, %v2123_v24  ;;  %v1508_v43 = vadd.f32 %v8562_v4, %v1507_v23  ;;  %v1703_v53 = vmax.f32 %v1505_v33, 0.0 }
 0x1bf   : > { %v8602_v29 = vpack.c.bf16 %v2072_v27, %v2071_v26  ;;  %v1706_v56 = vmax.f32 %v1516_v39, 0.0 }
 0x1c0   : > { %7092 = vmatprep.mubr.msk.bf16.mxu0 %vm280_vm3, %v8600_v28  ;;  %v1704_v59 = vmax.f32 %v1508_v43, 0.0 }
 0x1c1   : > { %7128 = vmatprep.mubr.msk.bf16.mxu1 %vm280_vm3, %v8602_v29 }
 0x1c2   : > { %v1905_v31 = vld [vmem:[#allocation4 + $0x190] ss:$2 sm:$0xff]  ;;  %v1969_v32 = vld [vmem:[#allocation4 + $0x191] ss:$2 sm:$0xff]  ;;  %v7046_v35 = vpop.f32.mrb[108].mxu0 }
 0x1c3   : > { %v2007_v36 = vmax.f32 %v1905_v31, %v1969_v32  ;;  %v1903_v37 = vld [vmem:[#allocation4 + $0x180] ss:$2 sm:$0xff]  ;;  %v1967_v38 = vld [vmem:[#allocation4 + $0x181] ss:$2 sm:$0xff]  ;;  %v1529_v40 = vadd.f32 %v8562_v4, %v7046_v35  ;;  %v1520_v41 = vpop.f32.mrb[109].mxu0 }
 0x1c4   : > { %v2006_v42 = vmax.f32 %v1903_v37, %v1967_v38  ;;  %v1521_v44 = vadd.f32 %v8562_v4, %v1520_v41  ;;  %v7047_v45 = vpop.f32.mrb[110].mxu0 }
 0x1c5   : > { %2040 = vst.msk [vmem:[#allocation2 + $0x1b0] sm:$0xff] %vm280_vm3, %v2007_v36  ;;  %v1709_v50 = vmax.f32 %v1529_v40, 0.0  ;;  %v1532_v51 = vadd.f32 %v8562_v4, %v7047_v45  ;;  %v1523_v52 = vpop.f32.mrb[111].mxu0 }
 0x1c6   : > { %2039 = vst.msk [vmem:[#allocation2 + $0x1a8] sm:$0xff] %vm280_vm3, %v2006_v42  ;;  %v1707_v54 = vmax.f32 %v1521_v44, 0.0  ;;  %v1524_v55 = vadd.f32 %v8562_v4, %v1523_v52 }
 0x1c7   : > { %v1781_v57 = vmax.f32 %v1705_v49, %v1709_v50  ;;  %v1710_v58 = vmax.f32 %v1532_v51, 0.0 }
 0x1c8   : > { %v1779_v0 = vmax.f32 %v1703_v53, %v1707_v54  ;;  %v1708_v8 = vmax.f32 %v1524_v55, 0.0 }
 0x1c9   : > { %1845 = vst.msk [vmem:[#allocation4 + $0x1b0] sm:$0xff] %vm280_vm3, %v1781_v57  ;;  %v1782_v60 = vmax.f32 %v1706_v56, %v1710_v58 }
 0x1ca   : > { %1843 = vst.msk [vmem:[#allocation4 + $0x1a0] sm:$0xff] %vm280_vm3, %v1779_v0  ;;  %v1780_v61 = vmax.f32 %v1704_v59, %v1708_v8  ;;  %v7050_v62 = vpop.f32.mrb[112].mxu0 }
 0x1cb   : > { %1846 = vst.msk [vmem:[#allocation4 + $0x1b8] sm:$0xff] %vm280_vm3, %v1782_v60  ;;  %v1536_v63 = vpop.f32.mrb[113].mxu0  ;;  %v1545_v15 = vadd.f32 %v8562_v4, %v7050_v62 }
 0x1cc   : > { %1844 = vst.msk [vmem:[#allocation4 + $0x1a8] sm:$0xff] %vm280_vm3, %v1780_v61  ;;  %v7051_v5 = vpop.f32.mrb[114].mxu0  ;;  %v2126_v6 = vld [vmem:[#allocation2 + $0x1b0] sm:$0xff]  ;;  %v1537_v18 = vadd.f32 %v8562_v4, %v1536_v63 }
 0x1cd   : > { %v1539_v7 = vpop.f32.mrb[115].mxu0  ;;  %v2125_v2 = vld [vmem:[#allocation2 + $0x1a8] sm:$0xff]  ;;  %v1548_v22 = vadd.f32 %v8562_v4, %v7051_v5  ;;  %v1713_v32 = vmax.f32 %v1545_v15, 0.0 }
 0x1ce   : > { %v2073_v10 = vld [vmem:[#allocation2 + $0x1a7] sm:$0xff]  ;;  %v2074_v11 = vld [vmem:[#allocation2 + $0x1af] sm:$0xff]  ;;  %v8622_v13 = vpack.c.bf16 %v2126_v6, %v2125_v2  ;;  %v1540_v27 = vadd.f32 %v8562_v4, %v1539_v7  ;;  %v1711_v37 = vmax.f32 %v1537_v18, 0.0 }
 0x1cf   : > { %v8624_v14 = vpack.c.bf16 %v2074_v11, %v2073_v10  ;;  %v1714_v40 = vmax.f32 %v1548_v22, 0.0 }
 0x1d0   : > { %7093 = vmatmul.mubr.msk.bf16.gmra.mrb[152].mxu0 %vm280_vm3, %v8622_v13  ;;  %v1712_v43 = vmax.f32 %v1540_v27, 0.0 }
 0x1d1   : > { %7129 = vmatmul.mubr.msk.bf16.gmra.mrb[12].mxu1 %vm280_vm3, %v8624_v14 }
 0x1d2   : > { %v1909_v16 = vld [vmem:[#allocation4 + $0x1b0] ss:$2 sm:$0xff]  ;;  %v1973_v17 = vld [vmem:[#allocation4 + $0x1b1] ss:$2 sm:$0xff]  ;;  %v7054_v9 = vpop.f32.mrb[116].mxu0 }
 0x1d3   : > { %v2009_v19 = vmax.f32 %v1909_v16, %v1973_v17  ;;  %v1907_v20 = vld [vmem:[#allocation4 + $0x1a0] ss:$2 sm:$0xff]  ;;  %v1971_v21 = vld [vmem:[#allocation4 + $0x1a1] ss:$2 sm:$0xff]  ;;  %v1561_v23 = vadd.f32 %v8562_v4, %v7054_v9  ;;  %v1552_v24 = vpop.f32.mrb[117].mxu0 }
 0x1d4   : > { %v2008_v26 = vmax.f32 %v1907_v20, %v1971_v21  ;;  %v1553_v30 = vadd.f32 %v8562_v4, %v1552_v24  ;;  %v7055_v31 = vpop.f32.mrb[118].mxu0 }
 0x1d5   : > { %2042 = vst.msk [vmem:[#allocation2 + $0x1d0] sm:$0xff] %vm280_vm3, %v2009_v19  ;;  %v1717_v33 = vmax.f32 %v1561_v23, 0.0  ;;  %v1564_v35 = vadd.f32 %v8562_v4, %v7055_v31  ;;  %v1555_v36 = vpop.f32.mrb[119].mxu0 }
 0x1d6   : > { %2041 = vst.msk [vmem:[#allocation2 + $0x1c8] sm:$0xff] %vm280_vm3, %v2008_v26  ;;  %v1715_v38 = vmax.f32 %v1553_v30, 0.0  ;;  %v1556_v39 = vadd.f32 %v8562_v4, %v1555_v36 }
 0x1d7   : > { %v1785_v41 = vmax.f32 %v1713_v32, %v1717_v33  ;;  %v1718_v42 = vmax.f32 %v1564_v35, 0.0  ;;  %v2047_v35 = vld [vmem:[#allocation2 + $0x7] sm:$0xff] }
 0x1d8   : > { %v1783_v44 = vmax.f32 %v1711_v37, %v1715_v38  ;;  %v1716_v45 = vmax.f32 %v1556_v39, 0.0  ;;  %v2048_v37 = vld [vmem:[#allocation2 + $0xf] sm:$0xff] }
 0x1d9   : > { %1849 = vst.msk [vmem:[#allocation4 + $0x1d0] sm:$0xff] %vm280_vm3, %v1785_v41  ;;  %v1786_v49 = vmax.f32 %v1714_v40, %v1718_v42  ;;  %v2594_v38 = vld [vmem:[#allocation2 + $0x9] sm:$0xff]  ;;  %v2595_v39 = vld [vmem:[#allocation2 + $0x11] sm:$0xff] }
 0x1da   : > { %1847 = vst.msk [vmem:[#allocation4 + $0x1c0] sm:$0xff] %vm280_vm3, %v1783_v44  ;;  %v1784_v50 = vmax.f32 %v1712_v43, %v1716_v45  ;;  %v7058_v51 = vpop.f32.mrb[120].mxu0  ;;  %v2079_v44 = vpack.c.bf16 %v2048_v37, %v2047_v35  ;;  %v2626_v45 = vpack.c.bf16 %v2595_v39, %v2594_v38  ;;  %v2607_v35 = vld [vmem:[#allocation2 + $0xd1] sm:$0xff]  ;;  %v2608_v39 = vld [vmem:[#allocation2 + $0xe9] sm:$0xff] }
 0x1db   : > { %1850 = vst.msk [vmem:[#allocation4 + $0x1d8] sm:$0xff] %vm280_vm3, %v1786_v49  ;;  %v1568_v52 = vpop.f32.mrb[121].mxu0  ;;  %v1577_v8 = vadd.f32 %v8562_v4, %v7058_v51  ;;  %v2049_v51 = vld [vmem:[#allocation2 + $0x27] sm:$0xff] }
 0x1dc   : > { %1848 = vst.msk [vmem:[#allocation4 + $0x1c8] sm:$0xff] %vm280_vm3, %v1784_v50  ;;  %v2128_v53 = vld [vmem:[#allocation2 + $0x1d0] sm:$0xff]  ;;  %v7059_v54 = vpop.f32.mrb[122].mxu0  ;;  %v1569_v60 = vadd.f32 %v8562_v4, %v1568_v52 }
 0x1dd   : > { %v2127_v55 = vld [vmem:[#allocation2 + $0x1c8] sm:$0xff]  ;;  %v1571_v58 = vpop.f32.mrb[123].mxu0  ;;  %v1580_v61 = vadd.f32 %v8562_v4, %v7059_v54  ;;  %v1721_v11 = vmax.f32 %v1577_v8, 0.0  ;;  %v2597_v52 = vld [vmem:[#allocation2 + $0x31] sm:$0xff] }
 0x1de   : > { %v2075_v56 = vld [vmem:[#allocation2 + $0x1c7] sm:$0xff]  ;;  %v2076_v57 = vld [vmem:[#allocation2 + $0x1cf] sm:$0xff]  ;;  %v8644_v59 = vpack.c.bf16 %v2128_v53, %v2127_v55  ;;  %v1572_v5 = vadd.f32 %v8562_v4, %v1571_v58  ;;  %v1719_v18 = vmax.f32 %v1569_v60, 0.0 }
 0x1df   : > { %v8646_v0 = vpack.c.bf16 %v2076_v57, %v2075_v56  ;;  %v1722_v20 = vmax.f32 %v1580_v61, 0.0  ;;  %v2050_v53 = vld [vmem:[#allocation2 + $0x2f] sm:$0xff]  ;;  %v2051_v60 = vld [vmem:[#allocation2 + $0x47] sm:$0xff] }
 0x1e0   : > { %7096 = vmatprep.mubr.msk.bf16.mxu0 %vm280_vm3, %v8644_v59  ;;  %v1720_v24 = vmax.f32 %v1572_v5, 0.0  ;;  %v2596_v56 = vld [vmem:[#allocation2 + $0x29] sm:$0xff]  ;;  %v2599_v5 = vld [vmem:[#allocation2 + $0x51] sm:$0xff] }
 0x1e1   : > { %7132 = vmatprep.mubr.msk.bf16.mxu1 %vm280_vm3, %v8646_v0  ;;  %v2052_v61 = vld [vmem:[#allocation2 + $0x4f] sm:$0xff] }
 0x1e2   : > { %v1913_v62 = vld [vmem:[#allocation4 + $0x1d0] ss:$2 sm:$0xff]  ;;  %v1977_v63 = vld [vmem:[#allocation4 + $0x1d1] ss:$2 sm:$0xff]  ;;  %v7062_v6 = vpop.f32.mrb[124].mxu0 }
 0x1e3   : > { %v2011_v7 = vmax.f32 %v1913_v62, %v1977_v63  ;;  %v1911_v2 = vld [vmem:[#allocation4 + $0x1c0] ss:$2 sm:$0xff]  ;;  %v1975_v10 = vld [vmem:[#allocation4 + $0x1c1] ss:$2 sm:$0xff]  ;;  %v1593_v15 = vadd.f32 %v8562_v4, %v7062_v6  ;;  %v1584_v16 = vpop.f32.mrb[125].mxu0  ;;  %v8677_v6 = vpack.c.bf16 %v2050_v53, %v2049_v51 }
 0x1e4   : > { %v2010_v17 = vmax.f32 %v1911_v2, %v1975_v10  ;;  %v1585_v9 = vadd.f32 %v8562_v4, %v1584_v16  ;;  %v7063_v19 = vpop.f32.mrb[126].mxu0  ;;  %v2598_v63 = vld [vmem:[#allocation2 + $0x49] sm:$0xff]  ;;  %v7939_v2 = vld [vmem:[%s9474_s3 + $0x38] sm:$0xff]   ;;  %v8685_v10 = vpack.c.bf16 %v2052_v61, %v2051_v60 }
 0x1e5   : > { %2044 = vst.msk [vmem:[#allocation2 + $0x1f0] sm:$0xff] %vm280_vm3, %v2011_v7  ;;  %v1725_v21 = vmax.f32 %v1593_v15, 0.0  ;;  %v1596_v22 = vadd.f32 %v8562_v4, %v7063_v19  ;;  %v1587_v23 = vpop.f32.mrb[127].mxu0  ;;  %v8679_v7 = vpack.c.bf16 %v2597_v52, %v2596_v56  ;;  %v2053_v15 = vld [vmem:[#allocation2 + $0x67] sm:$0xff]  ;;  %v2601_v16 = vld [vmem:[#allocation2 + $0x71] sm:$0xff] }
 0x1e6   : > { %2043 = vst.msk [vmem:[#allocation2 + $0x1e8] sm:$0xff] %vm280_vm3, %v2010_v17  ;;  %v1723_v26 = vmax.f32 %v1585_v9, 0.0  ;;  %v1588_v27 = vadd.f32 %v8562_v4, %v1587_v23  ;;  %v8701_v17 = vld [vmem:[%s9474_s3 + $0x40] sm:$0xff]   ;;  %v2600_v9 = vld [vmem:[#allocation2 + $0x69] sm:$0xff]  ;;  %v2603_v19 = vld [vmem:[#allocation2 + $0x91] sm:$0xff] }
 0x1e7   : > { %v1789_v30 = vmax.f32 %v1721_v11, %v1725_v21  ;;  %v1726_v31 = vmax.f32 %v1596_v22, 0.0  ;;  %v8691_v11 = vpack.c.bf16 %v2599_v5, %v2598_v63  ;;  %v2056_v21 = vld [vmem:[#allocation2 + $0x8f] sm:$0xff]  ;;  %v8705_v23 = vpack.c.bf16 %v2601_v16, %v2600_v9 }
 0x1e8   : > { %v1787_v32 = vmax.f32 %v1719_v18, %v1723_v26  ;;  %v1724_v33 = vmax.f32 %v1588_v27, 0.0  ;;  %v2054_v18 = vld [vmem:[#allocation2 + $0x6f] sm:$0xff] }
 0x1e9   : > { %1853 = vst.msk [vmem:[#allocation4 + $0x1f0] sm:$0xff] %vm280_vm3, %v1789_v30  ;;  %v1790_v36 = vmax.f32 %v1722_v20, %v1726_v31  ;;  %v2055_v20 = vld [vmem:[#allocation2 + $0x87] sm:$0xff]  ;;  %v8703_v22 = vpack.c.bf16 %v2054_v18, %v2053_v15  ;;  %v2605_v27 = vld [vmem:[#allocation2 + $0xb1] sm:$0xff] }
 0x1ea   : > { %1851 = vst.msk [vmem:[#allocation4 + $0x1e0] sm:$0xff] %vm280_vm3, %v1787_v32  ;;  %v1788_v40 = vmax.f32 %v1720_v24, %v1724_v33  ;;  %v8708_v24 = vpack.c.bf16 %v2056_v21, %v2055_v20  ;;  %v2057_v30 = vld [vmem:[#allocation2 + $0xa7] sm:$0xff]  ;;  %v2058_v31 = vld [vmem:[#allocation2 + $0xaf] sm:$0xff] }
 0x1eb   : > { %1854 = vst.msk [vmem:[#allocation4 + $0x1f8] sm:$0xff] %vm280_vm3, %v1790_v36  ;;  %v2604_v32 = vld [vmem:[#allocation2 + $0xa9] sm:$0xff]  ;;  %v8720_v36 = vpack.c.bf16 %v2058_v31, %v2057_v30  ;;  %v2615_v52 = vld [vmem:[#allocation2 + $0x151] sm:$0xff] }
 0x1ec   : > { %v2130_v41 = vld [vmem:[#allocation2 + $0x1f0] sm:$0xff]  ;;  %1852 = vst.msk [vmem:[#allocation4 + $0x1e8] sm:$0xff] %vm280_vm3, %v1788_v40  ;;  %v8722_v37 = vpack.c.bf16 %v2605_v27, %v2604_v32  ;;  %v2910_v21 = vld [vmem:[#allocation2 + $0xc7] sm:$0xff] }
 0x1ed   : > { %v2129_v4 = vld [vmem:[#allocation2 + $0x1e8] sm:$0xff]  ;;  %v2609_v40 = vld [vmem:[#allocation2 + $0xf1] sm:$0xff] }
 0x1ee   : > { %v2077_v42 = vld [vmem:[#allocation2 + $0x1e7] sm:$0xff]  ;;  %v2078_v43 = vld [vmem:[#allocation2 + $0x1ef] sm:$0xff]  ;;  %v8666_v49 = vpack.c.bf16 %v2130_v41, %v2129_v4 }
 0x1ef   : > { %v8668_v50 = vpack.c.bf16 %v2078_v43, %v2077_v42  ;;  %v2606_v33 = vld [vmem:[#allocation2 + $0xc9] sm:$0xff]  ;;  %v2611_v4 = vld [vmem:[#allocation2 + $0x111] sm:$0xff]  ;;  %v8732_v42 = vpack.c.bf16 %v2609_v40, %v2608_v39 }
 0x1f0   : > { %7097 = vmatmul.mubr.msk.bf16.gmra.mrb[156].mxu0 %vm280_vm3, %v8666_v49  ;;  %v8724_v38 = vpack.c.bf16 %v2607_v35, %v2606_v33  ;;  %v2610_v41 = vld [vmem:[#allocation2 + $0x109] sm:$0xff]  ;;  %v2617_v56 = vld [vmem:[#allocation2 + $0x171] sm:$0xff] }
 0x1f1   : > { %7133 = vmatmul.mubr.msk.bf16.gmra.mrb[16].mxu1 %vm280_vm3, %v8668_v50  ;;  %7104 = vmatprep.mubr.msk.bf16.mxu0 %vm280_vm3, %v2079_v44  ;;  %v8734_v43 = vpack.c.bf16 %v2611_v4, %v2610_v41  ;;  %v2612_v44 = vld [vmem:[#allocation2 + $0x129] sm:$0xff]  ;;  %v2623_v5 = vld [vmem:[#allocation2 + $0x1d1] sm:$0xff] }
 0x1f2   : > { %7140 = vmatprep.mubr.msk.bf16.mxu1 %vm280_vm3, %v2626_v45  ;;  %v1917_v54 = vld [vmem:[#allocation4 + $0x1f0] ss:$2 sm:$0xff]  ;;  %v1981_v55 = vld [vmem:[#allocation4 + $0x1f1] ss:$2 sm:$0xff]  ;;  %v2613_v45 = vld [vmem:[#allocation2 + $0x131] sm:$0xff] }
 0x1f3   : > { %v2013_v57 = vmax.f32 %v1917_v54, %v1981_v55  ;;  %v1915_v58 = vld [vmem:[#allocation4 + $0x1e0] ss:$2 sm:$0xff]  ;;  %v1979_v8 = vld [vmem:[#allocation4 + $0x1e1] ss:$2 sm:$0xff]  ;;  %v8740_v53 = vpack.c.bf16 %v2613_v45, %v2612_v44  ;;  %v2912_v27 = vld [vmem:[#allocation2 + $0xe7] sm:$0xff] }
 0x1f4   : > { %v2012_v62 = vmax.f32 %v1915_v58, %v1979_v8  ;;  %v2614_v51 = vld [vmem:[#allocation2 + $0x149] sm:$0xff]  ;;  %v2619_v58 = vld [vmem:[#allocation2 + $0x191] sm:$0xff] }
 0x1f5   : > { %2046 = vst.msk [vmem:[#allocation2 + $0x210] sm:$0xff] %vm280_vm3, %v2013_v57  ;;  %v8742_v54 = vpack.c.bf16 %v2615_v52, %v2614_v51  ;;  %v2616_v55 = vld [vmem:[#allocation2 + $0x169] sm:$0xff]  ;;  %v2625_v18 = vld [vmem:[#allocation2 + $0x1f1] sm:$0xff] }
 0x1f6   : > { %2045 = vst.msk [vmem:[#allocation2 + $0x208] sm:$0xff] %vm280_vm3, %v2012_v62  ;;  %v2618_v57 = vld [vmem:[#allocation2 + $0x189] sm:$0xff]  ;;  %v8748_v8 = vpack.c.bf16 %v2617_v56, %v2616_v55  ;;  %v2621_v62 = vld [vmem:[#allocation2 + $0x1b1] sm:$0xff] }
 0x1f7   : > { %v8750_v60 = vpack.c.bf16 %v2619_v58, %v2618_v57  ;;  %v2620_v61 = vld [vmem:[#allocation2 + $0x1a9] sm:$0xff]  ;;  %v7943_v57 = vld [vmem:[%s9474_s3 + $0x58] sm:$0xff]  }
 0x1f8   : > { %7105 = vmatmul.mubr.msk.bf16.vlgmr.msra.gmra.mrb[128].mxu0 %vm280_vm3, %v8677_v6  ;;  %v2622_v63 = vld [vmem:[#allocation2 + $0x1c9] sm:$0xff] }
 0x1f9   : > { %7141 = vmatmul.mubr.msk.bf16.vlgmr.msra.gmra.mrb[20].mxu1 %vm280_vm3, %v8679_v7  ;;  %7108 = vmatprep.mubr.msk.bf16.mxu0 %vm280_vm3, %v8685_v10  ;;  %v8758_v15 = vpack.c.bf16 %v2623_v5, %v2622_v63  ;;  %v2624_v16 = vld [vmem:[#allocation2 + $0x1e9] sm:$0xff] }
 0x1fa   : > { %7173 = vmatpush3.bf16.msra.mxu1 %v8498_v12  ;;  %7144 = vmatprep.mubr.msk.bf16.mxu1 %vm280_vm3, %v8691_v11  ;;  %v2602_v12 = vld [vmem:[#allocation2 + $0x89] sm:$0xff]  ;;  %v8764_v9 = vpack.c.bf16 %v2625_v18, %v2624_v16 }
 0x1fb   : > { %7174 = vmatprep.subr.bf16.mxu1 %v7939_v2  ;;  %v8710_v26 = vpack.c.bf16 %v2603_v19, %v2602_v12  ;;  %v7941_v19 = vld [vmem:[%s9474_s3 + $0x48] sm:$0xff]   ;;  %v7942_v20 = vld [vmem:[%s9474_s3 + $0x50] sm:$0xff]  }
 0x1fc   : > { %v2913_v30 = vld [vmem:[#allocation2 + $0xef] sm:$0xff] }
 0x1fd   : > { %v8795_v35 = vpack.c.bf16 %v2913_v30, %v2912_v27  ;;  %v3208_v45 = vld [vmem:[#allocation2 + $0x48] sm:$0xff]  ;;  %v3209_v51 = vld [vmem:[#allocation2 + $0x50] sm:$0xff] }
 0x1fe   : > { %7175 = vmatpush3.bf16.msra.mxu1 %v7939_v2  ;;  %v8756_v2 = vpack.c.bf16 %v2621_v62, %v2620_v61  ;;  %v3210_v52 = vld [vmem:[#allocation2 + $0x68] sm:$0xff]  ;;  %v3211_v55 = vld [vmem:[#allocation2 + $0x70] sm:$0xff]  ;;  %v8830_v56 = vpack.c.bf16 %v3209_v51, %v3208_v45  ;;  %v7944_v61 = vld [vmem:[%s9474_s3 + $0x60] sm:$0xff]  }
 0x1ff   : > { %7208 = vmatprep.subr.bf16.mxu1 %v8701_v17  ;;  %v8835_v58 = vpack.c.bf16 %v3211_v55, %v3210_v52  ;;  %v3212_v62 = vld [vmem:[#allocation2 + $0x88] sm:$0xff]  ;;  %v3213_v63 = vld [vmem:[#allocation2 + $0x90] sm:$0xff] }
 0x200   : > { %7109 = vmatmul.mubr.msk.bf16.gmra.mrb[132].mxu0 %vm280_vm3, %v8703_v22  ;;  %v3214_v5 = vld [vmem:[#allocation2 + $0xa8] sm:$0xff]  ;;  %v3215_v16 = vld [vmem:[#allocation2 + $0xb0] sm:$0xff]  ;;  %v8844_v18 = vpack.c.bf16 %v3213_v63, %v3212_v62 }
 0x201   : > { %7145 = vmatmul.mubr.msk.bf16.gmra.mrb[24].mxu1 %vm280_vm3, %v8705_v23  ;;  %7112 = vmatprep.mubr.msk.bf16.mxu0 %vm280_vm3, %v8708_v24  ;;  %v3218_v30 = vld [vmem:[#allocation2 + $0xe8] sm:$0xff]  ;;  %v3221_v51 = vld [vmem:[#allocation2 + $0x110] sm:$0xff] }
 0x202   : > { %7148 = vmatprep.mubr.msk.bf16.mxu1 %vm280_vm3, %v8710_v26  ;;  %v3220_v45 = vld [vmem:[#allocation2 + $0x108] sm:$0xff]  ;;  %v3223_v55 = vld [vmem:[#allocation2 + $0x130] sm:$0xff] }
 0x203   : > { %v3222_v52 = vld [vmem:[#allocation2 + $0x128] sm:$0xff] }
 0x204   : > { %v8870_v62 = vpack.c.bf16 %v3223_v55, %v3222_v52 }
 0x208   : > { %7113 = vmatmul.mubr.msk.bf16.gmra.mrb[136].mxu0 %vm280_vm3, %v8720_v36 }
 0x209   : > { %7149 = vmatmul.mubr.msk.bf16.gmra.mrb[28].mxu1 %vm280_vm3, %v8722_v37 }
 0x20a   : > { %7152 = vmatprep.mubr.msk.bf16.mxu1 %vm280_vm3, %v8724_v38 }
 0x211   : > { %7153 = vmatmul.mubr.msk.bf16.gmra.mrb[0].mxu1 %vm280_vm3, %v8732_v42 }
 0x212   : > { %7156 = vmatprep.mubr.msk.bf16.mxu1 %vm280_vm3, %v8734_v43 }
 0x219   : > { %7157 = vmatmul.mubr.msk.bf16.gmra.mrb[4].mxu1 %vm280_vm3, %v8740_v53 }
 0x21a   : > { %7160 = vmatprep.mubr.msk.bf16.mxu1 %vm280_vm3, %v8742_v54 }
 0x221   : > { %7161 = vmatmul.mubr.msk.bf16.gmra.mrb[8].mxu1 %vm280_vm3, %v8748_v8 }
 0x222   : > { %7164 = vmatprep.mubr.msk.bf16.mxu1 %vm280_vm3, %v8750_v60 }
 0x229   : > { %7165 = vmatmul.mubr.msk.bf16.gmra.mrb[12].mxu1 %vm280_vm3, %v8756_v2 }
 0x22a   : > { %7168 = vmatprep.mubr.msk.bf16.mxu1 %vm280_vm3, %v8758_v15 }
 0x231   : > { %7169 = vmatmul.mubr.msk.bf16.gmra.mrb[16].mxu1 %vm280_vm3, %v8764_v9 }
 0x232   : > { %7176 = vmatprep.mubr.msk.bf16.mxu1 %vm280_vm3, %v8677_v6 }
 0x239   : > { %7177 = vmatmul.mubr.msk.bf16.vlgmr.msra.gmra.mrb[20].mxu1 %vm280_vm3, %v8685_v10 }
 0x23a   : > { %7209 = vmatpush3.bf16.msra.mxu1 %v8701_v17  ;;  %7180 = vmatprep.mubr.msk.bf16.mxu1 %vm280_vm3, %v8703_v22  ;;  %v2911_v17 = vld [vmem:[#allocation2 + $0xcf] sm:$0xff] }
 0x23b   : > { %7210 = vmatprep.subr.bf16.mxu1 %v7941_v19  ;;  %v8793_v33 = vpack.c.bf16 %v2911_v17, %v2910_v21  ;;  %v3216_v21 = vld [vmem:[#allocation2 + $0xc8] sm:$0xff]  ;;  %v3217_v17 = vld [vmem:[#allocation2 + $0xd0] sm:$0xff] }
 0x23e   : > { %7211 = vmatpush3.bf16.msra.mxu1 %v7941_v19  ;;  %v8846_v19 = vpack.c.bf16 %v3215_v16, %v3214_v5 }
 0x23f   : > { %7244 = vmatprep.subr.bf16.mxu1 %v7942_v20 }
 0x241   : > { %7181 = vmatmul.mubr.msk.bf16.gmra.mrb[24].mxu1 %vm280_vm3, %v8708_v24 }
 0x242   : > { %7184 = vmatprep.mubr.msk.bf16.mxu1 %vm280_vm3, %v8720_v36 }
 0x243   : > { %v8785_v6 = vpop.f32.mrb[140].mxu0 }
 0x244   : > { %v8787_v12 = vpop.f32.mrb[141].mxu0 }
 0x245   : > { %v8789_v31 = vpop.f32.mrb[142].mxu0 }
 0x246   : > { %v8791_v32 = vpop.f32.mrb[143].mxu0 }
 0x249   : > { %7185 = vmatmul.mubr.msk.bf16.gmra.mrb[28].mxu1 %vm280_vm3, %v8793_v33 }
 0x24a   : > { %7188 = vmatprep.mubr.msk.bf16.mxu1 %vm280_vm3, %v8795_v35 }
 0x251   : > { %7189 = vmatmul.mubr.msk.bf16.gmra.mrb[0].mxu1 %vm280_vm3, %v8513_v47 }
 0x252   : > { %7192 = vmatprep.mubr.msk.bf16.mxu1 %vm280_vm3, %v8532_v25  ;;  %v2930_v25 = vld [vmem:[#allocation2 + $0x207] sm:$0xff] }
 0x259   : > { %7193 = vmatmul.mubr.msk.bf16.gmra.mrb[4].mxu1 %vm280_vm3, %v8553_v3  ;;  %v2931_v3 = vld [vmem:[#allocation2 + $0x20f] sm:$0xff] }
 0x25a   : > { %7196 = vmatprep.mubr.msk.bf16.mxu1 %vm280_vm3, %v8580_v48  ;;  %v3206_v48 = vld [vmem:[#allocation2 + $0x28] sm:$0xff]  ;;  %v8825_v4 = vpack.c.bf16 %v2931_v3, %v2930_v25  ;;  %v3219_v25 = vld [vmem:[#allocation2 + $0xf0] sm:$0xff] }
 0x261   : > { %7197 = vmatmul.mubr.msk.bf16.gmra.mrb[8].mxu1 %vm280_vm3, %v8602_v29  ;;  %v3207_v29 = vld [vmem:[#allocation2 + $0x30] sm:$0xff] }
 0x262   : > { %7200 = vmatprep.mubr.msk.bf16.mxu1 %vm280_vm3, %v8624_v14  ;;  %v3238_v44 = vpack.c.bf16 %v3207_v29, %v3206_v48  ;;  %v8860_v29 = vpack.c.bf16 %v3217_v17, %v3216_v21 }
 0x263   : > { %v8813_v39 = vpop.f32.mrb[144].mxu0 }
 0x264   : > { %v8815_v40 = vpop.f32.mrb[145].mxu0 }
 0x265   : > { %v8817_v47 = vpop.f32.mrb[146].mxu0 }
 0x266   : > { %v8819_v41 = vpop.f32.mrb[147].mxu0 }
 0x269   : > { %7201 = vmatmul.mubr.msk.bf16.gmra.mrb[12].mxu1 %vm280_vm3, %v8646_v0 }
 0x26a   : > { %7204 = vmatprep.mubr.msk.bf16.mxu1 %vm280_vm3, %v8668_v50 }
 0x271   : > { %7205 = vmatmul.mubr.msk.bf16.gmra.mrb[16].mxu1 %vm280_vm3, %v8825_v4 }
 0x272   : > { %7212 = vmatprep.mubr.msk.bf16.mxu1 %vm280_vm3, %v3238_v44  ;;  %v8862_v44 = vpack.c.bf16 %v3219_v25, %v3218_v30 }
 0x279   : > { %7213 = vmatmul.mubr.msk.bf16.vlgmr.msra.gmra.mrb[20].mxu1 %vm280_vm3, %v8830_v56 }
 0x27a   : > { %7245 = vmatpush3.bf16.msra.mxu1 %v7942_v20  ;;  %7216 = vmatprep.mubr.msk.bf16.mxu1 %vm280_vm3, %v8835_v58 }
 0x27b   : > { %7246 = vmatprep.subr.bf16.mxu1 %v7943_v57 }
 0x27e   : > { %7247 = vmatpush3.bf16.msra.mxu1 %v7943_v57  ;;  %v8868_v57 = vpack.c.bf16 %v3221_v51, %v3220_v45 }
 0x27f   : > { %7280 = vmatprep.subr.bf16.mxu1 %v7944_v61 }
 0x281   : > { %7217 = vmatmul.mubr.msk.bf16.gmra.mrb[24].mxu1 %vm280_vm3, %v8844_v18 }
 0x282   : > { %7220 = vmatprep.mubr.msk.bf16.mxu1 %vm280_vm3, %v8846_v19 }
 0x283   : > { %v8852_v20 = vpop.f32.mrb[148].mxu0 }
 0x284   : > { %v8854_v27 = vpop.f32.mrb[149].mxu0 }
 0x285   : > { %v8856_v3 = vpop.f32.mrb[150].mxu0 }
 0x286   : > { %9481 = vst [vmem:[#allocation7_spill] sm:$0xff] %v8856_v3  ;;  %v8858_v48 = vpop.f32.mrb[151].mxu0  ;;  %v3840_v3 = vld [vmem:[#allocation2 + $0x18f] sm:$0xff] }
 0x287   : > { %9482 = vst [vmem:[#allocation8_spill] sm:$0xff] %v8858_v48  ;;  %v3839_v48 = vld [vmem:[#allocation2 + $0x187] sm:$0xff] }
 0x289   : > { %7221 = vmatmul.mubr.msk.bf16.gmra.mrb[28].mxu1 %vm280_vm3, %v8860_v29 }
 0x28a   : > { %7224 = vmatprep.mubr.msk.bf16.mxu1 %vm280_vm3, %v8862_v44 }
 0x291   : > { %7225 = vmatmul.mubr.msk.bf16.gmra.mrb[0].mxu1 %vm280_vm3, %v8868_v57 }
 0x292   : > { %7228 = vmatprep.mubr.msk.bf16.mxu1 %vm280_vm3, %v8870_v62 }
 0x299   : > { %7229 = vmatmul.mubr.msk.bf16.gmra.mrb[4].mxu1 %vm280_vm3, %v8551_v1  ;;  %v3236_v1 = vld [vmem:[#allocation2 + $0x208] sm:$0xff] }
 0x29a   : > { %7232 = vmatprep.mubr.msk.bf16.mxu1 %vm280_vm3, %v8578_v46  ;;  %v3237_v46 = vld [vmem:[#allocation2 + $0x210] sm:$0xff] }
 0x2a1   : > { %7233 = vmatmul.mubr.msk.bf16.gmra.mrb[8].mxu1 %vm280_vm3, %v8600_v28  ;;  %v8896_v28 = vpack.c.bf16 %v3237_v46, %v3236_v1 }
 0x2a2   : > { %7236 = vmatprep.mubr.msk.bf16.mxu1 %vm280_vm3, %v8622_v13  ;;  %v7945_v13 = vld [vmem:[%s9474_s3 + $0x68] sm:$0xff]  }
 0x2a3   : > { %v8884_v63 = vpop.f32.mrb[152].mxu0 }
 0x2a4   : > { %9483 = vst [vmem:[#allocation9_spill] sm:$0xff] %v8884_v63  ;;  %v8886_v5 = vpop.f32.mrb[153].mxu0 }
 0x2a5   : > { %9484 = vst [vmem:[#allocation10_spill] sm:$0xff] %v8886_v5  ;;  %v8888_v16 = vpop.f32.mrb[154].mxu0  ;;  %v3836_v5 = vld [vmem:[#allocation2 + $0x14f] sm:$0xff] }
 0x2a6   : > { %9485 = vst [vmem:[#allocation11_spill] sm:$0xff] %v8888_v16  ;;  %v8890_v21 = vpop.f32.mrb[155].mxu0  ;;  %v3835_v16 = vld [vmem:[#allocation2 + $0x147] sm:$0xff] }
 0x2a7   : > { %9486 = vst [vmem:[#allocation12_spill] sm:$0xff] %v8890_v21  ;;  %v7947_v21 = vld [vmem:[%s9474_s3 + $0x78] sm:$0xff]   ;;  %v3859_v63 = vpack.c.bf16 %v3836_v5, %v3835_v16  ;;  %v4150_v16 = vld [vmem:[#allocation2 + $0x1d0] sm:$0xff] }
 0x2a9   : > { %7237 = vmatmul.mubr.msk.bf16.gmra.mrb[12].mxu1 %vm280_vm3, %v8644_v59  ;;  %v7946_v59 = vld [vmem:[%s9474_s3 + $0x70] sm:$0xff]  }
 0x2aa   : > { %7240 = vmatprep.mubr.msk.bf16.mxu1 %vm280_vm3, %v8666_v49 }
 0x2b1   : > { %7241 = vmatmul.mubr.msk.bf16.gmra.mrb[16].mxu1 %vm280_vm3, %v8896_v28 }
 0x2b2   : > { %7248 = vmatprep.mubr.msk.bf16.mxu1 %vm280_vm3, %v8679_v7 }
 0x2b9   : > { %7249 = vmatmul.mubr.msk.bf16.vlgmr.msra.gmra.mrb[20].mxu1 %vm280_vm3, %v8691_v11 }
 0x2ba   : > { %7281 = vmatpush3.bf16.msra.mxu1 %v7944_v61  ;;  %7252 = vmatprep.mubr.msk.bf16.mxu1 %vm280_vm3, %v8705_v23 }
 0x2bb   : > { %7282 = vmatprep.subr.bf16.mxu1 %v7945_v13 }
 0x2be   : > { %7283 = vmatpush3.bf16.msra.mxu1 %v7945_v13 }
 0x2bf   : > { %7316 = vmatprep.subr.bf16.mxu1 %v7946_v59 }
 0x2c1   : > { %7253 = vmatmul.mubr.msk.bf16.gmra.mrb[24].mxu1 %vm280_vm3, %v8710_v26 }
 0x2c2   : > { %7256 = vmatprep.mubr.msk.bf16.mxu1 %vm280_vm3, %v8722_v37 }
 0x2c3   : > { %v8916_v49 = vpop.f32.mrb[156].mxu0 }
 0x2c4   : > { %9487 = vst [vmem:[#allocation13_spill] sm:$0xff] %v8916_v49  ;;  %v8918_v7 = vpop.f32.mrb[157].mxu0 }
 0x2c5   : > { %9488 = vst [vmem:[#allocation14_spill] sm:$0xff] %v8918_v7  ;;  %v8920_v11 = vpop.f32.mrb[158].mxu0  ;;  %v3543_v7 = vld [vmem:[#allocation2 + $0x211] sm:$0xff] }
 0x2c6   : > { %9489 = vst [vmem:[#allocation15_spill] sm:$0xff] %v8920_v11  ;;  %v8922_v61 = vpop.f32.mrb[159].mxu0  ;;  %v3542_v11 = vld [vmem:[#allocation2 + $0x209] sm:$0xff] }
 0x2c7   : > { %9490 = vst [vmem:[#allocation16_spill] sm:$0xff] %v8922_v61  ;;  %v8968_v49 = vpack.c.bf16 %v3543_v7, %v3542_v11  ;;  %v7948_v7 = vld [vmem:[%s9474_s3 + $0x80] sm:$0xff]   ;;  %v3832_v11 = vld [vmem:[#allocation2 + $0x10f] sm:$0xff] }
 0x2c9   : > { %7257 = vmatmul.mubr.msk.bf16.gmra.mrb[28].mxu1 %vm280_vm3, %v8724_v38 }
 0x2ca   : > { %7260 = vmatprep.mubr.msk.bf16.mxu1 %vm280_vm3, %v8732_v42 }
 0x2cb   : > { %v8928_v17 = vpop.f32.mrb[128].mxu0 }
 0x2cc   : > { %v8930_v30 = vpop.f32.mrb[129].mxu0 }
 0x2cd   : > { %v8932_v25 = vpop.f32.mrb[130].mxu0 }
 0x2ce   : > { %v8934_v45 = vpop.f32.mrb[131].mxu0 }
 0x2d1   : > { %7261 = vmatmul.mubr.msk.bf16.gmra.mrb[0].mxu1 %vm280_vm3, %v8734_v43 }
 0x2d2   : > { %7264 = vmatprep.mubr.msk.bf16.mxu1 %vm280_vm3, %v8740_v53 }
 0x2d3   : > { %v8940_v51 = vpop.f32.mrb[132].mxu0 }
 0x2d4   : > { %v8942_v52 = vpop.f32.mrb[133].mxu0 }
 0x2d5   : > { %v8944_v55 = vpop.f32.mrb[134].mxu0 }
 0x2d6   : > { %v8946_v1 = vpop.f32.mrb[135].mxu0 }
 0x2d9   : > { %7265 = vmatmul.mubr.msk.bf16.gmra.mrb[4].mxu1 %vm280_vm3, %v8742_v54 }
 0x2da   : > { %7268 = vmatprep.mubr.msk.bf16.mxu1 %vm280_vm3, %v8748_v8 }
 0x2db   : > { %v8952_v46 = vpop.f32.mrb[136].mxu0 }
 0x2dc   : > { %v8954_v13 = vpop.f32.mrb[137].mxu0 }
 0x2dd   : > { %v8956_v34 = vpop.f32.mrb[138].mxu0 }
 0x2de   : > { %v8958_v61 = vpop.f32.mrb[139].mxu0 }
 0x2e1   : > { %7269 = vmatmul.mubr.msk.bf16.gmra.mrb[8].mxu1 %vm280_vm3, %v8750_v60 }
 0x2e2   : > { %7272 = vmatprep.mubr.msk.bf16.mxu1 %vm280_vm3, %v8756_v2 }
 0x2e9   : > { %7273 = vmatmul.mubr.msk.bf16.gmra.mrb[12].mxu1 %vm280_vm3, %v8758_v15 }
 0x2ea   : > { %7276 = vmatprep.mubr.msk.bf16.mxu1 %vm280_vm3, %v8764_v9 }
 0x2f1   : > { %7277 = vmatmul.mubr.msk.bf16.gmra.mrb[16].mxu1 %vm280_vm3, %v8968_v49 }
 0x2f2   : > { %7284 = vmatprep.mubr.msk.bf16.mxu1 %vm280_vm3, %v8685_v10  ;;  %v3831_v10 = vld [vmem:[#allocation2 + $0x107] sm:$0xff] }
 0x2f9   : > { %7285 = vmatmul.mubr.msk.bf16.vlgmr.msra.gmra.mrb[20].mxu1 %vm280_vm3, %v8703_v22  ;;  %v3857_v22 = vpack.c.bf16 %v3832_v11, %v3831_v10  ;;  %v3861_v11 = vpack.c.bf16 %v3840_v3, %v3839_v48 }
 0x2fa   : > { %7317 = vmatpush3.bf16.msra.mxu1 %v7946_v59  ;;  %7288 = vmatprep.mubr.msk.bf16.mxu1 %vm280_vm3, %v8708_v24  ;;  %v3833_v24 = vld [vmem:[#allocation2 + $0x127] sm:$0xff]  ;;  %v3834_v59 = vld [vmem:[#allocation2 + $0x12f] sm:$0xff] }
 0x2fb   : > { %7318 = vmatprep.subr.bf16.mxu1 %v7947_v21 }
 0x2fe   : > { %7319 = vmatpush3.bf16.msra.mxu1 %v7947_v21  ;;  %v3858_v21 = vpack.c.bf16 %v3834_v59, %v3833_v24  ;;  %v4152_v24 = vld [vmem:[#allocation2 + $0x1f0] sm:$0xff] }
 0x2ff   : > { %7352 = vmatprep.subr.bf16.mxu1 %v7948_v7 }
 0x301   : > { %7289 = vmatmul.mubr.msk.bf16.gmra.mrb[24].mxu1 %vm280_vm3, %v8720_v36  ;;  %v3837_v36 = vld [vmem:[#allocation2 + $0x167] sm:$0xff] }
 0x302   : > { %7292 = vmatprep.mubr.msk.bf16.mxu1 %vm280_vm3, %v8793_v33  ;;  %v3838_v33 = vld [vmem:[#allocation2 + $0x16f] sm:$0xff] }
 0x303   : > { %v3860_v10 = vpack.c.bf16 %v3838_v33, %v3837_v36  ;;  %v4156_v36 = vld [vmem:[#allocation2 + $0x230] sm:$0xff] }
 0x309   : > { %7293 = vmatmul.mubr.msk.bf16.gmra.mrb[28].mxu1 %vm280_vm3, %v8795_v35  ;;  %v3849_v35 = vld [vmem:[#allocation2 + $0x227] sm:$0xff] }
 0x30a   : > { %7296 = vmatprep.mubr.msk.bf16.mxu1 %vm280_vm3, %v3857_v22 }
 0x311   : > { %7297 = vmatmul.mubr.msk.bf16.gmra.mrb[0].mxu1 %vm280_vm3, %v3858_v21  ;;  %v4155_v21 = vld [vmem:[#allocation2 + $0x228] sm:$0xff] }
 0x312   : > { %7300 = vmatprep.mubr.msk.bf16.mxu1 %vm280_vm3, %v3859_v63  ;;  %v3850_v63 = vld [vmem:[#allocation2 + $0x22f] sm:$0xff]  ;;  %v4172_v33 = vpack.c.bf16 %v4156_v36, %v4155_v21 }
 0x313   : > { %v3866_v5 = vpack.c.bf16 %v3850_v63, %v3849_v35 }
 0x319   : > { %7301 = vmatmul.mubr.msk.bf16.gmra.mrb[4].mxu1 %vm280_vm3, %v3860_v10  ;;  %v4431_v10 = vld [vmem:[#allocation2 + $0x49] sm:$0xff] }
 0x31a   : > { %7304 = vmatprep.mubr.msk.bf16.mxu1 %vm280_vm3, %v3861_v11  ;;  %v4432_v11 = vld [vmem:[#allocation2 + $0x51] sm:$0xff] }
 0x31b   : > { %v4463_v35 = vpack.c.bf16 %v4432_v11, %v4431_v10 }
 0x321   : > { %7305 = vmatmul.mubr.msk.bf16.gmra.mrb[8].mxu1 %vm280_vm3, %v8624_v14  ;;  %v7949_v14 = vld [vmem:[%s9474_s3 + $0x88] sm:$0xff]  }
 0x322   : > { %7308 = vmatprep.mubr.msk.bf16.mxu1 %vm280_vm3, %v8646_v0  ;;  %v4141_v0 = vld [vmem:[#allocation2 + $0x148] sm:$0xff] }
 0x329   : > { %7309 = vmatmul.mubr.msk.bf16.gmra.mrb[12].mxu1 %vm280_vm3, %v8668_v50  ;;  %v4142_v50 = vld [vmem:[#allocation2 + $0x150] sm:$0xff] }
 0x32a   : > { %7312 = vmatprep.mubr.msk.bf16.mxu1 %vm280_vm3, %v8825_v4  ;;  %v4165_v4 = vpack.c.bf16 %v4142_v50, %v4141_v0 }
 0x331   : > { %7313 = vmatmul.mubr.msk.bf16.gmra.mrb[16].mxu1 %vm280_vm3, %v3866_v5 }
 0x332   : > { %7320 = vmatprep.mubr.msk.bf16.mxu1 %vm280_vm3, %v8830_v56  ;;  %v4143_v56 = vld [vmem:[#allocation2 + $0x168] sm:$0xff] }
 0x339   : > { %7321 = vmatmul.mubr.msk.bf16.vlgmr.msra.gmra.mrb[20].mxu1 %vm280_vm3, %v8835_v58  ;;  %v4144_v58 = vld [vmem:[#allocation2 + $0x170] sm:$0xff] }
 0x33a   : > { %7353 = vmatpush3.bf16.msra.mxu1 %v7948_v7  ;;  %7324 = vmatprep.mubr.msk.bf16.mxu1 %vm280_vm3, %v8844_v18  ;;  %v4145_v18 = vld [vmem:[#allocation2 + $0x188] sm:$0xff]  ;;  %v4166_v3 = vpack.c.bf16 %v4144_v58, %v4143_v56 }
 0x33b   : > { %7354 = vmatprep.subr.bf16.mxu1 %v7949_v14 }
 0x33e   : > { %7355 = vmatpush3.bf16.msra.mxu1 %v7949_v14 }
 0x341   : > { %7325 = vmatmul.mubr.msk.bf16.gmra.mrb[24].mxu1 %vm280_vm3, %v8846_v19  ;;  %v4146_v19 = vld [vmem:[#allocation2 + $0x190] sm:$0xff] }
 0x342   : > { %7328 = vmatprep.mubr.msk.bf16.mxu1 %vm280_vm3, %v8860_v29  ;;  %v4167_v48 = vpack.c.bf16 %v4146_v19, %v4145_v18  ;;  %v4147_v29 = vld [vmem:[#allocation2 + $0x1a8] sm:$0xff] }
 0x349   : > { %7329 = vmatmul.mubr.msk.bf16.gmra.mrb[28].mxu1 %vm280_vm3, %v8862_v44  ;;  %v4148_v44 = vld [vmem:[#allocation2 + $0x1b0] sm:$0xff] }
 0x34a   : > { %7332 = vmatprep.mubr.msk.bf16.mxu1 %vm280_vm3, %v8868_v57  ;;  %v4149_v57 = vld [vmem:[#allocation2 + $0x1c8] sm:$0xff]  ;;  %v4168_v7 = vpack.c.bf16 %v4148_v44, %v4147_v29 }
 0x34b   : > { %v4169_v22 = vpack.c.bf16 %v4150_v16, %v4149_v57 }
 0x351   : > { %7333 = vmatmul.mubr.msk.bf16.gmra.mrb[0].mxu1 %vm280_vm3, %v8870_v62  ;;  %v4151_v62 = vld [vmem:[#allocation2 + $0x1e8] sm:$0xff] }
 0x352   : > { %7336 = vmatprep.mubr.msk.bf16.mxu1 %vm280_vm3, %v4165_v4  ;;  %v4170_v59 = vpack.c.bf16 %v4152_v24, %v4151_v62 }
 0x359   : > { %7337 = vmatmul.mubr.msk.bf16.gmra.mrb[4].mxu1 %vm280_vm3, %v4166_v3 }
 0x35a   : > { %7340 = vmatprep.mubr.msk.bf16.mxu1 %vm280_vm3, %v4167_v48 }
 0x361   : > { %7341 = vmatmul.mubr.msk.bf16.gmra.mrb[8].mxu1 %vm280_vm3, %v4168_v7 }
 0x362   : > { %7344 = vmatprep.mubr.msk.bf16.mxu1 %vm280_vm3, %v4169_v22 }
 0x369   : > { %7345 = vmatmul.mubr.msk.bf16.gmra.mrb[12].mxu1 %vm280_vm3, %v4170_v59 }
 0x36a   : > { %7348 = vmatprep.mubr.msk.bf16.mxu1 %vm280_vm3, %v8896_v28 }
 0x371   : > { %7349 = vmatmul.mubr.msk.bf16.gmra.mrb[16].mxu1 %vm280_vm3, %v4172_v33 }
 0x372   : > { %7356 = vmatprep.mubr.msk.bf16.mxu1 %vm280_vm3, %v4463_v35 }
 0x379   : > { %7357 = vmatmul.mubr.msk.bf16.vlgmr.msra.gmra.mrb[20].mxu1 %vm280_vm3, %v8705_v23  ;;  %v4461_v23 = vld [vmem:[#allocation2 + $0x229] sm:$0xff] }
 0x37a   : > { %7360 = vmatprep.mubr.msk.bf16.mxu1 %vm280_vm3, %v8710_v26  ;;  %v4462_v26 = vld [vmem:[#allocation2 + $0x231] sm:$0xff] }
 0x381   : > { %7361 = vmatmul.mubr.msk.bf16.gmra.mrb[24].mxu1 %vm280_vm3, %v8722_v37  ;;  %v4478_v37 = vpack.c.bf16 %v4462_v26, %v4461_v23 }
 0x382   : > { %7364 = vmatprep.mubr.msk.bf16.mxu1 %vm280_vm3, %v8724_v38  ;;  %v9491_v38 = vmov 0.0  }
 0x383   : > { %354 = vst.msk [vmem:[#allocation3] sm:$0xff] %vm353_vm4, %v9491_v38  ;;  %355 = vst.msk [vmem:[#allocation3 + $0x8] sm:$0xff] %vm353_vm4, %v9491_v38 }
 0x384   : > { %356 = vst.msk [vmem:[#allocation3 + $0x10] sm:$0xff] %vm353_vm4, %v9491_v38  ;;  %357 = vst.msk [vmem:[#allocation3 + $0x18] sm:$0xff] %vm353_vm4, %v9491_v38 }
 0x385   : > { %358 = vst.msk [vmem:[#allocation3 + $0x20] sm:$0xff] %vm353_vm4, %v9491_v38  ;;  %359 = vst.msk [vmem:[#allocation3 + $0x28] sm:$0xff] %vm353_vm4, %v9491_v38 }
 0x386   : > { %360 = vst.msk [vmem:[#allocation3 + $0x30] sm:$0xff] %vm353_vm4, %v9491_v38  ;;  %361 = vst.msk [vmem:[#allocation3 + $0x38] sm:$0xff] %vm353_vm4, %v9491_v38 }
 0x387   : > { %362 = vst.msk [vmem:[#allocation3 + $0x40] sm:$0xff] %vm353_vm4, %v9491_v38  ;;  %363 = vst.msk [vmem:[#allocation3 + $0x48] sm:$0xff] %vm353_vm4, %v9491_v38 }
 0x388   : > { %364 = vst.msk [vmem:[#allocation3 + $0x50] sm:$0xff] %vm353_vm4, %v9491_v38  ;;  %365 = vst.msk [vmem:[#allocation3 + $0x58] sm:$0xff] %vm353_vm4, %v9491_v38 }
 0x389   : > { %7365 = vmatmul.mubr.msk.bf16.gmra.mrb[28].mxu1 %vm280_vm3, %v8732_v42  ;;  %366 = vst.msk [vmem:[#allocation3 + $0x60] sm:$0xff] %vm353_vm4, %v9491_v38  ;;  %367 = vst.msk [vmem:[#allocation3 + $0x68] sm:$0xff] %vm353_vm4, %v9491_v38  ;;  %v7950_v42 = vld [vmem:[%s9476_s5 + $0x20] sm:$0xff]  }
 0x38a   : > { %7368 = vmatprep.mubr.msk.bf16.mxu1 %vm280_vm3, %v8734_v43  ;;  %368 = vst.msk [vmem:[#allocation3 + $0x70] sm:$0xff] %vm353_vm4, %v9491_v38  ;;  %369 = vst.msk [vmem:[#allocation3 + $0x78] sm:$0xff] %vm353_vm4, %v9491_v38  ;;  %7388 = vmatprep.subr.bf16.mxu0 %v7950_v42  ;;  %v7951_v43 = vld [vmem:[%s9476_s5 + $0x28] sm:$0xff]  }
 0x38b   : > { %370 = vst.msk [vmem:[#allocation3 + $0x80] sm:$0xff] %vm353_vm4, %v9491_v38  ;;  %371 = vst.msk [vmem:[#allocation3 + $0x88] sm:$0xff] %vm353_vm4, %v9491_v38  ;;  %7389 = vmatpush3.bf16.msra.mxu0 %v7950_v42 }
 0x38c   : > { %372 = vst.msk [vmem:[#allocation3 + $0x90] sm:$0xff] %vm353_vm4, %v9491_v38  ;;  %373 = vst.msk [vmem:[#allocation3 + $0x98] sm:$0xff] %vm353_vm4, %v9491_v38  ;;  %7390 = vmatprep.subr.bf16.mxu0 %v7951_v43 }
 0x38d   : > { %374 = vst.msk [vmem:[#allocation3 + $0xa0] sm:$0xff] %vm353_vm4, %v9491_v38  ;;  %375 = vst.msk [vmem:[#allocation3 + $0xa8] sm:$0xff] %vm353_vm4, %v9491_v38 }
 0x38e   : > { %376 = vst.msk [vmem:[#allocation3 + $0xb0] sm:$0xff] %vm353_vm4, %v9491_v38  ;;  %377 = vst.msk [vmem:[#allocation3 + $0xb8] sm:$0xff] %vm353_vm4, %v9491_v38 }
 0x38f   : > { %378 = vst.msk [vmem:[#allocation3 + $0xc0] sm:$0xff] %vm353_vm4, %v9491_v38  ;;  %379 = vst.msk [vmem:[#allocation3 + $0xc8] sm:$0xff] %vm353_vm4, %v9491_v38  ;;  %7391 = vmatpush3.bf16.msra.mxu0 %v7951_v43 }
 0x390   : > { %380 = vst.msk [vmem:[#allocation3 + $0xd0] sm:$0xff] %vm353_vm4, %v9491_v38  ;;  %381 = vst.msk [vmem:[#allocation3 + $0xd8] sm:$0xff] %vm353_vm4, %v9491_v38 }
 0x391   : > { %7369 = vmatmul.mubr.msk.bf16.gmra.mrb[0].mxu1 %vm280_vm3, %v8740_v53  ;;  %382 = vst.msk [vmem:[#allocation3 + $0xe0] sm:$0xff] %vm353_vm4, %v9491_v38  ;;  %383 = vst.msk [vmem:[#allocation3 + $0xe8] sm:$0xff] %vm353_vm4, %v9491_v38  ;;  %v7952_v53 = vld [vmem:[%s9476_s5 + $0x30] sm:$0xff]  }
 0x392   : > { %7372 = vmatprep.mubr.msk.bf16.mxu1 %vm280_vm3, %v8742_v54  ;;  %7392 = vmatprep.subr.bf16.mxu0 %v7952_v53  ;;  %v7953_v54 = vld [vmem:[%s9476_s5 + $0x38] sm:$0xff]  }
 0x393   : > { %7393 = vmatpush3.bf16.msra.mxu0 %v7952_v53 }
 0x394   : > { %7394 = vmatprep.subr.bf16.mxu0 %v7953_v54 }
 0x397   : > { %7395 = vmatpush3.bf16.msra.mxu0 %v7953_v54 }
 0x399   : > { %7373 = vmatmul.mubr.msk.bf16.gmra.mrb[4].mxu1 %vm280_vm3, %v8748_v8  ;;  %v9137_v8 = vld [vmem:[%s9476_s5] sm:$0xff]  }
 0x39a   : > { %7376 = vmatprep.mubr.msk.bf16.mxu1 %vm280_vm3, %v8750_v60  ;;  %7404 = vmatprep.subr.bf16.mxu0 %v9137_v8 }
 0x3a1   : > { %7377 = vmatmul.mubr.msk.bf16.gmra.mrb[8].mxu1 %vm280_vm3, %v8756_v2  ;;  %v9143_v2 = vld [vmem:[%s9475_s4] ss:$0 sm:$0xff] }
 0x3a2   : > { %7380 = vmatprep.mubr.msk.bf16.mxu1 %vm280_vm3, %v8758_v15 }
 0x3a9   : > { %7381 = vmatmul.mubr.msk.bf16.gmra.mrb[12].mxu1 %vm280_vm3, %v8764_v9 }
 0x3aa   : > { %7384 = vmatprep.mubr.msk.bf16.mxu1 %vm280_vm3, %v8968_v49 }
 0x3b1   : > { %7385 = vmatmul.mubr.msk.bf16.gmra.mrb[16].mxu1 %vm280_vm3, %v4478_v37 }
 0x44c   : > { %v7358_v60 = vpop.f32.mrb[20].mxu1 }
 0x44d   : > { %v7536_v15 = vadd.f32 %v7358_v60, %v8928_v17  ;;  %v4578_v9 = vpop.f32.mrb[21].mxu1 }
 0x44e   : > { %v7537_v28 = vadd.f32 %v4578_v9, %v8930_v30  ;;  %v7359_v49 = vpop.f32.mrb[22].mxu1 }
 0x44f   : > { %v4746_v63 = vadd.f32 %v7536_v15, %v9143_v2  ;;  %v7538_v5 = vadd.f32 %v7359_v49, %v8932_v25  ;;  %v4581_v14 = vpop.f32.mrb[23].mxu1 }
 0x450   : > { %v4744_v0 = vadd.f32 %v7537_v28, %v9143_v2  ;;  %v7539_v50 = vadd.f32 %v4581_v14, %v8934_v45 }
 0x451   : > { %v4778_v4 = vmax.f32 %v4746_v63, 0.0  ;;  %v4747_v56 = vadd.f32 %v7538_v5, %v9143_v2 }
 0x452   : > { %v4776_v58 = vmax.f32 %v4744_v0, 0.0  ;;  %v4745_v18 = vadd.f32 %v7539_v50, %v9143_v2 }
 0x453   : > { %v4779_v17 = vmax.f32 %v4747_v56, 0.0 }
 0x454   : > { %v4808_v19 = vmax.f32 %v4776_v58, %v4778_v4  ;;  %v4777_v3 = vmax.f32 %v4745_v18, 0.0  ;;  %v7362_v30 = vpop.f32.mrb[24].mxu1 }
 0x455   : > { %v7540_v48 = vadd.f32 %v7362_v30, %v8940_v51  ;;  %v4594_v29 = vpop.f32.mrb[25].mxu1 }
 0x456   : > { %4824 = vst.msk [vmem:[#allocation5] sm:$0xff] %vm353_vm4, %v4808_v19  ;;  %v4809_v25 = vmax.f32 %v4777_v3, %v4779_v17  ;;  %v7541_v44 = vadd.f32 %v4594_v29, %v8942_v52  ;;  %v7363_v57 = vpop.f32.mrb[26].mxu1  ;;  %v4908_v19 = vld [vmem:[#allocation3 + $0x8] sm:$0xff] }
 0x457   : > { %v4750_v45 = vadd.f32 %v7540_v48, %v9143_v2  ;;  %v7542_v16 = vadd.f32 %v7363_v57, %v8944_v55  ;;  %v4597_v7 = vpop.f32.mrb[27].mxu1 }
 0x458   : > { %4825 = vst.msk [vmem:[#allocation5 + $0x8] sm:$0xff] %vm353_vm4, %v4809_v25  ;;  %v4748_v22 = vadd.f32 %v7541_v44, %v9143_v2  ;;  %v7543_v62 = vadd.f32 %v4597_v7, %v8946_v1 }
 0x459   : > { %v4782_v24 = vmax.f32 %v4750_v45, 0.0  ;;  %v4751_v51 = vadd.f32 %v7542_v16, %v9143_v2 }
 0x45a   : > { %v4780_v59 = vmax.f32 %v4748_v22, 0.0  ;;  %v4749_v21 = vadd.f32 %v7543_v62, %v9143_v2 }
 0x45b   : > { %v4783_v36 = vmax.f32 %v4751_v51, 0.0 }
 0x45c   : > { %v4810_v52 = vmax.f32 %v4780_v59, %v4782_v24  ;;  %v4781_v33 = vmax.f32 %v4749_v21, 0.0  ;;  %v7366_v10 = vpop.f32.mrb[28].mxu1 }
 0x45d   : > { %v7544_v11 = vadd.f32 %v7366_v10, %v8952_v46  ;;  %v4610_v55 = vpop.f32.mrb[29].mxu1 }
 0x45e   : > { %4826 = vst.msk [vmem:[#allocation5 + $0x10] sm:$0xff] %vm353_vm4, %v4810_v52  ;;  %v4811_v35 = vmax.f32 %v4781_v33, %v4783_v36  ;;  %v7545_v23 = vadd.f32 %v4610_v55, %v8954_v13  ;;  %v7367_v26 = vpop.f32.mrb[30].mxu1 }
 0x45f   : > { %v4840_v1 = vld [vmem:[#allocation5] ss:$2 sm:$0xff]  ;;  %v4856_v37 = vld [vmem:[#allocation5 + $0x1] ss:$2 sm:$0xff]  ;;  %v4754_v38 = vadd.f32 %v7544_v11, %v9143_v2  ;;  %v7546_v42 = vadd.f32 %v7367_v26, %v8956_v34  ;;  %v4613_v43 = vpop.f32.mrb[31].mxu1 }
 0x460   : > { %v4871_v53 = vmax.f32 %v4840_v1, %v4856_v37  ;;  %4827 = vst.msk [vmem:[#allocation5 + $0x18] sm:$0xff] %vm353_vm4, %v4811_v35  ;;  %v4752_v54 = vadd.f32 %v7545_v23, %v9143_v2  ;;  %v7547_v46 = vadd.f32 %v4613_v43, %v8958_v61 }
 0x461   : > { %v4786_v60 = vmax.f32 %v4754_v38, 0.0  ;;  %v4755_v15 = vadd.f32 %v7546_v42, %v9143_v2 }
 0x462   : > { %4880 = vst.msk [vmem:[#allocation3 + $0x20] sm:$0xff] %vm353_vm4, %v4871_v53  ;;  %v4784_v13 = vmax.f32 %v4752_v54, 0.0  ;;  %v4753_v9 = vadd.f32 %v7547_v46, %v9143_v2 }
 0x463   : > { %v4787_v28 = vmax.f32 %v4755_v15, 0.0 }
 0x464   : > { %v4812_v49 = vmax.f32 %v4784_v13, %v4786_v60  ;;  %v4785_v63 = vmax.f32 %v4753_v9, 0.0  ;;  %v7370_v34 = vpop.f32.mrb[0].mxu1  ;;  %v9492_v9 = vld [vmem:[#allocation7_spill] sm:$0xff] }
 0x465   : > { %v7548_v5 = vadd.f32 %v7370_v34, %v8785_v6  ;;  %v4626_v14 = vpop.f32.mrb[1].mxu1 }
 0x466   : > { %4828 = vst.msk [vmem:[#allocation5 + $0x20] sm:$0xff] %vm353_vm4, %v4812_v49  ;;  %v4813_v0 = vmax.f32 %v4785_v63, %v4787_v28  ;;  %v7549_v61 = vadd.f32 %v4626_v14, %v8787_v12  ;;  %v7371_v50 = vpop.f32.mrb[2].mxu1 }
 0x467   : > { %v4842_v4 = vld [vmem:[#allocation5 + $0x10] ss:$2 sm:$0xff]  ;;  %v4858_v56 = vld [vmem:[#allocation5 + $0x11] ss:$2 sm:$0xff]  ;;  %v4758_v58 = vadd.f32 %v7548_v5, %v9143_v2  ;;  %v7550_v18 = vadd.f32 %v7371_v50, %v8789_v31  ;;  %v4629_v17 = vpop.f32.mrb[3].mxu1 }
 0x468   : > { %v4872_v3 = vmax.f32 %v4842_v4, %v4858_v56  ;;  %4829 = vst.msk [vmem:[#allocation5 + $0x28] sm:$0xff] %vm353_vm4, %v4813_v0  ;;  %v4756_v6 = vadd.f32 %v7549_v61, %v9143_v2  ;;  %v7551_v30 = vadd.f32 %v4629_v17, %v8791_v32  ;;  %v7955_v56 = vld [vmem:[%s9476_s5 + $0x8] sm:$0xff]  }
 0x469   : > { %v4790_v48 = vmax.f32 %v4758_v58, 0.0  ;;  %v4759_v29 = vadd.f32 %v7550_v18, %v9143_v2  ;;  %v9183_v12 = vld [vmem:[#allocation3 + $0x20] sm:$0xff] }
 0x46a   : > { %4881 = vst.msk [vmem:[#allocation3 + $0x38] sm:$0xff] %vm353_vm4, %v4872_v3  ;;  %v4788_v25 = vmax.f32 %v4756_v6, 0.0  ;;  %v4757_v44 = vadd.f32 %v7551_v30, %v9143_v2  ;;  %v4916_v31 = vpack.c.bf16 %v9183_v12, %v4908_v19  ;;  %v9494_v3 = vld [vmem:[#allocation9_spill] sm:$0xff] }
 0x46b   : > { %v4791_v57 = vmax.f32 %v4759_v29, 0.0  ;;  %v9495_v29 = vld [vmem:[#allocation10_spill] sm:$0xff] }
 0x46c   : > { %v4814_v45 = vmax.f32 %v4788_v25, %v4790_v48  ;;  %v4789_v16 = vmax.f32 %v4757_v44, 0.0  ;;  %v7374_v7 = vpop.f32.mrb[4].mxu1  ;;  %7396 = vmatprep.mubr.msk.bf16.mxu0 %vm353_vm4, %v4916_v31  ;;  %v7956_v31 = vld [vmem:[%s9476_s5 + $0x10] sm:$0xff]  }
 0x46d   : > { %v7552_v32 = vadd.f32 %v7374_v7, %v8813_v39  ;;  %v4642_v22 = vpop.f32.mrb[5].mxu1  ;;  %v9496_v7 = vld [vmem:[#allocation11_spill] sm:$0xff] }
 0x46e   : > { %4830 = vst.msk [vmem:[#allocation5 + $0x30] sm:$0xff] %vm353_vm4, %v4814_v45  ;;  %v4815_v62 = vmax.f32 %v4789_v16, %v4791_v57  ;;  %v7553_v24 = vadd.f32 %v4642_v22, %v8815_v40  ;;  %v7375_v51 = vpop.f32.mrb[6].mxu1 }
 0x46f   : > { %v4844_v59 = vld [vmem:[#allocation5 + $0x20] ss:$2 sm:$0xff]  ;;  %v4860_v21 = vld [vmem:[#allocation5 + $0x21] ss:$2 sm:$0xff]  ;;  %v4762_v36 = vadd.f32 %v7552_v32, %v9143_v2  ;;  %v7554_v52 = vadd.f32 %v7375_v51, %v8817_v47  ;;  %v4645_v33 = vpop.f32.mrb[7].mxu1 }
 0x470   : > { %v4873_v10 = vmax.f32 %v4844_v59, %v4860_v21  ;;  %4831 = vst.msk [vmem:[#allocation5 + $0x38] sm:$0xff] %vm353_vm4, %v4815_v62  ;;  %v4760_v11 = vadd.f32 %v7553_v24, %v9143_v2  ;;  %v7555_v39 = vadd.f32 %v4645_v33, %v8819_v41  ;;  %v9497_v24 = vld [vmem:[#allocation12_spill] sm:$0xff] }
 0x471   : > { %v4794_v55 = vmax.f32 %v4762_v36, 0.0  ;;  %v4763_v35 = vadd.f32 %v7554_v52, %v9143_v2  ;;  %v9198_v23 = vld [vmem:[#allocation3 + $0x38] sm:$0xff] }
 0x472   : > { %4882 = vst.msk [vmem:[#allocation3 + $0x50] sm:$0xff] %vm353_vm4, %v4873_v10  ;;  %v4792_v40 = vmax.f32 %v4760_v11, 0.0  ;;  %v4761_v26 = vadd.f32 %v7555_v39, %v9143_v2  ;;  %v5399_v47 = vpack.c.bf16 %v9198_v23, %v9183_v12  ;;  %v7957_v10 = vld [vmem:[%s9476_s5 + $0x18] sm:$0xff]   ;;  %v7972_v12 = vld [vmem:[%s9476_s5 + $0xb0] sm:$0xff]  }
 0x473   : > { %v4795_v1 = vmax.f32 %v4763_v35, 0.0 }
 0x474   : > { %v4816_v37 = vmax.f32 %v4792_v40, %v4794_v55  ;;  %v4793_v38 = vmax.f32 %v4761_v26, 0.0  ;;  %v7378_v42 = vpop.f32.mrb[8].mxu1  ;;  %v9498_v26 = vld [vmem:[#allocation13_spill] sm:$0xff] }
 0x475   : > { %v7556_v43 = vadd.f32 %v7378_v42, %v8852_v20  ;;  %v4658_v41 = vpop.f32.mrb[9].mxu1  ;;  %v9493_v20 = vld [vmem:[#allocation8_spill] sm:$0xff]  ;;  %v9499_v42 = vld [vmem:[#allocation14_spill] sm:$0xff] }
 0x476   : > { %4832 = vst.msk [vmem:[#allocation5 + $0x40] sm:$0xff] %vm353_vm4, %v4816_v37  ;;  %v4817_v53 = vmax.f32 %v4793_v38, %v4795_v1  ;;  %v7557_v54 = vadd.f32 %v4658_v41, %v8854_v27  ;;  %v7379_v46 = vpop.f32.mrb[10].mxu1 }
 0x477   : > { %v4846_v60 = vld [vmem:[#allocation5 + $0x30] ss:$2 sm:$0xff]  ;;  %v4862_v15 = vld [vmem:[#allocation5 + $0x31] ss:$2 sm:$0xff]  ;;  %v4766_v13 = vadd.f32 %v7556_v43, %v9143_v2  ;;  %v7558_v28 = vadd.f32 %v7379_v46, %v9492_v9  ;;  %v4661_v49 = vpop.f32.mrb[11].mxu1 }
 0x478   : > { %v4874_v63 = vmax.f32 %v4846_v60, %v4862_v15  ;;  %4833 = vst.msk [vmem:[#allocation5 + $0x48] sm:$0xff] %vm353_vm4, %v4817_v53  ;;  %v4764_v34 = vadd.f32 %v7557_v54, %v9143_v2  ;;  %v7559_v5 = vadd.f32 %v4661_v49, %v9493_v20  ;;  %v7958_v53 = vld [vmem:[%s9476_s5 + $0x40] sm:$0xff]   ;;  %v9500_v15 = vld [vmem:[#allocation15_spill] sm:$0xff] }
 0x479   : > { %v4798_v14 = vmax.f32 %v4766_v13, 0.0  ;;  %v4767_v0 = vadd.f32 %v7558_v28, %v9143_v2  ;;  %v9213_v61 = vld [vmem:[#allocation3 + $0x50] sm:$0xff] }
 0x47a   : > { %4883 = vst.msk [vmem:[#allocation3 + $0x68] sm:$0xff] %vm353_vm4, %v4874_v63  ;;  %v4796_v27 = vmax.f32 %v4764_v34, 0.0  ;;  %v4765_v50 = vadd.f32 %v7559_v5, %v9143_v2  ;;  %v9219_v4 = vpack.c.bf16 %v9213_v61, %v9198_v23  ;;  %v9501_v63 = vld [vmem:[#allocation16_spill] sm:$0xff] }
 0x47b   : > { %v4799_v58 = vmax.f32 %v4767_v0, 0.0 }
 0x47c   : > { %v4818_v18 = vmax.f32 %v4796_v27, %v4798_v14  ;;  %v4797_v17 = vmax.f32 %v4765_v50, 0.0  ;;  %v7382_v19 = vpop.f32.mrb[12].mxu1  ;;  %7397 = vmatmul.mubr.msk.bf16.vlgmr.msra.gmra.mrb[160].mxu0 %vm353_vm4, %v9219_v4 }
 0x47d   : > { %v7560_v6 = vadd.f32 %v7382_v19, %v9494_v3  ;;  %v4674_v30 = vpop.f32.mrb[13].mxu1  ;;  %7405 = vmatpush3.bf16.msra.mxu0 %v9137_v8 }
 0x47e   : > { %4834 = vst.msk [vmem:[#allocation5 + $0x50] sm:$0xff] %vm353_vm4, %v4818_v18  ;;  %v4819_v48 = vmax.f32 %v4797_v17, %v4799_v58  ;;  %v7561_v25 = vadd.f32 %v4674_v30, %v9495_v29  ;;  %v7383_v44 = vpop.f32.mrb[14].mxu1  ;;  %7406 = vmatprep.subr.bf16.mxu0 %v7955_v56  ;;  %v4888_v29 = vld [vmem:[#allocation3 + $0x7] sm:$0xff] }
 0x47f   : > { %v4848_v57 = vld [vmem:[#allocation5 + $0x40] ss:$2 sm:$0xff]  ;;  %v4864_v45 = vld [vmem:[#allocation5 + $0x41] ss:$2 sm:$0xff]  ;;  %v4770_v16 = vadd.f32 %v7560_v6, %v9143_v2  ;;  %v7562_v32 = vadd.f32 %v7383_v44, %v9496_v7  ;;  %v4677_v22 = vpop.f32.mrb[15].mxu1 }
 0x480   : > { %v4875_v62 = vmax.f32 %v4848_v57, %v4864_v45  ;;  %4835 = vst.msk [vmem:[#allocation5 + $0x58] sm:$0xff] %vm353_vm4, %v4819_v48  ;;  %v4768_v8 = vadd.f32 %v7561_v25, %v9143_v2  ;;  %v7563_v51 = vadd.f32 %v4677_v22, %v9497_v24  ;;  %v4889_v25 = vld [vmem:[#allocation3 + $0x1f] sm:$0xff] }
 0x481   : > { %v4802_v59 = vmax.f32 %v4770_v16, 0.0  ;;  %v4771_v21 = vadd.f32 %v7562_v32, %v9143_v2  ;;  %v9239_v36 = vld [vmem:[#allocation3 + $0x68] sm:$0xff]  ;;  %7407 = vmatpush3.bf16.msra.mxu0 %v7955_v56  ;;  %v4896_v45 = vpack.c.bf16 %v4889_v25, %v4888_v29  ;;  %v4890_v32 = vld [vmem:[#allocation3 + $0x37] sm:$0xff]  ;;  %v5659_v29 = vld [vmem:[#allocation3 + $0xdf] sm:$0xff] }
 0x482   : > { %4884 = vst.msk [vmem:[#allocation3 + $0x80] sm:$0xff] %vm353_vm4, %v4875_v62  ;;  %v4800_v52 = vmax.f32 %v4768_v8, 0.0  ;;  %v4769_v33 = vadd.f32 %v7563_v51, %v9143_v2  ;;  %7408 = vmatprep.subr.bf16.mxu0 %v7956_v31  ;;  %v5400_v11 = vpack.c.bf16 %v9239_v36, %v9213_v61  ;;  %v4891_v16 = vld [vmem:[#allocation3 + $0x4f] sm:$0xff]  ;;  %v4892_v62 = vld [vmem:[#allocation3 + $0x67] sm:$0xff]  ;;  %v7973_v61 = vld [vmem:[%s9476_s5 + $0xb8] sm:$0xff]  }
 0x483   : > { %v4803_v39 = vmax.f32 %v4771_v21, 0.0  ;;  %v9285_v22 = vpack.c.bf16 %v4891_v16, %v4890_v32  ;;  %v7959_v8 = vld [vmem:[%s9476_s5 + $0x48] sm:$0xff]   ;;  %v7960_v51 = vld [vmem:[%s9476_s5 + $0x50] sm:$0xff]  }
 0x484   : > { %v4820_v55 = vmax.f32 %v4800_v52, %v4802_v59  ;;  %v4801_v35 = vmax.f32 %v4769_v33, 0.0  ;;  %v7386_v40 = vpop.f32.mrb[16].mxu1  ;;  %v5131_v21 = vld [vmem:[#allocation3 + $0x9] sm:$0xff]  ;;  %v9299_v52 = vld [vmem:[#allocation3 + $0x21] sm:$0xff] }
 0x485   : > { %v7564_v1 = vadd.f32 %v7386_v40, %v9498_v26  ;;  %v4690_v37 = vpop.f32.mrb[17].mxu1  ;;  %7409 = vmatpush3.bf16.msra.mxu0 %v7956_v31  ;;  %v9313_v40 = vld [vmem:[#allocation3 + $0x51] sm:$0xff] }
 0x486   : > { %4836 = vst.msk [vmem:[#allocation5 + $0x60] sm:$0xff] %vm353_vm4, %v4820_v55  ;;  %v4821_v38 = vmax.f32 %v4801_v35, %v4803_v39  ;;  %v7565_v43 = vadd.f32 %v4690_v37, %v9499_v42  ;;  %v7387_v41 = vpop.f32.mrb[18].mxu1  ;;  %7410 = vmatprep.subr.bf16.mxu0 %v7957_v10  ;;  %v7961_v39 = vld [vmem:[%s9476_s5 + $0x58] sm:$0xff]   ;;  %v5139_v55 = vpack.c.bf16 %v9299_v52, %v5131_v21  ;;  %v7962_v35 = vld [vmem:[%s9476_s5 + $0x60] sm:$0xff]   ;;  %v7963_v42 = vld [vmem:[%s9476_s5 + $0x68] sm:$0xff]  }
 0x487   : > { %v4850_v54 = vld [vmem:[#allocation5 + $0x50] ss:$2 sm:$0xff]  ;;  %v4866_v46 = vld [vmem:[#allocation5 + $0x51] ss:$2 sm:$0xff]  ;;  %v4774_v60 = vadd.f32 %v7564_v1, %v9143_v2  ;;  %v7566_v13 = vadd.f32 %v7387_v41, %v9500_v15  ;;  %v4693_v9 = vpop.f32.mrb[19].mxu1  ;;  %v7964_v41 = vld [vmem:[%s9476_s5 + $0x70] sm:$0xff]   ;;  %v5269_v15 = vpack.c.bf16 %v4890_v32, %v4889_v25 }
 0x488   : > { %v4876_v28 = vmax.f32 %v4850_v54, %v4866_v46  ;;  %4837 = vst.msk [vmem:[#allocation5 + $0x68] sm:$0xff] %vm353_vm4, %v4821_v38  ;;  %v4772_v49 = vadd.f32 %v7565_v43, %v9143_v2  ;;  %v7567_v34 = vadd.f32 %v4693_v9, %v9501_v63  ;;  %v5133_v1 = vld [vmem:[#allocation3 + $0x39] sm:$0xff]  ;;  %v9320_v38 = vld [vmem:[#allocation3 + $0x69] sm:$0xff]  ;;  %v5270_v9 = vpack.c.bf16 %v4892_v62, %v4891_v16 }
 0x489   : > { %v4806_v20 = vmax.f32 %v4774_v60, 0.0  ;;  %v4775_v5 = vadd.f32 %v7566_v13, %v9143_v2  ;;  %v9260_v14 = vld [vmem:[#allocation3 + $0x80] sm:$0xff]  ;;  %7411 = vmatpush3.bf16.msra.mxu0 %v7957_v10  ;;  %v9318_v37 = vpack.c.bf16 %v9313_v40, %v5133_v1  ;;  %v7965_v60 = vld [vmem:[%s9476_s5 + $0x78] sm:$0xff]   ;;  %v7968_v63 = vld [vmem:[%s9476_s5 + $0x90] sm:$0xff]  }
 0x48a   : > { %4885 = vst.msk [vmem:[#allocation3 + $0x98] sm:$0xff] %vm353_vm4, %v4876_v28  ;;  %v4804_v0 = vmax.f32 %v4772_v49, 0.0  ;;  %v4773_v27 = vadd.f32 %v7567_v34, %v9143_v2  ;;  %v9266_v50 = vpack.c.bf16 %v9260_v14, %v9239_v36  ;;  %7420 = vmatprep.subr.bf16.mxu0 %v7958_v53  ;;  %v4893_v7 = vld [vmem:[#allocation3 + $0x7f] sm:$0xff]  ;;  %v7967_v28 = vld [vmem:[%s9476_s5 + $0x88] sm:$0xff]   ;;  %v5529_v36 = vpack.c.bf16 %v5133_v1, %v9299_v52 }
 0x48b   : > { %v4807_v56 = vmax.f32 %v4775_v5, 0.0  ;;  %v9290_v24 = vpack.c.bf16 %v4893_v7, %v4892_v62  ;;  %v9315_v26 = vld [vmem:[#allocation3 + $0x81] sm:$0xff]  ;;  %v7969_v5 = vld [vmem:[%s9476_s5 + $0x98] sm:$0xff]  }
 0x48c   : > { %v4822_v58 = vmax.f32 %v4804_v0, %v4806_v20  ;;  %v4805_v18 = vmax.f32 %v4773_v27, 0.0  ;;  %7400 = vmatprep.mubr.msk.bf16.mxu0 %vm353_vm4, %v9266_v50  ;;  %v9327_v43 = vpack.c.bf16 %v9315_v26, %v9320_v38  ;;  %v7966_v13 = vld [vmem:[%s9476_s5 + $0x80] sm:$0xff]   ;;  %v7971_v27 = vld [vmem:[%s9476_s5 + $0xa8] sm:$0xff]   ;;  %v7985_v32 = vld [vmem:[%s9476_s5 + $0x118] sm:$0xff]  }
 0x48d   : > { %v7970_v0 = vld [vmem:[%s9476_s5 + $0xa0] sm:$0xff]  }
 0x48e   : > { %4838 = vst.msk [vmem:[#allocation5 + $0x70] sm:$0xff] %vm353_vm4, %v4822_v58  ;;  %v4823_v17 = vmax.f32 %v4805_v18, %v4807_v56  ;;  %v7975_v58 = vld [vmem:[%s9476_s5 + $0xc8] sm:$0xff]   ;;  %v5789_v16 = vld [vmem:[#allocation3 + $0xe0] sm:$0xff] }
 0x48f   : > { %v4852_v19 = vld [vmem:[#allocation5 + $0x60] ss:$2 sm:$0xff]  ;;  %v4868_v3 = vld [vmem:[#allocation5 + $0x61] ss:$2 sm:$0xff] }
 0x490   : > { %v4877_v6 = vmax.f32 %v4852_v19, %v4868_v3  ;;  %4839 = vst.msk [vmem:[#allocation5 + $0x78] sm:$0xff] %vm353_vm4, %v4823_v17  ;;  %v7976_v17 = vld [vmem:[%s9476_s5 + $0xd0] sm:$0xff]  }
 0x491   : > { %v9273_v44 = vld [vmem:[#allocation3 + $0x98] sm:$0xff] }
 0x492   : > { %4886 = vst.msk [vmem:[#allocation3 + $0xb0] sm:$0xff] %vm353_vm4, %v4877_v6  ;;  %v4894_v33 = vld [vmem:[#allocation3 + $0x97] sm:$0xff]  ;;  %v5401_v56 = vpack.c.bf16 %v9273_v44, %v9260_v14  ;;  %v5530_v14 = vpack.c.bf16 %v9320_v38, %v9313_v40 }
 0x493   : > { %v5137_v54 = vld [vmem:[#allocation3 + $0x99] sm:$0xff]  ;;  %v5271_v49 = vpack.c.bf16 %v4894_v33, %v4893_v7 }
 0x494   : > { %v5531_v18 = vpack.c.bf16 %v5137_v54, %v9315_v26  ;;  %v7977_v6 = vld [vmem:[%s9476_s5 + $0xd8] sm:$0xff]  }
 0x497   : > { %v4854_v2 = vld [vmem:[#allocation5 + $0x70] ss:$2 sm:$0xff]  ;;  %v4870_v30 = vld [vmem:[#allocation5 + $0x71] ss:$2 sm:$0xff] }
 0x498   : > { %v4878_v48 = vmax.f32 %v4854_v2, %v4870_v30  ;;  %v7978_v2 = vld [vmem:[%s9476_s5 + $0xe0] sm:$0xff]   ;;  %v7979_v30 = vld [vmem:[%s9476_s5 + $0xe8] sm:$0xff]  }
 0x499   : > { %v9275_v31 = vld [vmem:[#allocation3 + $0xb0] sm:$0xff] }
 0x49a   : > { %4887 = vst.msk [vmem:[#allocation3 + $0xc8] sm:$0xff] %vm353_vm4, %v4878_v48  ;;  %v9280_v57 = vpack.c.bf16 %v9275_v31, %v9273_v44  ;;  %v4895_v59 = vld [vmem:[#allocation3 + $0xaf] sm:$0xff]  ;;  %v7981_v44 = vld [vmem:[%s9476_s5 + $0xf8] sm:$0xff]  }
 0x49b   : > { %v9301_v10 = vpack.c.bf16 %v4895_v59, %v4894_v33  ;;  %v7980_v48 = vld [vmem:[%s9476_s5 + $0xf0] sm:$0xff]  }
 0x49c   : > { %7401 = vmatmul.mubr.msk.bf16.gmra.mrb[164].mxu0 %vm353_vm4, %v9280_v57 }
 0x49d   : > { %7412 = vmatprep.mubr.msk.bf16.mxu0 %vm353_vm4, %v4896_v45  ;;  %v7983_v45 = vld [vmem:[%s9476_s5 + $0x108] sm:$0xff]  }
 0x4a1   : > { %v9358_v34 = vld [vmem:[#allocation3 + $0xc7] sm:$0xff] }
 0x4a2   : > { %v5272_v20 = vpack.c.bf16 %v9358_v34, %v4895_v59  ;;  %v9385_v23 = vld [vmem:[#allocation3 + $0xc8] sm:$0xff]  ;;  %v5663_v25 = vpack.c.bf16 %v5659_v29, %v9358_v34 }
 0x4a3   : > { %v5528_v19 = vld [vmem:[#allocation3 + $0xc9] sm:$0xff]  ;;  %v5793_v7 = vpack.c.bf16 %v5789_v16, %v9385_v23 }
 0x4a4   : > { %7413 = vmatmul.mubr.msk.bf16.vlgmr.msra.gmra.mrb[160].mxu0 %vm353_vm4, %v9285_v22 }
 0x4a5   : > { %7421 = vmatpush3.bf16.msra.mxu0 %v7958_v53  ;;  %7416 = vmatprep.mubr.msk.bf16.mxu0 %vm353_vm4, %v9290_v24  ;;  %v9336_v53 = vld [vmem:[#allocation3 + $0xb1] sm:$0xff] }
 0x4a6   : > { %7422 = vmatprep.subr.bf16.mxu0 %v7959_v8  ;;  %v9339_v46 = vpack.c.bf16 %v9336_v53, %v5137_v54  ;;  %v5532_v3 = vpack.c.bf16 %v5528_v19, %v9336_v53 }
 0x4a9   : > { %7423 = vmatpush3.bf16.msra.mxu0 %v7959_v8 }
 0x4aa   : > { %7424 = vmatprep.subr.bf16.mxu0 %v7960_v51 }
 0x4ac   : > { %7417 = vmatmul.mubr.msk.bf16.gmra.mrb[164].mxu0 %vm353_vm4, %v9301_v10 }
 0x4ad   : > { %7425 = vmatpush3.bf16.msra.mxu0 %v7960_v51  ;;  %7428 = vmatprep.mubr.msk.bf16.mxu0 %vm353_vm4, %v5139_v55 }
 0x4ae   : > { %7426 = vmatprep.subr.bf16.mxu0 %v7961_v39 }
 0x4b1   : > { %7427 = vmatpush3.bf16.msra.mxu0 %v7961_v39 }
 0x4b2   : > { %7436 = vmatprep.subr.bf16.mxu0 %v7962_v35 }
 0x4b4   : > { %7429 = vmatmul.mubr.msk.bf16.vlgmr.msra.gmra.mrb[160].mxu0 %vm353_vm4, %v9318_v37 }
 0x4b5   : > { %7437 = vmatpush3.bf16.msra.mxu0 %v7962_v35  ;;  %7432 = vmatprep.mubr.msk.bf16.mxu0 %vm353_vm4, %v9327_v43 }
 0x4b6   : > { %7438 = vmatprep.subr.bf16.mxu0 %v7963_v42 }
 0x4b9   : > { %7439 = vmatpush3.bf16.msra.mxu0 %v7963_v42 }
 0x4ba   : > { %7440 = vmatprep.subr.bf16.mxu0 %v7964_v41 }
 0x4bc   : > { %7433 = vmatmul.mubr.msk.bf16.gmra.mrb[164].mxu0 %vm353_vm4, %v9339_v46 }
 0x4bd   : > { %7441 = vmatpush3.bf16.msra.mxu0 %v7964_v41  ;;  %7444 = vmatprep.mubr.msk.bf16.mxu0 %vm353_vm4, %v5269_v15 }
 0x4be   : > { %7442 = vmatprep.subr.bf16.mxu0 %v7965_v60 }
 0x4c1   : > { %7443 = vmatpush3.bf16.msra.mxu0 %v7965_v60 }
 0x4c2   : > { %7452 = vmatprep.subr.bf16.mxu0 %v7966_v13 }
 0x4c4   : > { %7445 = vmatmul.mubr.msk.bf16.vlgmr.msra.gmra.mrb[160].mxu0 %vm353_vm4, %v5270_v9 }
 0x4c5   : > { %7453 = vmatpush3.bf16.msra.mxu0 %v7966_v13  ;;  %7448 = vmatprep.mubr.msk.bf16.mxu0 %vm353_vm4, %v5271_v49 }
 0x4c6   : > { %7454 = vmatprep.subr.bf16.mxu0 %v7967_v28 }
 0x4c9   : > { %7455 = vmatpush3.bf16.msra.mxu0 %v7967_v28 }
 0x4ca   : > { %7456 = vmatprep.subr.bf16.mxu0 %v7968_v63 }
 0x4cc   : > { %7449 = vmatmul.mubr.msk.bf16.gmra.mrb[164].mxu0 %vm353_vm4, %v5272_v20 }
 0x4cd   : > { %7457 = vmatpush3.bf16.msra.mxu0 %v7968_v63  ;;  %7460 = vmatprep.mubr.msk.bf16.mxu0 %vm353_vm4, %v5399_v47  ;;  %v5402_v47 = vpack.c.bf16 %v9385_v23, %v9275_v31  ;;  %v7982_v31 = vld [vmem:[%s9476_s5 + $0x100] sm:$0xff]  }
 0x4ce   : > { %7458 = vmatprep.subr.bf16.mxu0 %v7969_v5 }
 0x4d1   : > { %7459 = vmatpush3.bf16.msra.mxu0 %v7969_v5 }
 0x4d2   : > { %7468 = vmatprep.subr.bf16.mxu0 %v7970_v0 }
 0x4d4   : > { %7461 = vmatmul.mubr.msk.bf16.vlgmr.msra.gmra.mrb[160].mxu0 %vm353_vm4, %v5400_v11  ;;  %v7974_v11 = vld [vmem:[%s9476_s5 + $0xc0] sm:$0xff]  }
 0x4d5   : > { %7469 = vmatpush3.bf16.msra.mxu0 %v7970_v0  ;;  %7464 = vmatprep.mubr.msk.bf16.mxu0 %vm353_vm4, %v5401_v56 }
 0x4d6   : > { %7470 = vmatprep.subr.bf16.mxu0 %v7971_v27 }
 0x4d9   : > { %7471 = vmatpush3.bf16.msra.mxu0 %v7971_v27 }
 0x4da   : > { %7472 = vmatprep.subr.bf16.mxu0 %v7972_v12 }
 0x4dc   : > { %7465 = vmatmul.mubr.msk.bf16.gmra.mrb[164].mxu0 %vm353_vm4, %v5402_v47 }
 0x4dd   : > { %7473 = vmatpush3.bf16.msra.mxu0 %v7972_v12  ;;  %7476 = vmatprep.mubr.msk.bf16.mxu0 %vm353_vm4, %v5529_v36 }
 0x4de   : > { %7474 = vmatprep.subr.bf16.mxu0 %v7973_v61 }
 0x4e1   : > { %7475 = vmatpush3.bf16.msra.mxu0 %v7973_v61 }
 0x4e2   : > { %7484 = vmatprep.subr.bf16.mxu0 %v7974_v11 }
 0x4e4   : > { %7477 = vmatmul.mubr.msk.bf16.vlgmr.msra.gmra.mrb[160].mxu0 %vm353_vm4, %v5530_v14 }
 0x4e5   : > { %7485 = vmatpush3.bf16.msra.mxu0 %v7974_v11  ;;  %7480 = vmatprep.mubr.msk.bf16.mxu0 %vm353_vm4, %v5531_v18 }
 0x4e6   : > { %7486 = vmatprep.subr.bf16.mxu0 %v7975_v58 }
 0x4e9   : > { %7487 = vmatpush3.bf16.msra.mxu0 %v7975_v58 }
 0x4ea   : > { %7488 = vmatprep.subr.bf16.mxu0 %v7976_v17 }
 0x4ec   : > { %7481 = vmatmul.mubr.msk.bf16.gmra.mrb[164].mxu0 %vm353_vm4, %v5532_v3 }
 0x4ed   : > { %7489 = vmatpush3.bf16.msra.mxu0 %v7976_v17  ;;  %7492 = vmatprep.mubr.msk.bf16.mxu0 %vm353_vm4, %v9285_v22  ;;  %v6618_v22 = vld [vmem:[%s9477_s6] ss:$0 sm:$0xff] }
 0x4ee   : > { %7490 = vmatprep.subr.bf16.mxu0 %v7977_v6 }
 0x4f1   : > { %7491 = vmatpush3.bf16.msra.mxu0 %v7977_v6 }
 0x4f2   : > { %7500 = vmatprep.subr.bf16.mxu0 %v7978_v2 }
 0x4f4   : > { %7493 = vmatmul.mubr.msk.bf16.vlgmr.msra.gmra.mrb[160].mxu0 %vm353_vm4, %v9290_v24 }
 0x4f5   : > { %7501 = vmatpush3.bf16.msra.mxu0 %v7978_v2  ;;  %7496 = vmatprep.mubr.msk.bf16.mxu0 %vm353_vm4, %v9301_v10 }
 0x4f6   : > { %7502 = vmatprep.subr.bf16.mxu0 %v7979_v30 }
 0x4f9   : > { %7503 = vmatpush3.bf16.msra.mxu0 %v7979_v30 }
 0x4fa   : > { %7504 = vmatprep.subr.bf16.mxu0 %v7980_v48 }
 0x4fc   : > { %7497 = vmatmul.mubr.msk.bf16.gmra.mrb[164].mxu0 %vm353_vm4, %v5663_v25 }
 0x4fd   : > { %7505 = vmatpush3.bf16.msra.mxu0 %v7980_v48  ;;  %7508 = vmatprep.mubr.msk.bf16.mxu0 %vm353_vm4, %v9219_v4  ;;  %v7984_v4 = vld [vmem:[%s9476_s5 + $0x110] sm:$0xff]  }
 0x4fe   : > { %7506 = vmatprep.subr.bf16.mxu0 %v7981_v44 }
 0x501   : > { %7507 = vmatpush3.bf16.msra.mxu0 %v7981_v44 }
 0x502   : > { %7516 = vmatprep.subr.bf16.mxu0 %v7982_v31 }
 0x504   : > { %7509 = vmatmul.mubr.msk.bf16.vlgmr.msra.gmra.mrb[160].mxu0 %vm353_vm4, %v9266_v50  ;;  %v5919_v50 = vld [vmem:[#allocation3 + $0xe1] sm:$0xff] }
 0x505   : > { %7517 = vmatpush3.bf16.msra.mxu0 %v7982_v31  ;;  %7512 = vmatprep.mubr.msk.bf16.mxu0 %vm353_vm4, %v9280_v57  ;;  %v5923_v57 = vpack.c.bf16 %v5919_v50, %v5528_v19 }
 0x506   : > { %7518 = vmatprep.subr.bf16.mxu0 %v7983_v45 }
 0x509   : > { %7519 = vmatpush3.bf16.msra.mxu0 %v7983_v45 }
 0x50a   : > { %7520 = vmatprep.subr.bf16.mxu0 %v7984_v4 }
 0x50c   : > { %7513 = vmatmul.mubr.msk.bf16.gmra.mrb[164].mxu0 %vm353_vm4, %v5793_v7 }
 0x50d   : > { %7521 = vmatpush3.bf16.msra.mxu0 %v7984_v4  ;;  %7524 = vmatprep.mubr.msk.bf16.mxu0 %vm353_vm4, %v9318_v37 }
 0x50e   : > { %7522 = vmatprep.subr.bf16.mxu0 %v7985_v32 }
 0x511   : > { %7523 = vmatpush3.bf16.msra.mxu0 %v7985_v32 }
 0x514   : > { %7525 = vmatmul.mubr.msk.bf16.vlgmr.msra.gmra.mrb[160].mxu0 %vm353_vm4, %v9327_v43 }
 0x515   : > { %7528 = vmatprep.mubr.msk.bf16.mxu0 %vm353_vm4, %v9339_v46 }
 0x51c   : > { %7529 = vmatmul.mubr.msk.bf16.gmra.mrb[164].mxu0 %vm353_vm4, %v5923_v57 }
 0x5e7   : > { %v7526_v62 = vpop.f32.mrb[160].mxu0 }
 0x5e8   : > { %v6051_v8 = vadd.f32 %v7526_v62, %v6618_v22  ;;  %v6003_v24 = vpop.f32.mrb[161].mxu0 }
 0x5e9   : > { %v6049_v51 = vadd.f32 %v6618_v22, %v6003_v24  ;;  %v7527_v59 = vpop.f32.mrb[162].mxu0 }
 0x5ea   : > { %v6052_v21 = vadd.f32 %v7527_v59, %v6618_v22  ;;  %v6006_v52 = vpop.f32.mrb[163].mxu0  ;;  %v6059_v10 = vmax.f32 %v6051_v8, 0.0 }
 0x5eb   : > { %v6050_v33 = vadd.f32 %v6618_v22, %v6006_v52  ;;  %v6057_v55 = vmax.f32 %v6049_v51, 0.0 }
 0x5ec   : > { %v6060_v39 = vmax.f32 %v6052_v21, 0.0 }
 0x5ed   : > { %v6058_v35 = vmax.f32 %v6050_v33, 0.0 }
 0x5ee   : > { %v6066_v40 = vmax.f32 %v6059_v10, %v6060_v39 }
 0x5ef   : > { %v6065_v26 = vmax.f32 %v6057_v55, %v6058_v35  ;;  %v7530_v1 = vpop.f32.mrb[164].mxu0 }
 0x5f0   : > { %6070 = vst [vmem:[#allocation6 + $0x8] sm:$0xff] %v6066_v40  ;;  %v6055_v37 = vadd.f32 %v7530_v1, %v6618_v22  ;;  %v6019_v38 = vpop.f32.mrb[165].mxu0 }
 0x5f1   : > { %6069 = vst [vmem:[#allocation6] sm:$0xff] %v6065_v26  ;;  %v6053_v42 = vadd.f32 %v6618_v22, %v6019_v38  ;;  %v7531_v43 = vpop.f32.mrb[166].mxu0 }
 0x5f2   : > { %v6056_v41 = vadd.f32 %v7531_v43, %v6618_v22  ;;  %v6022_v53 = vpop.f32.mrb[167].mxu0  ;;  %v6063_v46 = vmax.f32 %v6055_v37, 0.0 }
 0x5f3   : > { %v6054_v54 = vadd.f32 %v6618_v22, %v6022_v53  ;;  %v6061_v15 = vmax.f32 %v6053_v42, 0.0 }
 0x5f4   : > { %v6064_v60 = vmax.f32 %v6056_v41, 0.0 }
 0x5f5   : > { %v6062_v13 = vmax.f32 %v6054_v54, 0.0 }
 0x5f6   : > { %v6068_v9 = vmax.f32 %v6063_v46, %v6064_v60 }
 0x5f7   : > { %v6067_v28 = vmax.f32 %v6061_v15, %v6062_v13 }
 0x5f8   : > { %6072 = vst [vmem:[#allocation6 + $0x18] sm:$0xff] %v6068_v9  ;;  %v6073_v49 = vld [vmem:[#allocation6] ss:$2 sm:$0xff]  ;;  %v6077_v63 = vld [vmem:[#allocation6 + $0x1] ss:$2 sm:$0xff] }
 0x5f9   : > { %6071 = vst [vmem:[#allocation6 + $0x10] sm:$0xff] %v6067_v28  ;;  %v6080_v5 = vmax.f32 %v6073_v49, %v6077_v63 }
 0x600   : > { %v6075_v34 = vld [vmem:[#allocation6 + $0x10] ss:$2 sm:$0xff]  ;;  %v6079_v20 = vld [vmem:[#allocation6 + $0x11] ss:$2 sm:$0xff] }
 0x601   : > { %v6081_v0 = vmax.f32 %v6075_v34, %v6079_v20 }
 0x603   : > { %v6630_v27 = vpack.c.bf16 %v6081_v0, %v6080_v5 }
 0x605   : > { %6631 = vst [vmem:[%s278_s27] sm:$0xff] %v6630_v27  }
 0x606 PF: > { %s17_s24 = sadd.s32 1, %s7993_s24  }
 0x607   : > { %p14_p4 = scmp.ge.s32.totalorder %s17_s24, 4  }
 0x609   :  { %16 = sbr.rel (!%p14_p4) target bundleno = 1 (0x1), region = 179 }

// kernel: net_forward.3
= control target key start
LH: loop header
LB: loop body
LE: loop exit
PB: predicated region body
PF: predicated region fallthrough
CT: control target
= control target key end

     0   :  { %v538_v36 = vlaneseq  ;;  %v5734_v37 = vmov 1966171168   ;;  %s7510_s0 = inlined_call_operand.vmem [shape: bf16[2,2048], index: 0, kind: input, shape index: {}]   ;;  %s7511_s1 = inlined_call_operand.vmem [shape: bf16[2048,512], index: 1, kind: input, shape index: {}]   ;;  %s7512_s2 = inlined_call_operand.vmem [shape: f32[1,512], index: 2, kind: input, shape index: {}]   ;;  %s7513_s3 = inlined_call_operand.vmem [shape: bf16[512,10], index: 3, kind: input, shape index: {}]   ;;  %s7514_s4 = inlined_call_operand.vmem [shape: f32[1,10], index: 4, kind: input, shape index: {}]   ;;  %s7515_s5 = inlined_call_operand.hbm [shape: f32[2,10], index: 5, kind: output, shape index: {}]  }
   0x1   :  { %v4908_v0 = vld [vmem:[%s7511_s1 + $0x4] ss:$16 sps:$4 sm:$0xff]   ;;  %v4910_v1 = vld [vmem:[%s7511_s1 + $0xc] ss:$16 sps:$4 sm:$0xff]   ;;  %v4912_v2 = vld [vmem:[%s7511_s1] ss:$16 sps:$4 sm:$0xff]   ;;  %v562_v38 = vunpack.c.l.s4 %v5734_v37 }
   0x2   :  { %3234 = vmatprep.subr.bf16.mxu0 %v4908_v0  ;;  %v4913_v3 = vld [vmem:[%s7511_s1 + $0x8] ss:$16 sps:$4 sm:$0xff]   ;;  %3562 = vmatprep.subr.bf16.mxu1 %v4910_v1  ;;  %v4914_v4 = vld [vmem:[%s7511_s1 + $0x24] ss:$16 sps:$4 sm:$0xff]   ;;  %v4916_v5 = vld [vmem:[%s7511_s1 + $0x2c] ss:$16 sps:$4 sm:$0xff]  }
   0x3   :  { %3235 = vmatpush1.bf16.msra.mxu0 %v4912_v2  ;;  %3563 = vmatpush1.bf16.msra.mxu1 %v4913_v3  ;;  %v4918_v6 = vld [vmem:[%s7511_s1 + $0x20] ss:$16 sps:$4 sm:$0xff]   ;;  %v4919_v7 = vld [vmem:[%s7511_s1 + $0x28] ss:$16 sps:$4 sm:$0xff]   ;;  %v4920_v8 = vld [vmem:[%s7511_s1 + $0x44] ss:$16 sps:$4 sm:$0xff]   ;;  %v563_v43 = vunpack.c.0.s8 %v562_v38 }
   0x4   :  { %3236 = vmatprep.subr.bf16.mxu0 %v4914_v4  ;;  %3564 = vmatprep.subr.bf16.mxu1 %v4916_v5  ;;  %v4922_v9 = vld [vmem:[%s7511_s1 + $0x4c] ss:$16 sps:$4 sm:$0xff]   ;;  %v4924_v10 = vld [vmem:[%s7511_s1 + $0x40] ss:$16 sps:$4 sm:$0xff]   ;;  %v4925_v11 = vld [vmem:[%s7511_s1 + $0x48] ss:$16 sps:$4 sm:$0xff]  }
   0x5   :  { %v4926_v12 = vld [vmem:[%s7511_s1 + $0x64] ss:$16 sps:$4 sm:$0xff]   ;;  %v4928_v13 = vld [vmem:[%s7511_s1 + $0x6c] ss:$16 sps:$4 sm:$0xff]   ;;  %v4930_v14 = vld [vmem:[%s7511_s1 + $0x60] ss:$16 sps:$4 sm:$0xff]  }
   0x6   :  { %v4931_v15 = vld [vmem:[%s7511_s1 + $0x68] ss:$16 sps:$4 sm:$0xff]   ;;  %v4932_v16 = vld [vmem:[%s7511_s1 + $0x84] ss:$16 sps:$4 sm:$0xff]   ;;  %v4934_v17 = vld [vmem:[%s7511_s1 + $0x8c] ss:$16 sps:$4 sm:$0xff]  }
   0x7   :  { %3237 = vmatpush1.bf16.msra.mxu0 %v4918_v6  ;;  %3565 = vmatpush1.bf16.msra.mxu1 %v4919_v7  ;;  %v4936_v18 = vld [vmem:[%s7511_s1 + $0x80] ss:$16 sps:$4 sm:$0xff]   ;;  %v4937_v19 = vld [vmem:[%s7511_s1 + $0x88] ss:$16 sps:$4 sm:$0xff]   ;;  %v4938_v20 = vld [vmem:[%s7511_s1 + $0xa4] ss:$16 sps:$4 sm:$0xff]  }
   0x8   :  { %3238 = vmatprep.subr.bf16.mxu0 %v4920_v8  ;;  %3566 = vmatprep.subr.bf16.mxu1 %v4922_v9  ;;  %v4940_v21 = vld [vmem:[%s7511_s1 + $0xac] ss:$16 sps:$4 sm:$0xff]   ;;  %v4942_v22 = vld [vmem:[%s7511_s1 + $0xa0] ss:$16 sps:$4 sm:$0xff]   ;;  %v4943_v23 = vld [vmem:[%s7511_s1 + $0xa8] ss:$16 sps:$4 sm:$0xff]  }
   0x9   :  { %v4944_v24 = vld [vmem:[%s7511_s1 + $0xc4] ss:$16 sps:$4 sm:$0xff]   ;;  %v4946_v25 = vld [vmem:[%s7511_s1 + $0xcc] ss:$16 sps:$4 sm:$0xff]   ;;  %v4948_v26 = vld [vmem:[%s7511_s1 + $0xc0] ss:$16 sps:$4 sm:$0xff]  }
   0xa   :  { %v4949_v27 = vld [vmem:[%s7511_s1 + $0xc8] ss:$16 sps:$4 sm:$0xff]   ;;  %v4950_v28 = vld [vmem:[%s7511_s1 + $0xe4] ss:$16 sps:$4 sm:$0xff]   ;;  %v4952_v29 = vld [vmem:[%s7511_s1 + $0xec] ss:$16 sps:$4 sm:$0xff]  }
   0xb   :  { %3239 = vmatpush1.bf16.msra.mxu0 %v4924_v10  ;;  %3567 = vmatpush1.bf16.msra.mxu1 %v4925_v11  ;;  %v4954_v30 = vld [vmem:[%s7511_s1 + $0xe0] ss:$16 sps:$4 sm:$0xff]   ;;  %v4955_v31 = vld [vmem:[%s7511_s1 + $0xe8] ss:$16 sps:$4 sm:$0xff]   ;;  %v4956_v32 = vld [vmem:[%s7511_s1 + $0x104] ss:$16 sps:$4 sm:$0xff]  }
   0xc   :  { %3240 = vmatprep.subr.bf16.mxu0 %v4926_v12  ;;  %3568 = vmatprep.subr.bf16.mxu1 %v4928_v13  ;;  %v4958_v33 = vld [vmem:[%s7511_s1 + $0x10c] ss:$16 sps:$4 sm:$0xff]   ;;  %v4960_v34 = vld [vmem:[%s7511_s1 + $0x100] ss:$16 sps:$4 sm:$0xff]   ;;  %v4961_v35 = vld [vmem:[%s7511_s1 + $0x108] ss:$16 sps:$4 sm:$0xff]  }
   0xd   :  { %v4962_v39 = vld [vmem:[%s7511_s1 + $0x124] ss:$16 sps:$4 sm:$0xff]   ;;  %v4964_v40 = vld [vmem:[%s7511_s1 + $0x12c] ss:$16 sps:$4 sm:$0xff]   ;;  %v4966_v41 = vld [vmem:[%s7511_s1 + $0x120] ss:$16 sps:$4 sm:$0xff]  }
   0xe   :  { %v5883_v42 = vshrl.u32 %v538_v36, 7  ;;  %v4967_v44 = vld [vmem:[%s7511_s1 + $0x128] ss:$16 sps:$4 sm:$0xff]   ;;  %v4968_v45 = vld [vmem:[%s7511_s1 + $0x144] ss:$16 sps:$4 sm:$0xff]  }
   0xf   :  { %3241 = vmatpush1.bf16.msra.mxu0 %v4930_v14  ;;  %3569 = vmatpush1.bf16.msra.mxu1 %v4931_v15  ;;  %v4970_v46 = vld [vmem:[%s7511_s1 + $0x14c] ss:$16 sps:$4 sm:$0xff]   ;;  %v4972_v47 = vld [vmem:[%s7511_s1 + $0x140] ss:$16 sps:$4 sm:$0xff]   ;;  %v4973_v48 = vld [vmem:[%s7511_s1 + $0x148] ss:$16 sps:$4 sm:$0xff]  }
  0x10   :  { %3242 = vmatprep.subr.bf16.mxu0 %v4932_v16  ;;  %3570 = vmatprep.subr.bf16.mxu1 %v4934_v17  ;;  %v5901_v49 = vsub.s32 %v563_v43, %v5883_v42  ;;  %v4974_v50 = vld [vmem:[%s7511_s1 + $0x164] ss:$16 sps:$4 sm:$0xff]   ;;  %v4976_v51 = vld [vmem:[%s7511_s1 + $0x16c] ss:$16 sps:$4 sm:$0xff]   ;;  %v4978_v53 = vld [vmem:[%s7511_s1 + $0x160] ss:$16 sps:$4 sm:$0xff]  }
  0x11   :  { %v5912_v52 = vld [vmem:[%s7510_s0] sm:$0xff]  ;;  %v4979_v55 = vld [vmem:[%s7511_s1 + $0x168] ss:$16 sps:$4 sm:$0xff]   ;;  %v4982_v57 = vld [vmem:[%s7511_s1 + $0x18c] ss:$16 sps:$4 sm:$0xff]  }
  0x12   :  { %v567_v54 = vrot.slane %v5912_v52, %v5901_v49  ;;  %v4980_v56 = vld [vmem:[%s7511_s1 + $0x184] ss:$16 sps:$4 sm:$0xff]   ;;  %v4984_v59 = vld [vmem:[%s7511_s1 + $0x180] ss:$16 sps:$4 sm:$0xff]   ;;  %v4985_v61 = vld [vmem:[%s7511_s1 + $0x188] ss:$16 sps:$4 sm:$0xff]  }
  0x13   :  { %3243 = vmatpush1.bf16.msra.mxu0 %v4936_v18  ;;  %3571 = vmatpush1.bf16.msra.mxu1 %v4937_v19  ;;  %v4986_v62 = vld [vmem:[%s7511_s1 + $0x1a4] ss:$16 sps:$4 sm:$0xff]   ;;  %v4988_v63 = vld [vmem:[%s7511_s1 + $0x1ac] ss:$16 sps:$4 sm:$0xff]   ;;  %v4990_v0 = vld [vmem:[%s7511_s1 + $0x1a0] ss:$16 sps:$4 sm:$0xff]  }
  0x14   :  { %3244 = vmatprep.subr.bf16.mxu0 %v4938_v20  ;;  %3572 = vmatprep.subr.bf16.mxu1 %v4940_v21  ;;  %v575_v58 = vcombine.high %v567_v54, %v567_v54  ;;  %v4991_v1 = vld [vmem:[%s7511_s1 + $0x1a8] ss:$16 sps:$4 sm:$0xff]   ;;  %v4992_v2 = vld [vmem:[%s7511_s1 + $0x1c4] ss:$16 sps:$4 sm:$0xff]   ;;  %v4994_v3 = vld [vmem:[%s7511_s1 + $0x1cc] ss:$16 sps:$4 sm:$0xff]   ;;  %v5981_v13 = vrot.slane %v567_v54, %v5901_v49 }
  0x15   :  { %v4996_v4 = vld [vmem:[%s7511_s1 + $0x1c0] ss:$16 sps:$4 sm:$0xff]   ;;  %v4997_v5 = vld [vmem:[%s7511_s1 + $0x1c8] ss:$16 sps:$4 sm:$0xff]   ;;  %v4998_v6 = vld [vmem:[%s7511_s1 + $0x1e4] ss:$16 sps:$4 sm:$0xff]  }
  0x16   :  { %v597_v60 = vrot.slane %v575_v58, %v5901_v49  ;;  %v5000_v7 = vld [vmem:[%s7511_s1 + $0x1ec] ss:$16 sps:$4 sm:$0xff]   ;;  %v5002_v8 = vld [vmem:[%s7511_s1 + $0x1e0] ss:$16 sps:$4 sm:$0xff]   ;;  %v5003_v9 = vld [vmem:[%s7511_s1 + $0x1e8] ss:$16 sps:$4 sm:$0xff]  }
  0x17   :  { %3245 = vmatpush1.bf16.msra.mxu0 %v4942_v22  ;;  %3573 = vmatpush1.bf16.msra.mxu1 %v4943_v23  ;;  %v5006_v10 = vld [vmem:[%s7511_s1 + $0x204] ss:$16 sps:$4 sm:$0xff]   ;;  %v5009_v11 = vld [vmem:[%s7511_s1 + $0x20c] ss:$16 sps:$4 sm:$0xff]   ;;  %v5004_v12 = vld [vmem:[%s7511_s1 + $0x200] ss:$16 sps:$4 sm:$0xff]  }
  0x18   :  { %3246 = vmatprep.subr.bf16.mxu0 %v4944_v24  ;;  %3574 = vmatprep.subr.bf16.mxu1 %v4946_v25  ;;  %v5007_v14 = vld [vmem:[%s7511_s1 + $0x208] ss:$16 sps:$4 sm:$0xff]   ;;  %v5012_v15 = vld [vmem:[%s7511_s1 + $0x224] ss:$16 sps:$4 sm:$0xff]   ;;  %v5015_v16 = vld [vmem:[%s7511_s1 + $0x22c] ss:$16 sps:$4 sm:$0xff]   ;;  %v607_v17 = vcombine.high %v597_v60, %v597_v60 }
  0x19   :  { %3266 = vmatprep.mubr.bf16.mxu0 %v597_v60  ;;  %3594 = vmatprep.mubr.bf16.mxu1 %v597_v60  ;;  %v5010_v18 = vld [vmem:[%s7511_s1 + $0x220] ss:$16 sps:$4 sm:$0xff]   ;;  %v5013_v19 = vld [vmem:[%s7511_s1 + $0x228] ss:$16 sps:$4 sm:$0xff]   ;;  %v5018_v20 = vld [vmem:[%s7511_s1 + $0x244] ss:$16 sps:$4 sm:$0xff]  }
  0x1a   :  { %v5021_v21 = vld [vmem:[%s7511_s1 + $0x24c] ss:$16 sps:$4 sm:$0xff]   ;;  %v5016_v22 = vld [vmem:[%s7511_s1 + $0x240] ss:$16 sps:$4 sm:$0xff]   ;;  %v5019_v23 = vld [vmem:[%s7511_s1 + $0x248] ss:$16 sps:$4 sm:$0xff]  }
  0x1b   :  { %3247 = vmatpush1.bf16.msra.mxu0 %v4948_v26  ;;  %3575 = vmatpush1.bf16.msra.mxu1 %v4949_v27  ;;  %v5024_v24 = vld [vmem:[%s7511_s1 + $0x264] ss:$16 sps:$4 sm:$0xff]   ;;  %v5027_v25 = vld [vmem:[%s7511_s1 + $0x26c] ss:$16 sps:$4 sm:$0xff]   ;;  %v5022_v26 = vld [vmem:[%s7511_s1 + $0x260] ss:$16 sps:$4 sm:$0xff]  }
  0x1c   :  { %3248 = vmatprep.subr.bf16.mxu0 %v4950_v28  ;;  %3576 = vmatprep.subr.bf16.mxu1 %v4952_v29  ;;  %v5025_v27 = vld [vmem:[%s7511_s1 + $0x268] ss:$16 sps:$4 sm:$0xff]   ;;  %v5030_v28 = vld [vmem:[%s7511_s1 + $0x284] ss:$16 sps:$4 sm:$0xff]   ;;  %v5033_v29 = vld [vmem:[%s7511_s1 + $0x28c] ss:$16 sps:$4 sm:$0xff]  }
  0x1d   :  { %v5042_v36 = vld [vmem:[%s7511_s1 + $0x2c4] ss:$16 sps:$4 sm:$0xff]   ;;  %v5045_v37 = vld [vmem:[%s7511_s1 + $0x2cc] ss:$16 sps:$4 sm:$0xff]   ;;  %v5040_v38 = vld [vmem:[%s7511_s1 + $0x2c0] ss:$16 sps:$4 sm:$0xff]  }
  0x1e   :  { %v5046_v43 = vld [vmem:[%s7511_s1 + $0x2e0] ss:$16 sps:$4 sm:$0xff]   ;;  %v5061_v54 = vld [vmem:[%s7511_s1 + $0x328] ss:$16 sps:$4 sm:$0xff]   ;;  %v5075_v60 = vld [vmem:[%s7511_s1 + $0x36c] ss:$16 sps:$4 sm:$0xff]  }
  0x1f   :  { %3249 = vmatpush1.bf16.msra.mxu0 %v4954_v30  ;;  %3577 = vmatpush1.bf16.msra.mxu1 %v4955_v31  ;;  %v5028_v30 = vld [vmem:[%s7511_s1 + $0x280] ss:$16 sps:$4 sm:$0xff]   ;;  %v5031_v31 = vld [vmem:[%s7511_s1 + $0x288] ss:$16 sps:$4 sm:$0xff]  }
  0x20   :  { %3250 = vmatprep.subr.bf16.mxu0 %v4956_v32  ;;  %3578 = vmatprep.subr.bf16.mxu1 %v4958_v33  ;;  %v5036_v32 = vld [vmem:[%s7511_s1 + $0x2a4] ss:$16 sps:$4 sm:$0xff]   ;;  %v5039_v33 = vld [vmem:[%s7511_s1 + $0x2ac] ss:$16 sps:$4 sm:$0xff]   ;;  %v5067_v58 = vld [vmem:[%s7511_s1 + $0x348] ss:$16 sps:$4 sm:$0xff]  }
  0x23   :  { %3251 = vmatpush1.bf16.msra.mxu0 %v4960_v34  ;;  %3579 = vmatpush1.bf16.msra.mxu1 %v4961_v35  ;;  %v5034_v34 = vld [vmem:[%s7511_s1 + $0x2a0] ss:$16 sps:$4 sm:$0xff]   ;;  %v5037_v35 = vld [vmem:[%s7511_s1 + $0x2a8] ss:$16 sps:$4 sm:$0xff]  }
  0x24   :  { %3252 = vmatprep.subr.bf16.mxu0 %v4962_v39  ;;  %3580 = vmatprep.subr.bf16.mxu1 %v4964_v40  ;;  %v5043_v39 = vld [vmem:[%s7511_s1 + $0x2c8] ss:$16 sps:$4 sm:$0xff]   ;;  %v5048_v40 = vld [vmem:[%s7511_s1 + $0x2e4] ss:$16 sps:$4 sm:$0xff]  }
  0x27   :  { %3253 = vmatpush1.bf16.msra.mxu0 %v4966_v41  ;;  %3581 = vmatpush1.bf16.msra.mxu1 %v4967_v44  ;;  %v5051_v41 = vld [vmem:[%s7511_s1 + $0x2ec] ss:$16 sps:$4 sm:$0xff]   ;;  %v5049_v44 = vld [vmem:[%s7511_s1 + $0x2e8] ss:$16 sps:$4 sm:$0xff]  }
  0x28   :  { %3254 = vmatprep.subr.bf16.mxu0 %v4968_v45  ;;  %3582 = vmatprep.subr.bf16.mxu1 %v4970_v46  ;;  %v5054_v45 = vld [vmem:[%s7511_s1 + $0x304] ss:$16 sps:$4 sm:$0xff]   ;;  %v5057_v46 = vld [vmem:[%s7511_s1 + $0x30c] ss:$16 sps:$4 sm:$0xff]  }
  0x2b   :  { %3255 = vmatpush1.bf16.msra.mxu0 %v4972_v47  ;;  %3583 = vmatpush1.bf16.msra.mxu1 %v4973_v48  ;;  %v5052_v47 = vld [vmem:[%s7511_s1 + $0x300] ss:$16 sps:$4 sm:$0xff]   ;;  %v5055_v48 = vld [vmem:[%s7511_s1 + $0x308] ss:$16 sps:$4 sm:$0xff]  }
  0x2c   :  { %3256 = vmatprep.subr.bf16.mxu0 %v4974_v50  ;;  %3584 = vmatprep.subr.bf16.mxu1 %v4976_v51  ;;  %v5060_v50 = vld [vmem:[%s7511_s1 + $0x324] ss:$16 sps:$4 sm:$0xff]   ;;  %v5063_v51 = vld [vmem:[%s7511_s1 + $0x32c] ss:$16 sps:$4 sm:$0xff]  }
  0x2f   :  { %3257 = vmatpush1.bf16.msra.mxu0 %v4978_v53  ;;  %3585 = vmatpush1.bf16.msra.mxu1 %v4979_v55  ;;  %v5058_v53 = vld [vmem:[%s7511_s1 + $0x320] ss:$16 sps:$4 sm:$0xff]   ;;  %v5066_v55 = vld [vmem:[%s7511_s1 + $0x344] ss:$16 sps:$4 sm:$0xff]  }
  0x30   :  { %3258 = vmatprep.subr.bf16.mxu0 %v4980_v56  ;;  %3586 = vmatprep.subr.bf16.mxu1 %v4982_v57  ;;  %v5069_v56 = vld [vmem:[%s7511_s1 + $0x34c] ss:$16 sps:$4 sm:$0xff]   ;;  %v5064_v57 = vld [vmem:[%s7511_s1 + $0x340] ss:$16 sps:$4 sm:$0xff]  }
  0x33   :  { %3259 = vmatpush1.bf16.msra.mxu0 %v4984_v59  ;;  %3587 = vmatpush1.bf16.msra.mxu1 %v4985_v61  ;;  %v5072_v59 = vld [vmem:[%s7511_s1 + $0x364] ss:$16 sps:$4 sm:$0xff]   ;;  %v5070_v61 = vld [vmem:[%s7511_s1 + $0x360] ss:$16 sps:$4 sm:$0xff]  }
  0x34   :  { %3260 = vmatprep.subr.bf16.mxu0 %v4986_v62  ;;  %3588 = vmatprep.subr.bf16.mxu1 %v4988_v63  ;;  %v5073_v62 = vld [vmem:[%s7511_s1 + $0x368] ss:$16 sps:$4 sm:$0xff]   ;;  %v5078_v63 = vld [vmem:[%s7511_s1 + $0x384] ss:$16 sps:$4 sm:$0xff]  }
  0x37   :  { %3261 = vmatpush1.bf16.msra.mxu0 %v4990_v0  ;;  %3589 = vmatpush1.bf16.msra.mxu1 %v4991_v1  ;;  %v5081_v0 = vld [vmem:[%s7511_s1 + $0x38c] ss:$16 sps:$4 sm:$0xff]   ;;  %v5076_v1 = vld [vmem:[%s7511_s1 + $0x380] ss:$16 sps:$4 sm:$0xff]  }
  0x38   :  { %3262 = vmatprep.subr.bf16.mxu0 %v4992_v2  ;;  %3590 = vmatprep.subr.bf16.mxu1 %v4994_v3  ;;  %v5079_v2 = vld [vmem:[%s7511_s1 + $0x388] ss:$16 sps:$4 sm:$0xff]   ;;  %v5084_v3 = vld [vmem:[%s7511_s1 + $0x3a4] ss:$16 sps:$4 sm:$0xff]  }
  0x3b   :  { %3263 = vmatpush1.bf16.msra.mxu0 %v4996_v4  ;;  %3591 = vmatpush1.bf16.msra.mxu1 %v4997_v5  ;;  %v5087_v4 = vld [vmem:[%s7511_s1 + $0x3ac] ss:$16 sps:$4 sm:$0xff]   ;;  %v5082_v5 = vld [vmem:[%s7511_s1 + $0x3a0] ss:$16 sps:$4 sm:$0xff]  }
  0x3c   :  { %3264 = vmatprep.subr.bf16.mxu0 %v4998_v6  ;;  %3592 = vmatprep.subr.bf16.mxu1 %v5000_v7  ;;  %v5085_v6 = vld [vmem:[%s7511_s1 + $0x3a8] ss:$16 sps:$4 sm:$0xff]   ;;  %v5090_v7 = vld [vmem:[%s7511_s1 + $0x3c4] ss:$16 sps:$4 sm:$0xff]  }
  0x3f   :  { %3265 = vmatpush1.bf16.msra.mxu0 %v5002_v8  ;;  %3593 = vmatpush1.bf16.msra.mxu1 %v5003_v9  ;;  %v5093_v8 = vld [vmem:[%s7511_s1 + $0x3cc] ss:$16 sps:$4 sm:$0xff]   ;;  %v560_v9 = vcombine.high %v5912_v52, %v5912_v52 }
  0x40   :  { %3275 = vmatprep.subr.bf16.mxu0 %v5006_v10  ;;  %3603 = vmatprep.subr.bf16.mxu1 %v5009_v11  ;;  %v5088_v10 = vld [vmem:[%s7511_s1 + $0x3c0] ss:$16 sps:$4 sm:$0xff]   ;;  %v5091_v11 = vld [vmem:[%s7511_s1 + $0x3c8] ss:$16 sps:$4 sm:$0xff]   ;;  %v5099_v52 = vld [vmem:[%s7511_s1 + $0x3ec] ss:$16 sps:$4 sm:$0xff]  }
  0x42   :  { %3267 = vmatmul.mubr.bf16.vlgmr.msra.gmra.mrb[0].mxu0 %v5981_v13  ;;  %3595 = vmatmul.mubr.bf16.vlgmr.msra.gmra.mrb[0].mxu1 %v5981_v13 }
  0x43   :  { %3276 = vmatpush1.bf16.msra.mxu0 %v5004_v12  ;;  %3604 = vmatpush1.bf16.msra.mxu1 %v5007_v14  ;;  %v5096_v12 = vld [vmem:[%s7511_s1 + $0x3e4] ss:$16 sps:$4 sm:$0xff]   ;;  %v6165_v14 = vrot.slane %v560_v9, %v5901_v49  ;;  %v5175_v9 = vld [vmem:[%s7511_s1 + $0x588] ss:$16 sps:$4 sm:$0xff]  }
  0x44   :  { %3277 = vmatprep.subr.bf16.mxu0 %v5012_v15  ;;  %3605 = vmatprep.subr.bf16.mxu1 %v5015_v16  ;;  %v5094_v15 = vld [vmem:[%s7511_s1 + $0x3e0] ss:$16 sps:$4 sm:$0xff]   ;;  %v5097_v16 = vld [vmem:[%s7511_s1 + $0x3e8] ss:$16 sps:$4 sm:$0xff]  }
  0x45   :  { %3307 = vmatprep.mubr.bf16.mxu0 %v607_v17  ;;  %3635 = vmatprep.mubr.bf16.mxu1 %v607_v17  ;;  %v5102_v17 = vld [vmem:[%s7511_s1 + $0x404] ss:$16 sps:$4 sm:$0xff]  }
  0x47   :  { %3278 = vmatpush1.bf16.msra.mxu0 %v5010_v18  ;;  %3606 = vmatpush1.bf16.msra.mxu1 %v5013_v19  ;;  %v5105_v18 = vld [vmem:[%s7511_s1 + $0x40c] ss:$16 sps:$4 sm:$0xff]   ;;  %v576_v19 = vcombine.high %v6165_v14, %v6165_v14 }
  0x48   :  { %3279 = vmatprep.subr.bf16.mxu0 %v5018_v20  ;;  %3607 = vmatprep.subr.bf16.mxu1 %v5021_v21  ;;  %v5100_v20 = vld [vmem:[%s7511_s1 + $0x400] ss:$16 sps:$4 sm:$0xff]   ;;  %v605_v21 = vcombine.high %v5981_v13, %v5981_v13 }
  0x49   :  { %v5106_v13 = vld [vmem:[%s7511_s1 + $0x420] ss:$16 sps:$4 sm:$0xff]  }
  0x4b   :  { %3280 = vmatpush1.bf16.msra.mxu0 %v5016_v22  ;;  %3608 = vmatpush1.bf16.msra.mxu1 %v5019_v23  ;;  %v5103_v22 = vld [vmem:[%s7511_s1 + $0x408] ss:$16 sps:$4 sm:$0xff]   ;;  %v5108_v23 = vld [vmem:[%s7511_s1 + $0x424] ss:$16 sps:$4 sm:$0xff]  }
  0x4c   :  { %3281 = vmatprep.subr.bf16.mxu0 %v5024_v24  ;;  %3609 = vmatprep.subr.bf16.mxu1 %v5027_v25  ;;  %v5111_v24 = vld [vmem:[%s7511_s1 + $0x42c] ss:$16 sps:$4 sm:$0xff]   ;;  %v6196_v25 = vrot.slane %v576_v19, %v5901_v49  ;;  %v5192_v19 = vld [vmem:[%s7511_s1 + $0x5e4] ss:$16 sps:$4 sm:$0xff]  }
  0x4f   :  { %3282 = vmatpush1.bf16.msra.mxu0 %v5022_v26  ;;  %3610 = vmatpush1.bf16.msra.mxu1 %v5025_v27  ;;  %v5109_v26 = vld [vmem:[%s7511_s1 + $0x428] ss:$16 sps:$4 sm:$0xff]   ;;  %v5114_v27 = vld [vmem:[%s7511_s1 + $0x444] ss:$16 sps:$4 sm:$0xff]  }
  0x50   :  { %3283 = vmatprep.subr.bf16.mxu0 %v5030_v28  ;;  %3611 = vmatprep.subr.bf16.mxu1 %v5033_v29  ;;  %v5117_v28 = vld [vmem:[%s7511_s1 + $0x44c] ss:$16 sps:$4 sm:$0xff]   ;;  %v5112_v29 = vld [vmem:[%s7511_s1 + $0x440] ss:$16 sps:$4 sm:$0xff]  }
  0x53   :  { %3284 = vmatpush1.bf16.msra.mxu0 %v5028_v30  ;;  %3612 = vmatpush1.bf16.msra.mxu1 %v5031_v31  ;;  %v5115_v30 = vld [vmem:[%s7511_s1 + $0x448] ss:$16 sps:$4 sm:$0xff]   ;;  %v5120_v31 = vld [vmem:[%s7511_s1 + $0x464] ss:$16 sps:$4 sm:$0xff]  }
  0x54   :  { %3285 = vmatprep.subr.bf16.mxu0 %v5036_v32  ;;  %3613 = vmatprep.subr.bf16.mxu1 %v5039_v33  ;;  %v5123_v32 = vld [vmem:[%s7511_s1 + $0x46c] ss:$16 sps:$4 sm:$0xff]   ;;  %v5118_v33 = vld [vmem:[%s7511_s1 + $0x460] ss:$16 sps:$4 sm:$0xff]  }
  0x57   :  { %3286 = vmatpush1.bf16.msra.mxu0 %v5034_v34  ;;  %3614 = vmatpush1.bf16.msra.mxu1 %v5037_v35  ;;  %v5121_v34 = vld [vmem:[%s7511_s1 + $0x468] ss:$16 sps:$4 sm:$0xff]   ;;  %v5126_v35 = vld [vmem:[%s7511_s1 + $0x484] ss:$16 sps:$4 sm:$0xff]  }
  0x58   :  { %3287 = vmatprep.subr.bf16.mxu0 %v5042_v36  ;;  %3615 = vmatprep.subr.bf16.mxu1 %v5045_v37  ;;  %v5129_v36 = vld [vmem:[%s7511_s1 + $0x48c] ss:$16 sps:$4 sm:$0xff]   ;;  %v5124_v37 = vld [vmem:[%s7511_s1 + $0x480] ss:$16 sps:$4 sm:$0xff]  }
  0x5b   :  { %3288 = vmatpush1.bf16.msra.mxu0 %v5040_v38  ;;  %3616 = vmatpush1.bf16.msra.mxu1 %v5043_v39  ;;  %v5127_v38 = vld [vmem:[%s7511_s1 + $0x488] ss:$16 sps:$4 sm:$0xff]   ;;  %v5132_v39 = vld [vmem:[%s7511_s1 + $0x4a4] ss:$16 sps:$4 sm:$0xff]  }
  0x5c   :  { %3289 = vmatprep.subr.bf16.mxu0 %v5048_v40  ;;  %3617 = vmatprep.subr.bf16.mxu1 %v5051_v41  ;;  %v5135_v40 = vld [vmem:[%s7511_s1 + $0x4ac] ss:$16 sps:$4 sm:$0xff]   ;;  %v5130_v41 = vld [vmem:[%s7511_s1 + $0x4a0] ss:$16 sps:$4 sm:$0xff]  }
  0x5f   :  { %3290 = vmatpush1.bf16.msra.mxu0 %v5046_v43  ;;  %3618 = vmatpush1.bf16.msra.mxu1 %v5049_v44  ;;  %v5133_v43 = vld [vmem:[%s7511_s1 + $0x4a8] ss:$16 sps:$4 sm:$0xff]   ;;  %v5138_v44 = vld [vmem:[%s7511_s1 + $0x4c4] ss:$16 sps:$4 sm:$0xff]  }
  0x60   :  { %3291 = vmatprep.subr.bf16.mxu0 %v5054_v45  ;;  %3619 = vmatprep.subr.bf16.mxu1 %v5057_v46  ;;  %v5141_v45 = vld [vmem:[%s7511_s1 + $0x4cc] ss:$16 sps:$4 sm:$0xff]   ;;  %v5136_v46 = vld [vmem:[%s7511_s1 + $0x4c0] ss:$16 sps:$4 sm:$0xff]  }
  0x63   :  { %3292 = vmatpush1.bf16.msra.mxu0 %v5052_v47  ;;  %3620 = vmatpush1.bf16.msra.mxu1 %v5055_v48  ;;  %v5139_v47 = vld [vmem:[%s7511_s1 + $0x4c8] ss:$16 sps:$4 sm:$0xff]   ;;  %v5144_v48 = vld [vmem:[%s7511_s1 + $0x4e4] ss:$16 sps:$4 sm:$0xff]  }
  0x64   :  { %3293 = vmatprep.subr.bf16.mxu0 %v5060_v50  ;;  %3621 = vmatprep.subr.bf16.mxu1 %v5063_v51  ;;  %v5147_v50 = vld [vmem:[%s7511_s1 + $0x4ec] ss:$16 sps:$4 sm:$0xff]   ;;  %v5142_v51 = vld [vmem:[%s7511_s1 + $0x4e0] ss:$16 sps:$4 sm:$0xff]  }
  0x67   :  { %3294 = vmatpush1.bf16.msra.mxu0 %v5058_v53  ;;  %3622 = vmatpush1.bf16.msra.mxu1 %v5061_v54  ;;  %v5145_v53 = vld [vmem:[%s7511_s1 + $0x4e8] ss:$16 sps:$4 sm:$0xff]   ;;  %v5150_v54 = vld [vmem:[%s7511_s1 + $0x504] ss:$16 sps:$4 sm:$0xff]  }
  0x68   :  { %3295 = vmatprep.subr.bf16.mxu0 %v5066_v55  ;;  %3623 = vmatprep.subr.bf16.mxu1 %v5069_v56  ;;  %v5153_v55 = vld [vmem:[%s7511_s1 + $0x50c] ss:$16 sps:$4 sm:$0xff]   ;;  %v5148_v56 = vld [vmem:[%s7511_s1 + $0x500] ss:$16 sps:$4 sm:$0xff]  }
  0x6b   :  { %3296 = vmatpush1.bf16.msra.mxu0 %v5064_v57  ;;  %3624 = vmatpush1.bf16.msra.mxu1 %v5067_v58  ;;  %v5151_v57 = vld [vmem:[%s7511_s1 + $0x508] ss:$16 sps:$4 sm:$0xff]   ;;  %v5156_v58 = vld [vmem:[%s7511_s1 + $0x524] ss:$16 sps:$4 sm:$0xff]  }
  0x6c   :  { %3297 = vmatprep.subr.bf16.mxu0 %v5072_v59  ;;  %3625 = vmatprep.subr.bf16.mxu1 %v5075_v60  ;;  %v5159_v59 = vld [vmem:[%s7511_s1 + $0x52c] ss:$16 sps:$4 sm:$0xff]   ;;  %v5154_v60 = vld [vmem:[%s7511_s1 + $0x520] ss:$16 sps:$4 sm:$0xff]  }
  0x6f   :  { %3298 = vmatpush1.bf16.msra.mxu0 %v5070_v61  ;;  %3626 = vmatpush1.bf16.msra.mxu1 %v5073_v62  ;;  %v5157_v61 = vld [vmem:[%s7511_s1 + $0x528] ss:$16 sps:$4 sm:$0xff]   ;;  %v5162_v62 = vld [vmem:[%s7511_s1 + $0x544] ss:$16 sps:$4 sm:$0xff]  }
  0x70   :  { %3299 = vmatprep.subr.bf16.mxu0 %v5078_v63  ;;  %3627 = vmatprep.subr.bf16.mxu1 %v5081_v0  ;;  %v5165_v63 = vld [vmem:[%s7511_s1 + $0x54c] ss:$16 sps:$4 sm:$0xff]   ;;  %v5160_v0 = vld [vmem:[%s7511_s1 + $0x540] ss:$16 sps:$4 sm:$0xff]  }
  0x73   :  { %3300 = vmatpush1.bf16.msra.mxu0 %v5076_v1  ;;  %3628 = vmatpush1.bf16.msra.mxu1 %v5079_v2  ;;  %v5163_v1 = vld [vmem:[%s7511_s1 + $0x548] ss:$16 sps:$4 sm:$0xff]   ;;  %v5168_v2 = vld [vmem:[%s7511_s1 + $0x564] ss:$16 sps:$4 sm:$0xff]  }
  0x74   :  { %3301 = vmatprep.subr.bf16.mxu0 %v5084_v3  ;;  %3629 = vmatprep.subr.bf16.mxu1 %v5087_v4  ;;  %v5171_v3 = vld [vmem:[%s7511_s1 + $0x56c] ss:$16 sps:$4 sm:$0xff]   ;;  %v5166_v4 = vld [vmem:[%s7511_s1 + $0x560] ss:$16 sps:$4 sm:$0xff]  }
  0x77   :  { %3302 = vmatpush1.bf16.msra.mxu0 %v5082_v5  ;;  %3630 = vmatpush1.bf16.msra.mxu1 %v5085_v6  ;;  %v5169_v5 = vld [vmem:[%s7511_s1 + $0x568] ss:$16 sps:$4 sm:$0xff]   ;;  %v5174_v6 = vld [vmem:[%s7511_s1 + $0x584] ss:$16 sps:$4 sm:$0xff]  }
  0x78   :  { %3303 = vmatprep.subr.bf16.mxu0 %v5090_v7  ;;  %3631 = vmatprep.subr.bf16.mxu1 %v5093_v8  ;;  %v5177_v7 = vld [vmem:[%s7511_s1 + $0x58c] ss:$16 sps:$4 sm:$0xff]   ;;  %v5172_v8 = vld [vmem:[%s7511_s1 + $0x580] ss:$16 sps:$4 sm:$0xff]  }
  0x7b   :  { %3304 = vmatpush1.bf16.msra.mxu0 %v5088_v10  ;;  %3632 = vmatpush1.bf16.msra.mxu1 %v5091_v11  ;;  %v5180_v10 = vld [vmem:[%s7511_s1 + $0x5a4] ss:$16 sps:$4 sm:$0xff]   ;;  %v5183_v11 = vld [vmem:[%s7511_s1 + $0x5ac] ss:$16 sps:$4 sm:$0xff]  }
  0x7c   :  { %3305 = vmatprep.subr.bf16.mxu0 %v5096_v12  ;;  %3633 = vmatprep.subr.bf16.mxu1 %v5099_v52  ;;  %v5178_v12 = vld [vmem:[%s7511_s1 + $0x5a0] ss:$16 sps:$4 sm:$0xff]   ;;  %v5181_v52 = vld [vmem:[%s7511_s1 + $0x5a8] ss:$16 sps:$4 sm:$0xff]  }
  0x7f   :  { %3306 = vmatpush1.bf16.msra.mxu0 %v5094_v15  ;;  %3634 = vmatpush1.bf16.msra.mxu1 %v5097_v16  ;;  %v5186_v15 = vld [vmem:[%s7511_s1 + $0x5c4] ss:$16 sps:$4 sm:$0xff]   ;;  %v5189_v16 = vld [vmem:[%s7511_s1 + $0x5cc] ss:$16 sps:$4 sm:$0xff]  }
  0x80   :  { %3316 = vmatprep.subr.bf16.mxu0 %v5102_v17  ;;  %3644 = vmatprep.subr.bf16.mxu1 %v5105_v18  ;;  %v5184_v17 = vld [vmem:[%s7511_s1 + $0x5c0] ss:$16 sps:$4 sm:$0xff]   ;;  %v5187_v18 = vld [vmem:[%s7511_s1 + $0x5c8] ss:$16 sps:$4 sm:$0xff]  }
  0x82   :  { %3308 = vmatmul.mubr.bf16.vlgmr.msra.gmra.mrb[0].mxu0 %v605_v21  ;;  %3636 = vmatmul.mubr.bf16.vlgmr.msra.gmra.mrb[0].mxu1 %v605_v21  ;;  %v5190_v21 = vld [vmem:[%s7511_s1 + $0x5e0] ss:$16 sps:$4 sm:$0xff]  }
  0x83   :  { %3317 = vmatpush1.bf16.msra.mxu0 %v5100_v20  ;;  %3645 = vmatpush1.bf16.msra.mxu1 %v5103_v22  ;;  %v5195_v20 = vld [vmem:[%s7511_s1 + $0x5ec] ss:$16 sps:$4 sm:$0xff]   ;;  %v5193_v22 = vld [vmem:[%s7511_s1 + $0x5e8] ss:$16 sps:$4 sm:$0xff]  }
  0x84   :  { %3318 = vmatprep.subr.bf16.mxu0 %v5108_v23  ;;  %3646 = vmatprep.subr.bf16.mxu1 %v5111_v24  ;;  %v5199_v23 = vld [vmem:[%s7511_s1 + $0x604] ss:$16 sps:$4 sm:$0xff]   ;;  %v5202_v24 = vld [vmem:[%s7511_s1 + $0x60c] ss:$16 sps:$4 sm:$0xff]  }
  0x85   :  { %3348 = vmatprep.mubr.bf16.mxu0 %v6196_v25  ;;  %3676 = vmatprep.mubr.bf16.mxu1 %v6196_v25 }
  0x87   :  { %3319 = vmatpush1.bf16.msra.mxu0 %v5106_v13  ;;  %3647 = vmatpush1.bf16.msra.mxu1 %v5109_v26  ;;  %v5197_v13 = vld [vmem:[%s7511_s1 + $0x600] ss:$16 sps:$4 sm:$0xff]   ;;  %v6385_v26 = vrot.slane %v6165_v14, %v5901_v49  ;;  %v608_v14 = vcombine.high %v6196_v25, %v6196_v25  ;;  %v5211_v25 = vld [vmem:[%s7511_s1 + $0x644] ss:$16 sps:$4 sm:$0xff]  }
  0x88   :  { %3320 = vmatprep.subr.bf16.mxu0 %v5114_v27  ;;  %3648 = vmatprep.subr.bf16.mxu1 %v5117_v28  ;;  %v5200_v27 = vld [vmem:[%s7511_s1 + $0x608] ss:$16 sps:$4 sm:$0xff]   ;;  %v5205_v28 = vld [vmem:[%s7511_s1 + $0x624] ss:$16 sps:$4 sm:$0xff]  }
  0x8b   :  { %3321 = vmatpush1.bf16.msra.mxu0 %v5112_v29  ;;  %3649 = vmatpush1.bf16.msra.mxu1 %v5115_v30  ;;  %v5208_v29 = vld [vmem:[%s7511_s1 + $0x62c] ss:$16 sps:$4 sm:$0xff]   ;;  %v5203_v30 = vld [vmem:[%s7511_s1 + $0x620] ss:$16 sps:$4 sm:$0xff]  }
  0x8c   :  { %3322 = vmatprep.subr.bf16.mxu0 %v5120_v31  ;;  %3650 = vmatprep.subr.bf16.mxu1 %v5123_v32  ;;  %v5206_v31 = vld [vmem:[%s7511_s1 + $0x628] ss:$16 sps:$4 sm:$0xff]   ;;  %v5214_v32 = vld [vmem:[%s7511_s1 + $0x64c] ss:$16 sps:$4 sm:$0xff]  }
  0x8f   :  { %3323 = vmatpush1.bf16.msra.mxu0 %v5118_v33  ;;  %3651 = vmatpush1.bf16.msra.mxu1 %v5121_v34  ;;  %v5209_v33 = vld [vmem:[%s7511_s1 + $0x640] ss:$16 sps:$4 sm:$0xff]   ;;  %v5212_v34 = vld [vmem:[%s7511_s1 + $0x648] ss:$16 sps:$4 sm:$0xff]  }
  0x90   :  { %3324 = vmatprep.subr.bf16.mxu0 %v5126_v35  ;;  %3652 = vmatprep.subr.bf16.mxu1 %v5129_v36  ;;  %v5217_v35 = vld [vmem:[%s7511_s1 + $0x664] ss:$16 sps:$4 sm:$0xff]   ;;  %v5220_v36 = vld [vmem:[%s7511_s1 + $0x66c] ss:$16 sps:$4 sm:$0xff]  }
  0x93   :  { %3325 = vmatpush1.bf16.msra.mxu0 %v5124_v37  ;;  %3653 = vmatpush1.bf16.msra.mxu1 %v5127_v38  ;;  %v5215_v37 = vld [vmem:[%s7511_s1 + $0x660] ss:$16 sps:$4 sm:$0xff]   ;;  %v5218_v38 = vld [vmem:[%s7511_s1 + $0x668] ss:$16 sps:$4 sm:$0xff]  }
  0x94   :  { %3326 = vmatprep.subr.bf16.mxu0 %v5132_v39  ;;  %3654 = vmatprep.subr.bf16.mxu1 %v5135_v40  ;;  %v5223_v39 = vld [vmem:[%s7511_s1 + $0x684] ss:$16 sps:$4 sm:$0xff]   ;;  %v5226_v40 = vld [vmem:[%s7511_s1 + $0x68c] ss:$16 sps:$4 sm:$0xff]  }
  0x97   :  { %3327 = vmatpush1.bf16.msra.mxu0 %v5130_v41  ;;  %3655 = vmatpush1.bf16.msra.mxu1 %v5133_v43  ;;  %v5221_v41 = vld [vmem:[%s7511_s1 + $0x680] ss:$16 sps:$4 sm:$0xff]   ;;  %v5224_v43 = vld [vmem:[%s7511_s1 + $0x688] ss:$16 sps:$4 sm:$0xff]  }
  0x98   :  { %3328 = vmatprep.subr.bf16.mxu0 %v5138_v44  ;;  %3656 = vmatprep.subr.bf16.mxu1 %v5141_v45  ;;  %v5229_v44 = vld [vmem:[%s7511_s1 + $0x6a4] ss:$16 sps:$4 sm:$0xff]   ;;  %v5232_v45 = vld [vmem:[%s7511_s1 + $0x6ac] ss:$16 sps:$4 sm:$0xff]  }
  0x9b   :  { %3329 = vmatpush1.bf16.msra.mxu0 %v5136_v46  ;;  %3657 = vmatpush1.bf16.msra.mxu1 %v5139_v47  ;;  %v5227_v46 = vld [vmem:[%s7511_s1 + $0x6a0] ss:$16 sps:$4 sm:$0xff]   ;;  %v5230_v47 = vld [vmem:[%s7511_s1 + $0x6a8] ss:$16 sps:$4 sm:$0xff]  }
  0x9c   :  { %3330 = vmatprep.subr.bf16.mxu0 %v5144_v48  ;;  %3658 = vmatprep.subr.bf16.mxu1 %v5147_v50  ;;  %v5235_v48 = vld [vmem:[%s7511_s1 + $0x6c4] ss:$16 sps:$4 sm:$0xff]   ;;  %v5238_v50 = vld [vmem:[%s7511_s1 + $0x6cc] ss:$16 sps:$4 sm:$0xff]  }
  0x9f   :  { %3331 = vmatpush1.bf16.msra.mxu0 %v5142_v51  ;;  %3659 = vmatpush1.bf16.msra.mxu1 %v5145_v53  ;;  %v5233_v51 = vld [vmem:[%s7511_s1 + $0x6c0] ss:$16 sps:$4 sm:$0xff]   ;;  %v5236_v53 = vld [vmem:[%s7511_s1 + $0x6c8] ss:$16 sps:$4 sm:$0xff]  }
  0xa0   :  { %3332 = vmatprep.subr.bf16.mxu0 %v5150_v54  ;;  %3660 = vmatprep.subr.bf16.mxu1 %v5153_v55  ;;  %v5241_v54 = vld [vmem:[%s7511_s1 + $0x6e4] ss:$16 sps:$4 sm:$0xff]   ;;  %v5244_v55 = vld [vmem:[%s7511_s1 + $0x6ec] ss:$16 sps:$4 sm:$0xff]  }
  0xa3   :  { %3333 = vmatpush1.bf16.msra.mxu0 %v5148_v56  ;;  %3661 = vmatpush1.bf16.msra.mxu1 %v5151_v57  ;;  %v5239_v56 = vld [vmem:[%s7511_s1 + $0x6e0] ss:$16 sps:$4 sm:$0xff]   ;;  %v5242_v57 = vld [vmem:[%s7511_s1 + $0x6e8] ss:$16 sps:$4 sm:$0xff]  }
  0xa4   :  { %3334 = vmatprep.subr.bf16.mxu0 %v5156_v58  ;;  %3662 = vmatprep.subr.bf16.mxu1 %v5159_v59  ;;  %v5247_v58 = vld [vmem:[%s7511_s1 + $0x704] ss:$16 sps:$4 sm:$0xff]   ;;  %v5250_v59 = vld [vmem:[%s7511_s1 + $0x70c] ss:$16 sps:$4 sm:$0xff]  }
  0xa7   :  { %3335 = vmatpush1.bf16.msra.mxu0 %v5154_v60  ;;  %3663 = vmatpush1.bf16.msra.mxu1 %v5157_v61  ;;  %v5245_v60 = vld [vmem:[%s7511_s1 + $0x700] ss:$16 sps:$4 sm:$0xff]   ;;  %v5248_v61 = vld [vmem:[%s7511_s1 + $0x708] ss:$16 sps:$4 sm:$0xff]  }
  0xa8   :  { %3336 = vmatprep.subr.bf16.mxu0 %v5162_v62  ;;  %3664 = vmatprep.subr.bf16.mxu1 %v5165_v63  ;;  %v5253_v62 = vld [vmem:[%s7511_s1 + $0x724] ss:$16 sps:$4 sm:$0xff]   ;;  %v5256_v63 = vld [vmem:[%s7511_s1 + $0x72c] ss:$16 sps:$4 sm:$0xff]  }
  0xab   :  { %3337 = vmatpush1.bf16.msra.mxu0 %v5160_v0  ;;  %3665 = vmatpush1.bf16.msra.mxu1 %v5163_v1  ;;  %v5251_v0 = vld [vmem:[%s7511_s1 + $0x720] ss:$16 sps:$4 sm:$0xff]   ;;  %v5254_v1 = vld [vmem:[%s7511_s1 + $0x728] ss:$16 sps:$4 sm:$0xff]  }
  0xac   :  { %3338 = vmatprep.subr.bf16.mxu0 %v5168_v2  ;;  %3666 = vmatprep.subr.bf16.mxu1 %v5171_v3  ;;  %v5259_v2 = vld [vmem:[%s7511_s1 + $0x744] ss:$16 sps:$4 sm:$0xff]   ;;  %v5262_v3 = vld [vmem:[%s7511_s1 + $0x74c] ss:$16 sps:$4 sm:$0xff]  }
  0xaf   :  { %3339 = vmatpush1.bf16.msra.mxu0 %v5166_v4  ;;  %3667 = vmatpush1.bf16.msra.mxu1 %v5169_v5  ;;  %v5257_v4 = vld [vmem:[%s7511_s1 + $0x740] ss:$16 sps:$4 sm:$0xff]   ;;  %v5260_v5 = vld [vmem:[%s7511_s1 + $0x748] ss:$16 sps:$4 sm:$0xff]  }
  0xb0   :  { %3340 = vmatprep.subr.bf16.mxu0 %v5174_v6  ;;  %3668 = vmatprep.subr.bf16.mxu1 %v5177_v7  ;;  %v5265_v6 = vld [vmem:[%s7511_s1 + $0x764] ss:$16 sps:$4 sm:$0xff]   ;;  %v5268_v7 = vld [vmem:[%s7511_s1 + $0x76c] ss:$16 sps:$4 sm:$0xff]  }
  0xb3   :  { %3341 = vmatpush1.bf16.msra.mxu0 %v5172_v8  ;;  %3669 = vmatpush1.bf16.msra.mxu1 %v5175_v9  ;;  %v5263_v8 = vld [vmem:[%s7511_s1 + $0x760] ss:$16 sps:$4 sm:$0xff]   ;;  %v5266_v9 = vld [vmem:[%s7511_s1 + $0x768] ss:$16 sps:$4 sm:$0xff]  }
  0xb4   :  { %3342 = vmatprep.subr.bf16.mxu0 %v5180_v10  ;;  %3670 = vmatprep.subr.bf16.mxu1 %v5183_v11  ;;  %v5271_v10 = vld [vmem:[%s7511_s1 + $0x784] ss:$16 sps:$4 sm:$0xff]   ;;  %v5274_v11 = vld [vmem:[%s7511_s1 + $0x78c] ss:$16 sps:$4 sm:$0xff]  }
  0xb7   :  { %3343 = vmatpush1.bf16.msra.mxu0 %v5178_v12  ;;  %3671 = vmatpush1.bf16.msra.mxu1 %v5181_v52  ;;  %v5269_v12 = vld [vmem:[%s7511_s1 + $0x780] ss:$16 sps:$4 sm:$0xff]   ;;  %v5272_v52 = vld [vmem:[%s7511_s1 + $0x788] ss:$16 sps:$4 sm:$0xff]  }
  0xb8   :  { %3344 = vmatprep.subr.bf16.mxu0 %v5186_v15  ;;  %3672 = vmatprep.subr.bf16.mxu1 %v5189_v16  ;;  %v5277_v15 = vld [vmem:[%s7511_s1 + $0x7a4] ss:$16 sps:$4 sm:$0xff]   ;;  %v5280_v16 = vld [vmem:[%s7511_s1 + $0x7ac] ss:$16 sps:$4 sm:$0xff]  }
  0xbb   :  { %3345 = vmatpush1.bf16.msra.mxu0 %v5184_v17  ;;  %3673 = vmatpush1.bf16.msra.mxu1 %v5187_v18  ;;  %v5275_v17 = vld [vmem:[%s7511_s1 + $0x7a0] ss:$16 sps:$4 sm:$0xff]   ;;  %v5278_v18 = vld [vmem:[%s7511_s1 + $0x7a8] ss:$16 sps:$4 sm:$0xff]  }
  0xbc   :  { %3346 = vmatprep.subr.bf16.mxu0 %v5192_v19  ;;  %3674 = vmatprep.subr.bf16.mxu1 %v5195_v20  ;;  %v5283_v19 = vld [vmem:[%s7511_s1 + $0x7c4] ss:$16 sps:$4 sm:$0xff]   ;;  %v5286_v20 = vld [vmem:[%s7511_s1 + $0x7cc] ss:$16 sps:$4 sm:$0xff]  }
  0xbf   :  { %3347 = vmatpush1.bf16.msra.mxu0 %v5190_v21  ;;  %3675 = vmatpush1.bf16.msra.mxu1 %v5193_v22  ;;  %v6559_v21 = vld [vmem:[%s7510_s0 + $0x8] sm:$0xff]  ;;  %v5281_v22 = vld [vmem:[%s7511_s1 + $0x7c0] ss:$16 sps:$4 sm:$0xff]  }
  0xc0   :  { %3357 = vmatprep.subr.bf16.mxu0 %v5199_v23  ;;  %3685 = vmatprep.subr.bf16.mxu1 %v5202_v24  ;;  %v5284_v23 = vld [vmem:[%s7511_s1 + $0x7c8] ss:$16 sps:$4 sm:$0xff]   ;;  %v5289_v24 = vld [vmem:[%s7511_s1 + $0x7e4] ss:$16 sps:$4 sm:$0xff]  }
  0xc2   :  { %3349 = vmatmul.mubr.bf16.vlgmr.msra.gmra.mrb[0].mxu0 %v6385_v26  ;;  %3677 = vmatmul.mubr.bf16.vlgmr.msra.gmra.mrb[0].mxu1 %v6385_v26 }
  0xc3   :  { %3358 = vmatpush1.bf16.msra.mxu0 %v5197_v13  ;;  %3686 = vmatpush1.bf16.msra.mxu1 %v5200_v27  ;;  %v5292_v13 = vld [vmem:[%s7511_s1 + $0x7ec] ss:$16 sps:$4 sm:$0xff]   ;;  %v6575_v27 = vrot.slane %v6559_v21, %v5901_v49 }
  0xc4   :  { %3359 = vmatprep.subr.bf16.mxu0 %v5205_v28  ;;  %3687 = vmatprep.subr.bf16.mxu1 %v5208_v29  ;;  %v5287_v28 = vld [vmem:[%s7511_s1 + $0x7e0] ss:$16 sps:$4 sm:$0xff]   ;;  %v5290_v29 = vld [vmem:[%s7511_s1 + $0x7e8] ss:$16 sps:$4 sm:$0xff]  }
  0xc5   :  { %3389 = vmatprep.mubr.bf16.mxu0 %v608_v14  ;;  %3717 = vmatprep.mubr.bf16.mxu1 %v608_v14  ;;  %v5295_v14 = vld [vmem:[%s7511_s1 + $0x804] ss:$16 sps:$4 sm:$0xff]  }
  0xc7   :  { %3360 = vmatpush1.bf16.msra.mxu0 %v5203_v30  ;;  %3688 = vmatpush1.bf16.msra.mxu1 %v5206_v31  ;;  %v5298_v30 = vld [vmem:[%s7511_s1 + $0x80c] ss:$16 sps:$4 sm:$0xff]   ;;  %v624_v31 = vcombine.high %v6575_v27, %v6575_v27 }
  0xc8   :  { %3361 = vmatprep.subr.bf16.mxu0 %v5211_v25  ;;  %3689 = vmatprep.subr.bf16.mxu1 %v5214_v32  ;;  %v606_v25 = vcombine.high %v6385_v26, %v6385_v26  ;;  %v5293_v32 = vld [vmem:[%s7511_s1 + $0x800] ss:$16 sps:$4 sm:$0xff]   ;;  %v5304_v26 = vld [vmem:[%s7511_s1 + $0x82c] ss:$16 sps:$4 sm:$0xff]  }
  0xcb   :  { %3362 = vmatpush1.bf16.msra.mxu0 %v5209_v33  ;;  %3690 = vmatpush1.bf16.msra.mxu1 %v5212_v34  ;;  %v5296_v33 = vld [vmem:[%s7511_s1 + $0x808] ss:$16 sps:$4 sm:$0xff]   ;;  %v5301_v34 = vld [vmem:[%s7511_s1 + $0x824] ss:$16 sps:$4 sm:$0xff]  }
  0xcc   :  { %3363 = vmatprep.subr.bf16.mxu0 %v5217_v35  ;;  %3691 = vmatprep.subr.bf16.mxu1 %v5220_v36  ;;  %v6606_v35 = vrot.slane %v624_v31, %v5901_v49  ;;  %v5299_v36 = vld [vmem:[%s7511_s1 + $0x820] ss:$16 sps:$4 sm:$0xff]   ;;  %v5380_v31 = vld [vmem:[%s7511_s1 + $0x9c8] ss:$16 sps:$4 sm:$0xff]  }
  0xcf   :  { %3364 = vmatpush1.bf16.msra.mxu0 %v5215_v37  ;;  %3692 = vmatpush1.bf16.msra.mxu1 %v5218_v38  ;;  %v5302_v37 = vld [vmem:[%s7511_s1 + $0x828] ss:$16 sps:$4 sm:$0xff]   ;;  %v5307_v38 = vld [vmem:[%s7511_s1 + $0x844] ss:$16 sps:$4 sm:$0xff]  }
  0xd0   :  { %3365 = vmatprep.subr.bf16.mxu0 %v5223_v39  ;;  %3693 = vmatprep.subr.bf16.mxu1 %v5226_v40  ;;  %v5310_v39 = vld [vmem:[%s7511_s1 + $0x84c] ss:$16 sps:$4 sm:$0xff]   ;;  %v5305_v40 = vld [vmem:[%s7511_s1 + $0x840] ss:$16 sps:$4 sm:$0xff]  }
  0xd3   :  { %3366 = vmatpush1.bf16.msra.mxu0 %v5221_v41  ;;  %3694 = vmatpush1.bf16.msra.mxu1 %v5224_v43  ;;  %v5308_v41 = vld [vmem:[%s7511_s1 + $0x848] ss:$16 sps:$4 sm:$0xff]   ;;  %v5313_v43 = vld [vmem:[%s7511_s1 + $0x864] ss:$16 sps:$4 sm:$0xff]  }
  0xd4   :  { %3367 = vmatprep.subr.bf16.mxu0 %v5229_v44  ;;  %3695 = vmatprep.subr.bf16.mxu1 %v5232_v45  ;;  %v5316_v44 = vld [vmem:[%s7511_s1 + $0x86c] ss:$16 sps:$4 sm:$0xff]   ;;  %v5311_v45 = vld [vmem:[%s7511_s1 + $0x860] ss:$16 sps:$4 sm:$0xff]  }
  0xd7   :  { %3368 = vmatpush1.bf16.msra.mxu0 %v5227_v46  ;;  %3696 = vmatpush1.bf16.msra.mxu1 %v5230_v47  ;;  %v5314_v46 = vld [vmem:[%s7511_s1 + $0x868] ss:$16 sps:$4 sm:$0xff]   ;;  %v5319_v47 = vld [vmem:[%s7511_s1 + $0x884] ss:$16 sps:$4 sm:$0xff]  }
  0xd8   :  { %3369 = vmatprep.subr.bf16.mxu0 %v5235_v48  ;;  %3697 = vmatprep.subr.bf16.mxu1 %v5238_v50  ;;  %v5322_v48 = vld [vmem:[%s7511_s1 + $0x88c] ss:$16 sps:$4 sm:$0xff]   ;;  %v5317_v50 = vld [vmem:[%s7511_s1 + $0x880] ss:$16 sps:$4 sm:$0xff]  }
  0xdb   :  { %3370 = vmatpush1.bf16.msra.mxu0 %v5233_v51  ;;  %3698 = vmatpush1.bf16.msra.mxu1 %v5236_v53  ;;  %v5320_v51 = vld [vmem:[%s7511_s1 + $0x888] ss:$16 sps:$4 sm:$0xff]   ;;  %v5325_v53 = vld [vmem:[%s7511_s1 + $0x8a4] ss:$16 sps:$4 sm:$0xff]  }
  0xdc   :  { %3371 = vmatprep.subr.bf16.mxu0 %v5241_v54  ;;  %3699 = vmatprep.subr.bf16.mxu1 %v5244_v55  ;;  %v5328_v54 = vld [vmem:[%s7511_s1 + $0x8ac] ss:$16 sps:$4 sm:$0xff]   ;;  %v5323_v55 = vld [vmem:[%s7511_s1 + $0x8a0] ss:$16 sps:$4 sm:$0xff]  }
  0xdf   :  { %3372 = vmatpush1.bf16.msra.mxu0 %v5239_v56  ;;  %3700 = vmatpush1.bf16.msra.mxu1 %v5242_v57  ;;  %v5326_v56 = vld [vmem:[%s7511_s1 + $0x8a8] ss:$16 sps:$4 sm:$0xff]   ;;  %v5331_v57 = vld [vmem:[%s7511_s1 + $0x8c4] ss:$16 sps:$4 sm:$0xff]  }
  0xe0   :  { %3373 = vmatprep.subr.bf16.mxu0 %v5247_v58  ;;  %3701 = vmatprep.subr.bf16.mxu1 %v5250_v59  ;;  %v5334_v58 = vld [vmem:[%s7511_s1 + $0x8cc] ss:$16 sps:$4 sm:$0xff]   ;;  %v5329_v59 = vld [vmem:[%s7511_s1 + $0x8c0] ss:$16 sps:$4 sm:$0xff]  }
  0xe3   :  { %3374 = vmatpush1.bf16.msra.mxu0 %v5245_v60  ;;  %3702 = vmatpush1.bf16.msra.mxu1 %v5248_v61  ;;  %v5332_v60 = vld [vmem:[%s7511_s1 + $0x8c8] ss:$16 sps:$4 sm:$0xff]   ;;  %v5337_v61 = vld [vmem:[%s7511_s1 + $0x8e4] ss:$16 sps:$4 sm:$0xff]  }
  0xe4   :  { %3375 = vmatprep.subr.bf16.mxu0 %v5253_v62  ;;  %3703 = vmatprep.subr.bf16.mxu1 %v5256_v63  ;;  %v5340_v62 = vld [vmem:[%s7511_s1 + $0x8ec] ss:$16 sps:$4 sm:$0xff]   ;;  %v5335_v63 = vld [vmem:[%s7511_s1 + $0x8e0] ss:$16 sps:$4 sm:$0xff]  }
  0xe7   :  { %3376 = vmatpush1.bf16.msra.mxu0 %v5251_v0  ;;  %3704 = vmatpush1.bf16.msra.mxu1 %v5254_v1  ;;  %v5338_v0 = vld [vmem:[%s7511_s1 + $0x8e8] ss:$16 sps:$4 sm:$0xff]   ;;  %v5343_v1 = vld [vmem:[%s7511_s1 + $0x904] ss:$16 sps:$4 sm:$0xff]  }
  0xe8   :  { %3377 = vmatprep.subr.bf16.mxu0 %v5259_v2  ;;  %3705 = vmatprep.subr.bf16.mxu1 %v5262_v3  ;;  %v5346_v2 = vld [vmem:[%s7511_s1 + $0x90c] ss:$16 sps:$4 sm:$0xff]   ;;  %v5341_v3 = vld [vmem:[%s7511_s1 + $0x900] ss:$16 sps:$4 sm:$0xff]  }
  0xeb   :  { %3378 = vmatpush1.bf16.msra.mxu0 %v5257_v4  ;;  %3706 = vmatpush1.bf16.msra.mxu1 %v5260_v5  ;;  %v5344_v4 = vld [vmem:[%s7511_s1 + $0x908] ss:$16 sps:$4 sm:$0xff]   ;;  %v5349_v5 = vld [vmem:[%s7511_s1 + $0x924] ss:$16 sps:$4 sm:$0xff]  }
  0xec   :  { %3379 = vmatprep.subr.bf16.mxu0 %v5265_v6  ;;  %3707 = vmatprep.subr.bf16.mxu1 %v5268_v7  ;;  %v5352_v6 = vld [vmem:[%s7511_s1 + $0x92c] ss:$16 sps:$4 sm:$0xff]   ;;  %v5347_v7 = vld [vmem:[%s7511_s1 + $0x920] ss:$16 sps:$4 sm:$0xff]  }
  0xef   :  { %3380 = vmatpush1.bf16.msra.mxu0 %v5263_v8  ;;  %3708 = vmatpush1.bf16.msra.mxu1 %v5266_v9  ;;  %v5350_v8 = vld [vmem:[%s7511_s1 + $0x928] ss:$16 sps:$4 sm:$0xff]   ;;  %v5355_v9 = vld [vmem:[%s7511_s1 + $0x944] ss:$16 sps:$4 sm:$0xff]  }
  0xf0   :  { %3381 = vmatprep.subr.bf16.mxu0 %v5271_v10  ;;  %3709 = vmatprep.subr.bf16.mxu1 %v5274_v11  ;;  %v5358_v10 = vld [vmem:[%s7511_s1 + $0x94c] ss:$16 sps:$4 sm:$0xff]   ;;  %v5353_v11 = vld [vmem:[%s7511_s1 + $0x940] ss:$16 sps:$4 sm:$0xff]  }
  0xf3   :  { %3382 = vmatpush1.bf16.msra.mxu0 %v5269_v12  ;;  %3710 = vmatpush1.bf16.msra.mxu1 %v5272_v52  ;;  %v5356_v12 = vld [vmem:[%s7511_s1 + $0x948] ss:$16 sps:$4 sm:$0xff]   ;;  %v5361_v52 = vld [vmem:[%s7511_s1 + $0x964] ss:$16 sps:$4 sm:$0xff]  }
  0xf4   :  { %3383 = vmatprep.subr.bf16.mxu0 %v5277_v15  ;;  %3711 = vmatprep.subr.bf16.mxu1 %v5280_v16  ;;  %v5364_v15 = vld [vmem:[%s7511_s1 + $0x96c] ss:$16 sps:$4 sm:$0xff]   ;;  %v5359_v16 = vld [vmem:[%s7511_s1 + $0x960] ss:$16 sps:$4 sm:$0xff]  }
  0xf7   :  { %3384 = vmatpush1.bf16.msra.mxu0 %v5275_v17  ;;  %3712 = vmatpush1.bf16.msra.mxu1 %v5278_v18  ;;  %v5362_v17 = vld [vmem:[%s7511_s1 + $0x968] ss:$16 sps:$4 sm:$0xff]   ;;  %v5367_v18 = vld [vmem:[%s7511_s1 + $0x984] ss:$16 sps:$4 sm:$0xff]  }
  0xf8   :  { %3385 = vmatprep.subr.bf16.mxu0 %v5283_v19  ;;  %3713 = vmatprep.subr.bf16.mxu1 %v5286_v20  ;;  %v5370_v19 = vld [vmem:[%s7511_s1 + $0x98c] ss:$16 sps:$4 sm:$0xff]   ;;  %v5365_v20 = vld [vmem:[%s7511_s1 + $0x980] ss:$16 sps:$4 sm:$0xff]  }
  0xfb   :  { %3386 = vmatpush1.bf16.msra.mxu0 %v5281_v22  ;;  %3714 = vmatpush1.bf16.msra.mxu1 %v5284_v23  ;;  %v5368_v22 = vld [vmem:[%s7511_s1 + $0x988] ss:$16 sps:$4 sm:$0xff]   ;;  %v5373_v23 = vld [vmem:[%s7511_s1 + $0x9a4] ss:$16 sps:$4 sm:$0xff]  }
  0xfc   :  { %3387 = vmatprep.subr.bf16.mxu0 %v5289_v24  ;;  %3715 = vmatprep.subr.bf16.mxu1 %v5292_v13  ;;  %v5376_v24 = vld [vmem:[%s7511_s1 + $0x9ac] ss:$16 sps:$4 sm:$0xff]   ;;  %v5371_v13 = vld [vmem:[%s7511_s1 + $0x9a0] ss:$16 sps:$4 sm:$0xff]  }
  0xff   :  { %3388 = vmatpush1.bf16.msra.mxu0 %v5287_v28  ;;  %3716 = vmatpush1.bf16.msra.mxu1 %v5290_v29  ;;  %v5374_v28 = vld [vmem:[%s7511_s1 + $0x9a8] ss:$16 sps:$4 sm:$0xff]   ;;  %v5379_v29 = vld [vmem:[%s7511_s1 + $0x9c4] ss:$16 sps:$4 sm:$0xff]  }
 0x100   :  { %3398 = vmatprep.subr.bf16.mxu0 %v5295_v14  ;;  %3726 = vmatprep.subr.bf16.mxu1 %v5298_v30  ;;  %v5382_v14 = vld [vmem:[%s7511_s1 + $0x9cc] ss:$16 sps:$4 sm:$0xff]   ;;  %v5377_v30 = vld [vmem:[%s7511_s1 + $0x9c0] ss:$16 sps:$4 sm:$0xff]  }
 0x102   :  { %3390 = vmatmul.mubr.bf16.vlgmr.msra.gmra.mrb[0].mxu0 %v606_v25  ;;  %3718 = vmatmul.mubr.bf16.vlgmr.msra.gmra.mrb[0].mxu1 %v606_v25  ;;  %v5385_v25 = vld [vmem:[%s7511_s1 + $0x9e4] ss:$16 sps:$4 sm:$0xff]  }
 0x103   :  { %3399 = vmatpush1.bf16.msra.mxu0 %v5293_v32  ;;  %3727 = vmatpush1.bf16.msra.mxu1 %v5296_v33  ;;  %v5388_v32 = vld [vmem:[%s7511_s1 + $0x9ec] ss:$16 sps:$4 sm:$0xff]   ;;  %v5383_v33 = vld [vmem:[%s7511_s1 + $0x9e0] ss:$16 sps:$4 sm:$0xff]  }
 0x104   :  { %3400 = vmatprep.subr.bf16.mxu0 %v5301_v34  ;;  %3728 = vmatprep.subr.bf16.mxu1 %v5304_v26  ;;  %v5386_v34 = vld [vmem:[%s7511_s1 + $0x9e8] ss:$16 sps:$4 sm:$0xff]   ;;  %v5391_v26 = vld [vmem:[%s7511_s1 + $0xa04] ss:$16 sps:$4 sm:$0xff]  }
 0x105   :  { %3430 = vmatprep.mubr.bf16.mxu0 %v6606_v35  ;;  %3758 = vmatprep.mubr.bf16.mxu1 %v6606_v35 }
 0x107   :  { %3401 = vmatpush1.bf16.msra.mxu0 %v5299_v36  ;;  %3729 = vmatpush1.bf16.msra.mxu1 %v5302_v37  ;;  %v5394_v36 = vld [vmem:[%s7511_s1 + $0xa0c] ss:$16 sps:$4 sm:$0xff]   ;;  %v6792_v37 = vrot.slane %v6575_v27, %v5901_v49 }
 0x108   :  { %3402 = vmatprep.subr.bf16.mxu0 %v5307_v38  ;;  %3730 = vmatprep.subr.bf16.mxu1 %v5310_v39  ;;  %v5389_v38 = vld [vmem:[%s7511_s1 + $0xa00] ss:$16 sps:$4 sm:$0xff]   ;;  %v5392_v39 = vld [vmem:[%s7511_s1 + $0xa08] ss:$16 sps:$4 sm:$0xff]   ;;  %v5400_v27 = vld [vmem:[%s7511_s1 + $0xa2c] ss:$16 sps:$4 sm:$0xff]  }
 0x10b   :  { %3403 = vmatpush1.bf16.msra.mxu0 %v5305_v40  ;;  %3731 = vmatpush1.bf16.msra.mxu1 %v5308_v41  ;;  %v5397_v40 = vld [vmem:[%s7511_s1 + $0xa24] ss:$16 sps:$4 sm:$0xff]   ;;  %v656_v41 = vcombine.high %v6606_v35, %v6606_v35 }
 0x10c   :  { %3404 = vmatprep.subr.bf16.mxu0 %v5313_v43  ;;  %3732 = vmatprep.subr.bf16.mxu1 %v5316_v44  ;;  %v5395_v43 = vld [vmem:[%s7511_s1 + $0xa20] ss:$16 sps:$4 sm:$0xff]   ;;  %v5398_v44 = vld [vmem:[%s7511_s1 + $0xa28] ss:$16 sps:$4 sm:$0xff]   ;;  %v5403_v35 = vld [vmem:[%s7511_s1 + $0xa44] ss:$16 sps:$4 sm:$0xff]  }
 0x10f   :  { %3405 = vmatpush1.bf16.msra.mxu0 %v5311_v45  ;;  %3733 = vmatpush1.bf16.msra.mxu1 %v5314_v46  ;;  %v5406_v45 = vld [vmem:[%s7511_s1 + $0xa4c] ss:$16 sps:$4 sm:$0xff]   ;;  %v5401_v46 = vld [vmem:[%s7511_s1 + $0xa40] ss:$16 sps:$4 sm:$0xff]  }
 0x110   :  { %3406 = vmatprep.subr.bf16.mxu0 %v5319_v47  ;;  %3734 = vmatprep.subr.bf16.mxu1 %v5322_v48  ;;  %v5404_v47 = vld [vmem:[%s7511_s1 + $0xa48] ss:$16 sps:$4 sm:$0xff]   ;;  %v5409_v48 = vld [vmem:[%s7511_s1 + $0xa64] ss:$16 sps:$4 sm:$0xff]  }
 0x113   :  { %3407 = vmatpush1.bf16.msra.mxu0 %v5317_v50  ;;  %3735 = vmatpush1.bf16.msra.mxu1 %v5320_v51  ;;  %v5412_v50 = vld [vmem:[%s7511_s1 + $0xa6c] ss:$16 sps:$4 sm:$0xff]   ;;  %v5407_v51 = vld [vmem:[%s7511_s1 + $0xa60] ss:$16 sps:$4 sm:$0xff]  }
 0x114   :  { %3408 = vmatprep.subr.bf16.mxu0 %v5325_v53  ;;  %3736 = vmatprep.subr.bf16.mxu1 %v5328_v54  ;;  %v5410_v53 = vld [vmem:[%s7511_s1 + $0xa68] ss:$16 sps:$4 sm:$0xff]   ;;  %v5415_v54 = vld [vmem:[%s7511_s1 + $0xa84] ss:$16 sps:$4 sm:$0xff]  }
 0x117   :  { %3409 = vmatpush1.bf16.msra.mxu0 %v5323_v55  ;;  %3737 = vmatpush1.bf16.msra.mxu1 %v5326_v56  ;;  %v5418_v55 = vld [vmem:[%s7511_s1 + $0xa8c] ss:$16 sps:$4 sm:$0xff]   ;;  %v5413_v56 = vld [vmem:[%s7511_s1 + $0xa80] ss:$16 sps:$4 sm:$0xff]  }
 0x118   :  { %3410 = vmatprep.subr.bf16.mxu0 %v5331_v57  ;;  %3738 = vmatprep.subr.bf16.mxu1 %v5334_v58  ;;  %v5416_v57 = vld [vmem:[%s7511_s1 + $0xa88] ss:$16 sps:$4 sm:$0xff]   ;;  %v5421_v58 = vld [vmem:[%s7511_s1 + $0xaa4] ss:$16 sps:$4 sm:$0xff]  }
 0x11b   :  { %3411 = vmatpush1.bf16.msra.mxu0 %v5329_v59  ;;  %3739 = vmatpush1.bf16.msra.mxu1 %v5332_v60  ;;  %v5424_v59 = vld [vmem:[%s7511_s1 + $0xaac] ss:$16 sps:$4 sm:$0xff]   ;;  %v5419_v60 = vld [vmem:[%s7511_s1 + $0xaa0] ss:$16 sps:$4 sm:$0xff]  }
 0x11c   :  { %3412 = vmatprep.subr.bf16.mxu0 %v5337_v61  ;;  %3740 = vmatprep.subr.bf16.mxu1 %v5340_v62  ;;  %v5422_v61 = vld [vmem:[%s7511_s1 + $0xaa8] ss:$16 sps:$4 sm:$0xff]   ;;  %v5427_v62 = vld [vmem:[%s7511_s1 + $0xac4] ss:$16 sps:$4 sm:$0xff]  }
 0x11f   :  { %3413 = vmatpush1.bf16.msra.mxu0 %v5335_v63  ;;  %3741 = vmatpush1.bf16.msra.mxu1 %v5338_v0  ;;  %v5430_v63 = vld [vmem:[%s7511_s1 + $0xacc] ss:$16 sps:$4 sm:$0xff]   ;;  %v5425_v0 = vld [vmem:[%s7511_s1 + $0xac0] ss:$16 sps:$4 sm:$0xff]  }
 0x120   :  { %3414 = vmatprep.subr.bf16.mxu0 %v5343_v1  ;;  %3742 = vmatprep.subr.bf16.mxu1 %v5346_v2  ;;  %v5428_v1 = vld [vmem:[%s7511_s1 + $0xac8] ss:$16 sps:$4 sm:$0xff]   ;;  %v5433_v2 = vld [vmem:[%s7511_s1 + $0xae4] ss:$16 sps:$4 sm:$0xff]  }
 0x123   :  { %3415 = vmatpush1.bf16.msra.mxu0 %v5341_v3  ;;  %3743 = vmatpush1.bf16.msra.mxu1 %v5344_v4  ;;  %v5436_v3 = vld [vmem:[%s7511_s1 + $0xaec] ss:$16 sps:$4 sm:$0xff]   ;;  %v5431_v4 = vld [vmem:[%s7511_s1 + $0xae0] ss:$16 sps:$4 sm:$0xff]  }
 0x124   :  { %3416 = vmatprep.subr.bf16.mxu0 %v5349_v5  ;;  %3744 = vmatprep.subr.bf16.mxu1 %v5352_v6  ;;  %v5434_v5 = vld [vmem:[%s7511_s1 + $0xae8] ss:$16 sps:$4 sm:$0xff]   ;;  %v5439_v6 = vld [vmem:[%s7511_s1 + $0xb04] ss:$16 sps:$4 sm:$0xff]  }
 0x127   :  { %3417 = vmatpush1.bf16.msra.mxu0 %v5347_v7  ;;  %3745 = vmatpush1.bf16.msra.mxu1 %v5350_v8  ;;  %v5442_v7 = vld [vmem:[%s7511_s1 + $0xb0c] ss:$16 sps:$4 sm:$0xff]   ;;  %v5437_v8 = vld [vmem:[%s7511_s1 + $0xb00] ss:$16 sps:$4 sm:$0xff]  }
 0x128   :  { %3418 = vmatprep.subr.bf16.mxu0 %v5355_v9  ;;  %3746 = vmatprep.subr.bf16.mxu1 %v5358_v10  ;;  %v5440_v9 = vld [vmem:[%s7511_s1 + $0xb08] ss:$16 sps:$4 sm:$0xff]   ;;  %v5445_v10 = vld [vmem:[%s7511_s1 + $0xb24] ss:$16 sps:$4 sm:$0xff]  }
 0x12b   :  { %3419 = vmatpush1.bf16.msra.mxu0 %v5353_v11  ;;  %3747 = vmatpush1.bf16.msra.mxu1 %v5356_v12  ;;  %v5448_v11 = vld [vmem:[%s7511_s1 + $0xb2c] ss:$16 sps:$4 sm:$0xff]  }
 0x12c   :  { %3420 = vmatprep.subr.bf16.mxu0 %v5361_v52  ;;  %3748 = vmatprep.subr.bf16.mxu1 %v5364_v15 }
 0x12f   :  { %3421 = vmatpush1.bf16.msra.mxu0 %v5359_v16  ;;  %3749 = vmatpush1.bf16.msra.mxu1 %v5362_v17 }
 0x130   :  { %3422 = vmatprep.subr.bf16.mxu0 %v5367_v18  ;;  %3750 = vmatprep.subr.bf16.mxu1 %v5370_v19 }
 0x133   :  { %3423 = vmatpush1.bf16.msra.mxu0 %v5365_v20  ;;  %3751 = vmatpush1.bf16.msra.mxu1 %v5368_v22 }
 0x134   :  { %3424 = vmatprep.subr.bf16.mxu0 %v5373_v23  ;;  %3752 = vmatprep.subr.bf16.mxu1 %v5376_v24 }
 0x137   :  { %3425 = vmatpush1.bf16.msra.mxu0 %v5371_v13  ;;  %3753 = vmatpush1.bf16.msra.mxu1 %v5374_v28 }
 0x138   :  { %3426 = vmatprep.subr.bf16.mxu0 %v5379_v29  ;;  %3754 = vmatprep.subr.bf16.mxu1 %v5382_v14 }
 0x13b   :  { %3427 = vmatpush1.bf16.msra.mxu0 %v5377_v30  ;;  %3755 = vmatpush1.bf16.msra.mxu1 %v5380_v31 }
 0x13c   :  { %3428 = vmatprep.subr.bf16.mxu0 %v5385_v25  ;;  %3756 = vmatprep.subr.bf16.mxu1 %v5388_v32 }
 0x13f   :  { %3429 = vmatpush1.bf16.msra.mxu0 %v5383_v33  ;;  %3757 = vmatpush1.bf16.msra.mxu1 %v5386_v34 }
 0x140   :  { %3439 = vmatprep.subr.bf16.mxu0 %v5391_v26  ;;  %3767 = vmatprep.subr.bf16.mxu1 %v5394_v36 }
 0x142   :  { %3431 = vmatmul.mubr.bf16.vlgmr.msra.gmra.mrb[0].mxu0 %v6792_v37  ;;  %3759 = vmatmul.mubr.bf16.vlgmr.msra.gmra.mrb[0].mxu1 %v6792_v37 }
 0x143   :  { %3440 = vmatpush1.bf16.msra.mxu0 %v5389_v38  ;;  %3768 = vmatpush1.bf16.msra.mxu1 %v5392_v39 }
 0x144   :  { %3441 = vmatprep.subr.bf16.mxu0 %v5397_v40  ;;  %3769 = vmatprep.subr.bf16.mxu1 %v5400_v27 }
 0x145   :  { %3471 = vmatprep.mubr.bf16.mxu0 %v656_v41  ;;  %3799 = vmatprep.mubr.bf16.mxu1 %v656_v41 }
 0x147   :  { %3442 = vmatpush1.bf16.msra.mxu0 %v5395_v43  ;;  %3770 = vmatpush1.bf16.msra.mxu1 %v5398_v44 }
 0x148   :  { %3443 = vmatprep.subr.bf16.mxu0 %v5403_v35  ;;  %3771 = vmatprep.subr.bf16.mxu1 %v5406_v45 }
 0x14b   :  { %3444 = vmatpush1.bf16.msra.mxu0 %v5401_v46  ;;  %3772 = vmatpush1.bf16.msra.mxu1 %v5404_v47 }
 0x14c   :  { %3445 = vmatprep.subr.bf16.mxu0 %v5409_v48  ;;  %3773 = vmatprep.subr.bf16.mxu1 %v5412_v50 }
 0x14f   :  { %3446 = vmatpush1.bf16.msra.mxu0 %v5407_v51  ;;  %3774 = vmatpush1.bf16.msra.mxu1 %v5410_v53 }
 0x150   :  { %3447 = vmatprep.subr.bf16.mxu0 %v5415_v54  ;;  %3775 = vmatprep.subr.bf16.mxu1 %v5418_v55 }
 0x153   :  { %3448 = vmatpush1.bf16.msra.mxu0 %v5413_v56  ;;  %3776 = vmatpush1.bf16.msra.mxu1 %v5416_v57 }
 0x154   :  { %3449 = vmatprep.subr.bf16.mxu0 %v5421_v58  ;;  %3777 = vmatprep.subr.bf16.mxu1 %v5424_v59 }
 0x157   :  { %3450 = vmatpush1.bf16.msra.mxu0 %v5419_v60  ;;  %3778 = vmatpush1.bf16.msra.mxu1 %v5422_v61 }
 0x158   :  { %3451 = vmatprep.subr.bf16.mxu0 %v5427_v62  ;;  %3779 = vmatprep.subr.bf16.mxu1 %v5430_v63 }
 0x15b   :  { %3452 = vmatpush1.bf16.msra.mxu0 %v5425_v0  ;;  %3780 = vmatpush1.bf16.msra.mxu1 %v5428_v1 }
 0x15c   :  { %3453 = vmatprep.subr.bf16.mxu0 %v5433_v2  ;;  %3781 = vmatprep.subr.bf16.mxu1 %v5436_v3 }
 0x15f   :  { %3454 = vmatpush1.bf16.msra.mxu0 %v5431_v4  ;;  %3782 = vmatpush1.bf16.msra.mxu1 %v5434_v5 }
 0x160   :  { %3455 = vmatprep.subr.bf16.mxu0 %v5439_v6  ;;  %3783 = vmatprep.subr.bf16.mxu1 %v5442_v7 }
 0x161   :  { %10 = vsyncpa [#allocation3], 0  ;;  %v5443_v12 = vld [vmem:[%s7511_s1 + $0xb20] ss:$16 sps:$4 sm:$0xff]   ;;  %v5446_v52 = vld [vmem:[%s7511_s1 + $0xb28] ss:$16 sps:$4 sm:$0xff]   ;;  %v609_v34 = vcombine.high %v6559_v21, %v6559_v21  ;;  %v654_v35 = vcombine.high %v6792_v37, %v6792_v37 }
 0x162   :  { %v5451_v15 = vld [vmem:[%s7511_s1 + $0xb44] ss:$16 sps:$4 sm:$0xff]   ;;  %v5454_v16 = vld [vmem:[%s7511_s1 + $0xb4c] ss:$16 sps:$4 sm:$0xff]   ;;  %v5449_v17 = vld [vmem:[%s7511_s1 + $0xb40] ss:$16 sps:$4 sm:$0xff]  }
 0x163   :  { %3456 = vmatpush1.bf16.msra.mxu0 %v5437_v8  ;;  %3784 = vmatpush1.bf16.msra.mxu1 %v5440_v9  ;;  %v5452_v18 = vld [vmem:[%s7511_s1 + $0xb48] ss:$16 sps:$4 sm:$0xff]   ;;  %v5457_v19 = vld [vmem:[%s7511_s1 + $0xb64] ss:$16 sps:$4 sm:$0xff]   ;;  %v5460_v20 = vld [vmem:[%s7511_s1 + $0xb6c] ss:$16 sps:$4 sm:$0xff]   ;;  %v6981_v39 = vrot.slane %v609_v34, %v5901_v49 }
 0x164   :  { %3457 = vmatprep.subr.bf16.mxu0 %v5445_v10  ;;  %3785 = vmatprep.subr.bf16.mxu1 %v5448_v11  ;;  %v5455_v22 = vld [vmem:[%s7511_s1 + $0xb60] ss:$16 sps:$4 sm:$0xff]   ;;  %v5458_v23 = vld [vmem:[%s7511_s1 + $0xb68] ss:$16 sps:$4 sm:$0xff]   ;;  %v5463_v24 = vld [vmem:[%s7511_s1 + $0xb84] ss:$16 sps:$4 sm:$0xff]  }
 0x165   :  { %v5466_v13 = vld [vmem:[%s7511_s1 + $0xb8c] ss:$16 sps:$4 sm:$0xff]   ;;  %v5461_v28 = vld [vmem:[%s7511_s1 + $0xb80] ss:$16 sps:$4 sm:$0xff]   ;;  %v5464_v29 = vld [vmem:[%s7511_s1 + $0xb88] ss:$16 sps:$4 sm:$0xff]   ;;  %v625_v44 = vcombine.high %v6981_v39, %v6981_v39 }
 0x166   :  { %v5469_v14 = vld [vmem:[%s7511_s1 + $0xba4] ss:$16 sps:$4 sm:$0xff]   ;;  %v5472_v30 = vld [vmem:[%s7511_s1 + $0xbac] ss:$16 sps:$4 sm:$0xff]   ;;  %v5467_v31 = vld [vmem:[%s7511_s1 + $0xba0] ss:$16 sps:$4 sm:$0xff]  }
 0x167   :  { %3458 = vmatpush1.bf16.msra.mxu0 %v5443_v12  ;;  %3786 = vmatpush1.bf16.msra.mxu1 %v5446_v52  ;;  %v5470_v25 = vld [vmem:[%s7511_s1 + $0xba8] ss:$16 sps:$4 sm:$0xff]   ;;  %v5475_v32 = vld [vmem:[%s7511_s1 + $0xbc4] ss:$16 sps:$4 sm:$0xff]   ;;  %v5478_v33 = vld [vmem:[%s7511_s1 + $0xbcc] ss:$16 sps:$4 sm:$0xff]   ;;  %v7012_v48 = vrot.slane %v625_v44, %v5901_v49 }
 0x168   :  { %3459 = vmatprep.subr.bf16.mxu0 %v5451_v15  ;;  %3787 = vmatprep.subr.bf16.mxu1 %v5454_v16  ;;  %v5473_v26 = vld [vmem:[%s7511_s1 + $0xbc0] ss:$16 sps:$4 sm:$0xff]   ;;  %v5476_v36 = vld [vmem:[%s7511_s1 + $0xbc8] ss:$16 sps:$4 sm:$0xff]   ;;  %v5481_v38 = vld [vmem:[%s7511_s1 + $0xbe4] ss:$16 sps:$4 sm:$0xff]  }
 0x169   :  { %v5484_v21 = vld [vmem:[%s7511_s1 + $0xbec] ss:$16 sps:$4 sm:$0xff]   ;;  %v5479_v40 = vld [vmem:[%s7511_s1 + $0xbe0] ss:$16 sps:$4 sm:$0xff]   ;;  %v5482_v27 = vld [vmem:[%s7511_s1 + $0xbe8] ss:$16 sps:$4 sm:$0xff]  }
 0x16a   :  { %v5487_v41 = vld [vmem:[%s7511_s1 + $0xc04] ss:$16 sps:$4 sm:$0xff]   ;;  %v5490_v43 = vld [vmem:[%s7511_s1 + $0xc0c] ss:$16 sps:$4 sm:$0xff]   ;;  %v5485_v45 = vld [vmem:[%s7511_s1 + $0xc00] ss:$16 sps:$4 sm:$0xff]  }
 0x16b   :  { %3460 = vmatpush1.bf16.msra.mxu0 %v5449_v17  ;;  %3788 = vmatpush1.bf16.msra.mxu1 %v5452_v18  ;;  %v5488_v46 = vld [vmem:[%s7511_s1 + $0xc08] ss:$16 sps:$4 sm:$0xff]   ;;  %v5493_v47 = vld [vmem:[%s7511_s1 + $0xc24] ss:$16 sps:$4 sm:$0xff]   ;;  %v5496_v37 = vld [vmem:[%s7511_s1 + $0xc2c] ss:$16 sps:$4 sm:$0xff]  }
 0x16c   :  { %3461 = vmatprep.subr.bf16.mxu0 %v5457_v19  ;;  %3789 = vmatprep.subr.bf16.mxu1 %v5460_v20  ;;  %v5491_v50 = vld [vmem:[%s7511_s1 + $0xc20] ss:$16 sps:$4 sm:$0xff]   ;;  %v5494_v51 = vld [vmem:[%s7511_s1 + $0xc28] ss:$16 sps:$4 sm:$0xff]   ;;  %v5499_v53 = vld [vmem:[%s7511_s1 + $0xc44] ss:$16 sps:$4 sm:$0xff]  }
 0x16d   :  { %v5502_v54 = vld [vmem:[%s7511_s1 + $0xc4c] ss:$16 sps:$4 sm:$0xff]   ;;  %v5497_v55 = vld [vmem:[%s7511_s1 + $0xc40] ss:$16 sps:$4 sm:$0xff]   ;;  %v5500_v56 = vld [vmem:[%s7511_s1 + $0xc48] ss:$16 sps:$4 sm:$0xff]  }
 0x16e   :  { %v5505_v57 = vld [vmem:[%s7511_s1 + $0xc64] ss:$16 sps:$4 sm:$0xff]   ;;  %v5508_v58 = vld [vmem:[%s7511_s1 + $0xc6c] ss:$16 sps:$4 sm:$0xff]   ;;  %v5503_v59 = vld [vmem:[%s7511_s1 + $0xc60] ss:$16 sps:$4 sm:$0xff]  }
 0x16f   :  { %3462 = vmatpush1.bf16.msra.mxu0 %v5455_v22  ;;  %3790 = vmatpush1.bf16.msra.mxu1 %v5458_v23  ;;  %v5506_v60 = vld [vmem:[%s7511_s1 + $0xc68] ss:$16 sps:$4 sm:$0xff]   ;;  %v5511_v61 = vld [vmem:[%s7511_s1 + $0xc84] ss:$16 sps:$4 sm:$0xff]   ;;  %v5514_v62 = vld [vmem:[%s7511_s1 + $0xc8c] ss:$16 sps:$4 sm:$0xff]  }
 0x170   :  { %3463 = vmatprep.subr.bf16.mxu0 %v5463_v24  ;;  %3791 = vmatprep.subr.bf16.mxu1 %v5466_v13  ;;  %v5509_v63 = vld [vmem:[%s7511_s1 + $0xc80] ss:$16 sps:$4 sm:$0xff]   ;;  %v5512_v0 = vld [vmem:[%s7511_s1 + $0xc88] ss:$16 sps:$4 sm:$0xff]   ;;  %v5517_v1 = vld [vmem:[%s7511_s1 + $0xca4] ss:$16 sps:$4 sm:$0xff]  }
 0x171   :  { %v5520_v2 = vld [vmem:[%s7511_s1 + $0xcac] ss:$16 sps:$4 sm:$0xff]   ;;  %v5515_v3 = vld [vmem:[%s7511_s1 + $0xca0] ss:$16 sps:$4 sm:$0xff]   ;;  %v5518_v4 = vld [vmem:[%s7511_s1 + $0xca8] ss:$16 sps:$4 sm:$0xff]  }
 0x172   :  { %v5523_v5 = vld [vmem:[%s7511_s1 + $0xcc4] ss:$16 sps:$4 sm:$0xff]   ;;  %v5526_v6 = vld [vmem:[%s7511_s1 + $0xccc] ss:$16 sps:$4 sm:$0xff]   ;;  %v5521_v7 = vld [vmem:[%s7511_s1 + $0xcc0] ss:$16 sps:$4 sm:$0xff]  }
 0x173   :  { %3464 = vmatpush1.bf16.msra.mxu0 %v5461_v28  ;;  %3792 = vmatpush1.bf16.msra.mxu1 %v5464_v29  ;;  %v5524_v8 = vld [vmem:[%s7511_s1 + $0xcc8] ss:$16 sps:$4 sm:$0xff]   ;;  %v5529_v9 = vld [vmem:[%s7511_s1 + $0xce4] ss:$16 sps:$4 sm:$0xff]   ;;  %v5532_v10 = vld [vmem:[%s7511_s1 + $0xcec] ss:$16 sps:$4 sm:$0xff]  }
 0x174   :  { %3465 = vmatprep.subr.bf16.mxu0 %v5469_v14  ;;  %3793 = vmatprep.subr.bf16.mxu1 %v5472_v30  ;;  %v5527_v11 = vld [vmem:[%s7511_s1 + $0xce0] ss:$16 sps:$4 sm:$0xff]   ;;  %v5530_v12 = vld [vmem:[%s7511_s1 + $0xce8] ss:$16 sps:$4 sm:$0xff]   ;;  %v5535_v52 = vld [vmem:[%s7511_s1 + $0xd04] ss:$16 sps:$4 sm:$0xff]  }
 0x175   :  { %v5538_v15 = vld [vmem:[%s7511_s1 + $0xd0c] ss:$16 sps:$4 sm:$0xff]   ;;  %v5533_v16 = vld [vmem:[%s7511_s1 + $0xd00] ss:$16 sps:$4 sm:$0xff]   ;;  %v5536_v17 = vld [vmem:[%s7511_s1 + $0xd08] ss:$16 sps:$4 sm:$0xff]  }
 0x176   :  { %v5541_v18 = vld [vmem:[%s7511_s1 + $0xd24] ss:$16 sps:$4 sm:$0xff]   ;;  %v5544_v19 = vld [vmem:[%s7511_s1 + $0xd2c] ss:$16 sps:$4 sm:$0xff]   ;;  %v5539_v20 = vld [vmem:[%s7511_s1 + $0xd20] ss:$16 sps:$4 sm:$0xff]  }
 0x177   :  { %3466 = vmatpush1.bf16.msra.mxu0 %v5467_v31  ;;  %3794 = vmatpush1.bf16.msra.mxu1 %v5470_v25  ;;  %v5542_v22 = vld [vmem:[%s7511_s1 + $0xd28] ss:$16 sps:$4 sm:$0xff]   ;;  %v5547_v23 = vld [vmem:[%s7511_s1 + $0xd44] ss:$16 sps:$4 sm:$0xff]   ;;  %v5550_v24 = vld [vmem:[%s7511_s1 + $0xd4c] ss:$16 sps:$4 sm:$0xff]  }
 0x178   :  { %3467 = vmatprep.subr.bf16.mxu0 %v5475_v32  ;;  %3795 = vmatprep.subr.bf16.mxu1 %v5478_v33  ;;  %v5545_v13 = vld [vmem:[%s7511_s1 + $0xd40] ss:$16 sps:$4 sm:$0xff]   ;;  %v5548_v28 = vld [vmem:[%s7511_s1 + $0xd48] ss:$16 sps:$4 sm:$0xff]   ;;  %v5553_v29 = vld [vmem:[%s7511_s1 + $0xd64] ss:$16 sps:$4 sm:$0xff]  }
 0x179   :  { %v5556_v14 = vld [vmem:[%s7511_s1 + $0xd6c] ss:$16 sps:$4 sm:$0xff]   ;;  %v5551_v30 = vld [vmem:[%s7511_s1 + $0xd60] ss:$16 sps:$4 sm:$0xff]   ;;  %v5554_v31 = vld [vmem:[%s7511_s1 + $0xd68] ss:$16 sps:$4 sm:$0xff]  }
 0x17a   :  { %v5559_v25 = vld [vmem:[%s7511_s1 + $0xd84] ss:$16 sps:$4 sm:$0xff]   ;;  %v5562_v32 = vld [vmem:[%s7511_s1 + $0xd8c] ss:$16 sps:$4 sm:$0xff]   ;;  %v5557_v33 = vld [vmem:[%s7511_s1 + $0xd80] ss:$16 sps:$4 sm:$0xff]  }
 0x17b   :  { %3468 = vmatpush1.bf16.msra.mxu0 %v5473_v26  ;;  %3796 = vmatpush1.bf16.msra.mxu1 %v5476_v36  ;;  %v5560_v34 = vld [vmem:[%s7511_s1 + $0xd88] ss:$16 sps:$4 sm:$0xff]   ;;  %v5565_v26 = vld [vmem:[%s7511_s1 + $0xda4] ss:$16 sps:$4 sm:$0xff]   ;;  %v5568_v36 = vld [vmem:[%s7511_s1 + $0xdac] ss:$16 sps:$4 sm:$0xff]  }
 0x17c   :  { %3469 = vmatprep.subr.bf16.mxu0 %v5481_v38  ;;  %3797 = vmatprep.subr.bf16.mxu1 %v5484_v21  ;;  %v5563_v38 = vld [vmem:[%s7511_s1 + $0xda0] ss:$16 sps:$4 sm:$0xff]   ;;  %v5566_v21 = vld [vmem:[%s7511_s1 + $0xda8] ss:$16 sps:$4 sm:$0xff]   ;;  %v5577_v44 = vld [vmem:[%s7511_s1 + $0xde4] ss:$16 sps:$4 sm:$0xff]  }
 0x17d   :  { %s5735_s11 = smov [#allocation2]   ;;  %vm4241_vm0 = vcmask 74752  }
 0x17e   :  { %s4249_s12 = sshll.u32 %s5735_s11, 4  ;;  %s4250_s12 = int_to_ptr.vmem [resolvable:$true] %s4249_s12 }
 0x17f   :  { %3470 = vmatpush1.bf16.msra.mxu0 %v5479_v40  ;;  %3798 = vmatpush1.bf16.msra.mxu1 %v5482_v27  ;;  %v5571_v40 = vld [vmem:[%s7511_s1 + $0xdc4] ss:$16 sps:$4 sm:$0xff]   ;;  %v5574_v27 = vld [vmem:[%s7511_s1 + $0xdcc] ss:$16 sps:$4 sm:$0xff]   ;;  %s5710_s13 = scalar_lea.vmem %s4250_s12, 32  ;;  %p5715_p1 = scmp.lt.s32.totalorder %s4250_s12, %s4250_s12 }
 0x180   :  { %3480 = vmatprep.subr.bf16.mxu0 %v5487_v41  ;;  %3808 = vmatprep.subr.bf16.mxu1 %v5490_v43  ;;  %v5569_v41 = vld [vmem:[%s7511_s1 + $0xdc0] ss:$16 sps:$4 sm:$0xff]   ;;  %v5572_v43 = vld [vmem:[%s7511_s1 + $0xdc8] ss:$16 sps:$4 sm:$0xff]   ;;  %p5711_p0 = scmp.ne.s32.totalorder %s4250_s12, %s5710_s13  ;;  %p5716_p2 = scmp.lt.s32.totalorder %s5710_s13, %s5710_s13 }
 0x182   :  { %3472 = vmatmul.mubr.bf16.vlgmr.msra.gmra.mrb[0].mxu0 %v654_v35  ;;  %3800 = vmatmul.mubr.bf16.vlgmr.msra.gmra.mrb[0].mxu1 %v654_v35  ;;  %v5580_v35 = vld [vmem:[%s7511_s1 + $0xdec] ss:$16 sps:$4 sm:$0xff]   ;;  %p5717_p3 = por %p5716_p2, %p5715_p1 }
 0x183   :  { %3481 = vmatpush1.bf16.msra.mxu0 %v5485_v45  ;;  %3809 = vmatpush1.bf16.msra.mxu1 %v5488_v46  ;;  %v5575_v45 = vld [vmem:[%s7511_s1 + $0xde0] ss:$16 sps:$4 sm:$0xff]   ;;  %v5578_v46 = vld [vmem:[%s7511_s1 + $0xde8] ss:$16 sps:$4 sm:$0xff]  }
 0x184   :  { %3482 = vmatprep.subr.bf16.mxu0 %v5493_v47  ;;  %3810 = vmatprep.subr.bf16.mxu1 %v5496_v37  ;;  %v5584_v47 = vld [vmem:[%s7511_s1 + $0xe04] ss:$16 sps:$4 sm:$0xff]   ;;  %v5587_v37 = vld [vmem:[%s7511_s1 + $0xe0c] ss:$16 sps:$4 sm:$0xff]   ;;  %p5718_p4 = pnand %p5717_p3, %p5711_p0 }
 0x185   :  { %3512 = vmatprep.mubr.bf16.mxu0 %v7012_v48  ;;  %3840 = vmatprep.mubr.bf16.mxu1 %v7012_v48 }
 0x187   :  { %3483 = vmatpush1.bf16.msra.mxu0 %v5491_v50  ;;  %3811 = vmatpush1.bf16.msra.mxu1 %v5494_v51  ;;  %v7198_v50 = vrot.slane %v6981_v39, %v5901_v49  ;;  %v5582_v51 = vld [vmem:[%s7511_s1 + $0xe00] ss:$16 sps:$4 sm:$0xff]   ;;  %v5593_v49 = vld [vmem:[%s7511_s1 + $0xe2c] ss:$16 sps:$4 sm:$0xff]   ;;  %v657_v39 = vcombine.high %v7012_v48, %v7012_v48  ;;  %v5596_v48 = vld [vmem:[%s7511_s1 + $0xe44] ss:$16 sps:$4 sm:$0xff]  }
 0x188   :  { %3484 = vmatprep.subr.bf16.mxu0 %v5499_v53  ;;  %3812 = vmatprep.subr.bf16.mxu1 %v5502_v54  ;;  %v5585_v53 = vld [vmem:[%s7511_s1 + $0xe08] ss:$16 sps:$4 sm:$0xff]   ;;  %v5590_v54 = vld [vmem:[%s7511_s1 + $0xe24] ss:$16 sps:$4 sm:$0xff]  }
 0x18b   :  { %3485 = vmatpush1.bf16.msra.mxu0 %v5497_v55  ;;  %3813 = vmatpush1.bf16.msra.mxu1 %v5500_v56  ;;  %v5588_v55 = vld [vmem:[%s7511_s1 + $0xe20] ss:$16 sps:$4 sm:$0xff]   ;;  %v5591_v56 = vld [vmem:[%s7511_s1 + $0xe28] ss:$16 sps:$4 sm:$0xff]  }
 0x18c   :  { %3486 = vmatprep.subr.bf16.mxu0 %v5505_v57  ;;  %3814 = vmatprep.subr.bf16.mxu1 %v5508_v58  ;;  %v5599_v57 = vld [vmem:[%s7511_s1 + $0xe4c] ss:$16 sps:$4 sm:$0xff]   ;;  %v5594_v58 = vld [vmem:[%s7511_s1 + $0xe40] ss:$16 sps:$4 sm:$0xff]  }
 0x18f   :  { %3487 = vmatpush1.bf16.msra.mxu0 %v5503_v59  ;;  %3815 = vmatpush1.bf16.msra.mxu1 %v5506_v60  ;;  %v5597_v59 = vld [vmem:[%s7511_s1 + $0xe48] ss:$16 sps:$4 sm:$0xff]   ;;  %v5602_v60 = vld [vmem:[%s7511_s1 + $0xe64] ss:$16 sps:$4 sm:$0xff]  }
 0x190   :  { %3488 = vmatprep.subr.bf16.mxu0 %v5511_v61  ;;  %3816 = vmatprep.subr.bf16.mxu1 %v5514_v62  ;;  %v5605_v61 = vld [vmem:[%s7511_s1 + $0xe6c] ss:$16 sps:$4 sm:$0xff]   ;;  %v5600_v62 = vld [vmem:[%s7511_s1 + $0xe60] ss:$16 sps:$4 sm:$0xff]  }
 0x193   :  { %3489 = vmatpush1.bf16.msra.mxu0 %v5509_v63  ;;  %3817 = vmatpush1.bf16.msra.mxu1 %v5512_v0  ;;  %v5603_v63 = vld [vmem:[%s7511_s1 + $0xe68] ss:$16 sps:$4 sm:$0xff]   ;;  %v5608_v0 = vld [vmem:[%s7511_s1 + $0xe84] ss:$16 sps:$4 sm:$0xff]  }
 0x194   :  { %3490 = vmatprep.subr.bf16.mxu0 %v5517_v1  ;;  %3818 = vmatprep.subr.bf16.mxu1 %v5520_v2  ;;  %v5611_v1 = vld [vmem:[%s7511_s1 + $0xe8c] ss:$16 sps:$4 sm:$0xff]   ;;  %v5606_v2 = vld [vmem:[%s7511_s1 + $0xe80] ss:$16 sps:$4 sm:$0xff]  }
 0x197   :  { %3491 = vmatpush1.bf16.msra.mxu0 %v5515_v3  ;;  %3819 = vmatpush1.bf16.msra.mxu1 %v5518_v4  ;;  %v5609_v3 = vld [vmem:[%s7511_s1 + $0xe88] ss:$16 sps:$4 sm:$0xff]   ;;  %v5614_v4 = vld [vmem:[%s7511_s1 + $0xea4] ss:$16 sps:$4 sm:$0xff]  }
 0x198   :  { %3492 = vmatprep.subr.bf16.mxu0 %v5523_v5  ;;  %3820 = vmatprep.subr.bf16.mxu1 %v5526_v6  ;;  %v5617_v5 = vld [vmem:[%s7511_s1 + $0xeac] ss:$16 sps:$4 sm:$0xff]   ;;  %v5612_v6 = vld [vmem:[%s7511_s1 + $0xea0] ss:$16 sps:$4 sm:$0xff]  }
 0x19b   :  { %3493 = vmatpush1.bf16.msra.mxu0 %v5521_v7  ;;  %3821 = vmatpush1.bf16.msra.mxu1 %v5524_v8  ;;  %v5615_v7 = vld [vmem:[%s7511_s1 + $0xea8] ss:$16 sps:$4 sm:$0xff]   ;;  %v5620_v8 = vld [vmem:[%s7511_s1 + $0xec4] ss:$16 sps:$4 sm:$0xff]  }
 0x19c   :  { %3494 = vmatprep.subr.bf16.mxu0 %v5529_v9  ;;  %3822 = vmatprep.subr.bf16.mxu1 %v5532_v10  ;;  %v5623_v9 = vld [vmem:[%s7511_s1 + $0xecc] ss:$16 sps:$4 sm:$0xff]   ;;  %v5618_v10 = vld [vmem:[%s7511_s1 + $0xec0] ss:$16 sps:$4 sm:$0xff]  }
 0x19f   :  { %3495 = vmatpush1.bf16.msra.mxu0 %v5527_v11  ;;  %3823 = vmatpush1.bf16.msra.mxu1 %v5530_v12  ;;  %v5621_v11 = vld [vmem:[%s7511_s1 + $0xec8] ss:$16 sps:$4 sm:$0xff]   ;;  %v5626_v12 = vld [vmem:[%s7511_s1 + $0xee4] ss:$16 sps:$4 sm:$0xff]  }
 0x1a0   :  { %3496 = vmatprep.subr.bf16.mxu0 %v5535_v52  ;;  %3824 = vmatprep.subr.bf16.mxu1 %v5538_v15  ;;  %v5629_v52 = vld [vmem:[%s7511_s1 + $0xeec] ss:$16 sps:$4 sm:$0xff]   ;;  %v5624_v15 = vld [vmem:[%s7511_s1 + $0xee0] ss:$16 sps:$4 sm:$0xff]  }
 0x1a3   :  { %3497 = vmatpush1.bf16.msra.mxu0 %v5533_v16  ;;  %3825 = vmatpush1.bf16.msra.mxu1 %v5536_v17  ;;  %v5627_v16 = vld [vmem:[%s7511_s1 + $0xee8] ss:$16 sps:$4 sm:$0xff]   ;;  %v5632_v17 = vld [vmem:[%s7511_s1 + $0xf04] ss:$16 sps:$4 sm:$0xff]  }
 0x1a4   :  { %3498 = vmatprep.subr.bf16.mxu0 %v5541_v18  ;;  %3826 = vmatprep.subr.bf16.mxu1 %v5544_v19  ;;  %v5635_v18 = vld [vmem:[%s7511_s1 + $0xf0c] ss:$16 sps:$4 sm:$0xff]   ;;  %v5630_v19 = vld [vmem:[%s7511_s1 + $0xf00] ss:$16 sps:$4 sm:$0xff]  }
 0x1a7   :  { %3499 = vmatpush1.bf16.msra.mxu0 %v5539_v20  ;;  %3827 = vmatpush1.bf16.msra.mxu1 %v5542_v22  ;;  %v5633_v20 = vld [vmem:[%s7511_s1 + $0xf08] ss:$16 sps:$4 sm:$0xff]   ;;  %v5638_v22 = vld [vmem:[%s7511_s1 + $0xf24] ss:$16 sps:$4 sm:$0xff]  }
 0x1a8   :  { %3500 = vmatprep.subr.bf16.mxu0 %v5547_v23  ;;  %3828 = vmatprep.subr.bf16.mxu1 %v5550_v24  ;;  %v5641_v23 = vld [vmem:[%s7511_s1 + $0xf2c] ss:$16 sps:$4 sm:$0xff]   ;;  %v5636_v24 = vld [vmem:[%s7511_s1 + $0xf20] ss:$16 sps:$4 sm:$0xff]  }
 0x1ab   :  { %3501 = vmatpush1.bf16.msra.mxu0 %v5545_v13  ;;  %3829 = vmatpush1.bf16.msra.mxu1 %v5548_v28  ;;  %v5639_v13 = vld [vmem:[%s7511_s1 + $0xf28] ss:$16 sps:$4 sm:$0xff]   ;;  %v5644_v28 = vld [vmem:[%s7511_s1 + $0xf44] ss:$16 sps:$4 sm:$0xff]  }
 0x1ac   :  { %3502 = vmatprep.subr.bf16.mxu0 %v5553_v29  ;;  %3830 = vmatprep.subr.bf16.mxu1 %v5556_v14  ;;  %v5647_v29 = vld [vmem:[%s7511_s1 + $0xf4c] ss:$16 sps:$4 sm:$0xff]   ;;  %v5642_v14 = vld [vmem:[%s7511_s1 + $0xf40] ss:$16 sps:$4 sm:$0xff]  }
 0x1af   :  { %3503 = vmatpush1.bf16.msra.mxu0 %v5551_v30  ;;  %3831 = vmatpush1.bf16.msra.mxu1 %v5554_v31  ;;  %v5645_v30 = vld [vmem:[%s7511_s1 + $0xf48] ss:$16 sps:$4 sm:$0xff]   ;;  %v5650_v31 = vld [vmem:[%s7511_s1 + $0xf64] ss:$16 sps:$4 sm:$0xff]  }
 0x1b0   :  { %3504 = vmatprep.subr.bf16.mxu0 %v5559_v25  ;;  %3832 = vmatprep.subr.bf16.mxu1 %v5562_v32  ;;  %v5653_v25 = vld [vmem:[%s7511_s1 + $0xf6c] ss:$16 sps:$4 sm:$0xff]   ;;  %v5648_v32 = vld [vmem:[%s7511_s1 + $0xf60] ss:$16 sps:$4 sm:$0xff]  }
 0x1b3   :  { %3505 = vmatpush1.bf16.msra.mxu0 %v5557_v33  ;;  %3833 = vmatpush1.bf16.msra.mxu1 %v5560_v34  ;;  %v5651_v33 = vld [vmem:[%s7511_s1 + $0xf68] ss:$16 sps:$4 sm:$0xff]   ;;  %v5656_v34 = vld [vmem:[%s7511_s1 + $0xf84] ss:$16 sps:$4 sm:$0xff]  }
 0x1b4   :  { %3506 = vmatprep.subr.bf16.mxu0 %v5565_v26  ;;  %3834 = vmatprep.subr.bf16.mxu1 %v5568_v36  ;;  %v5659_v26 = vld [vmem:[%s7511_s1 + $0xf8c] ss:$16 sps:$4 sm:$0xff]   ;;  %v5654_v36 = vld [vmem:[%s7511_s1 + $0xf80] ss:$16 sps:$4 sm:$0xff]  }
 0x1b7   :  { %3507 = vmatpush1.bf16.msra.mxu0 %v5563_v38  ;;  %3835 = vmatpush1.bf16.msra.mxu1 %v5566_v21  ;;  %v5657_v38 = vld [vmem:[%s7511_s1 + $0xf88] ss:$16 sps:$4 sm:$0xff]   ;;  %v5662_v21 = vld [vmem:[%s7511_s1 + $0xfa4] ss:$16 sps:$4 sm:$0xff]  }
 0x1b8   :  { %3508 = vmatprep.subr.bf16.mxu0 %v5571_v40  ;;  %3836 = vmatprep.subr.bf16.mxu1 %v5574_v27  ;;  %v5665_v40 = vld [vmem:[%s7511_s1 + $0xfac] ss:$16 sps:$4 sm:$0xff]   ;;  %v5660_v27 = vld [vmem:[%s7511_s1 + $0xfa0] ss:$16 sps:$4 sm:$0xff]  }
 0x1bb   :  { %3509 = vmatpush1.bf16.msra.mxu0 %v5569_v41  ;;  %3837 = vmatpush1.bf16.msra.mxu1 %v5572_v43  ;;  %v5663_v41 = vld [vmem:[%s7511_s1 + $0xfa8] ss:$16 sps:$4 sm:$0xff]   ;;  %v5668_v43 = vld [vmem:[%s7511_s1 + $0xfc4] ss:$16 sps:$4 sm:$0xff]  }
 0x1bc   :  { %3510 = vmatprep.subr.bf16.mxu0 %v5577_v44  ;;  %3838 = vmatprep.subr.bf16.mxu1 %v5580_v35  ;;  %v5671_v44 = vld [vmem:[%s7511_s1 + $0xfcc] ss:$16 sps:$4 sm:$0xff]   ;;  %v5666_v35 = vld [vmem:[%s7511_s1 + $0xfc0] ss:$16 sps:$4 sm:$0xff]  }
 0x1bf   :  { %3511 = vmatpush1.bf16.msra.mxu0 %v5575_v45  ;;  %3839 = vmatpush1.bf16.msra.mxu1 %v5578_v46  ;;  %v5669_v45 = vld [vmem:[%s7511_s1 + $0xfc8] ss:$16 sps:$4 sm:$0xff]   ;;  %v5674_v46 = vld [vmem:[%s7511_s1 + $0xfe4] ss:$16 sps:$4 sm:$0xff]  }
 0x1c0   :  { %3521 = vmatprep.subr.bf16.mxu0 %v5584_v47  ;;  %3849 = vmatprep.subr.bf16.mxu1 %v5587_v37  ;;  %v5677_v47 = vld [vmem:[%s7511_s1 + $0xfec] ss:$16 sps:$4 sm:$0xff]   ;;  %v5672_v37 = vld [vmem:[%s7511_s1 + $0xfe0] ss:$16 sps:$4 sm:$0xff]  }
 0x1c2   :  { %3513 = vmatmul.mubr.bf16.vlgmr.msra.gmra.mrb[0].mxu0 %v7198_v50  ;;  %3841 = vmatmul.mubr.bf16.vlgmr.msra.gmra.mrb[0].mxu1 %v7198_v50 }
 0x1c3   :  { %3522 = vmatpush1.bf16.msra.mxu0 %v5582_v51  ;;  %3850 = vmatpush1.bf16.msra.mxu1 %v5585_v53  ;;  %v5675_v51 = vld [vmem:[%s7511_s1 + $0xfe8] ss:$16 sps:$4 sm:$0xff]   ;;  %v5678_v53 = vld [vmem:[%s7513_s3 + $0x40] sm:$0xff]  }
 0x1c4   :  { %3523 = vmatprep.subr.bf16.mxu0 %v5590_v54  ;;  %3851 = vmatprep.subr.bf16.mxu1 %v5593_v49  ;;  %v5679_v54 = vld [vmem:[%s7513_s3 + $0xc0] sm:$0xff]   ;;  %v655_v49 = vcombine.high %v7198_v50, %v7198_v50  ;;  %v5683_v50 = vld [vmem:[%s7513_s3 + $0xc8] sm:$0xff]  }
 0x1c5   :  { %3553 = vmatprep.mubr.bf16.mxu0 %v657_v39  ;;  %3881 = vmatprep.mubr.bf16.mxu1 %v657_v39  ;;  %v5680_v39 = vld [vmem:[%s7513_s3] sm:$0xff]  }
 0x1c7   :  { %3524 = vmatpush1.bf16.msra.mxu0 %v5588_v55  ;;  %3852 = vmatpush1.bf16.msra.mxu1 %v5591_v56  ;;  %v5681_v55 = vld [vmem:[%s7513_s3 + $0x80] sm:$0xff]   ;;  %v5682_v56 = vld [vmem:[%s7513_s3 + $0x48] sm:$0xff]  }
 0x1c8   :  { %3525 = vmatprep.subr.bf16.mxu0 %v5596_v48  ;;  %3853 = vmatprep.subr.bf16.mxu1 %v5599_v57  ;;  %v5684_v48 = vld [vmem:[%s7513_s3 + $0x8] sm:$0xff]  }
 0x1c9   :  { %v5685_v57 = vld [vmem:[%s7513_s3 + $0x88] sm:$0xff]  }
 0x1cb   :  { %3526 = vmatpush1.bf16.msra.mxu0 %v5594_v58  ;;  %3854 = vmatpush1.bf16.msra.mxu1 %v5597_v59  ;;  %v5686_v58 = vld [vmem:[%s7513_s3 + $0x50] sm:$0xff]  }
 0x1cc   :  { %3527 = vmatprep.subr.bf16.mxu0 %v5602_v60  ;;  %3855 = vmatprep.subr.bf16.mxu1 %v5605_v61  ;;  %v5687_v59 = vld [vmem:[%s7513_s3 + $0xd0] sm:$0xff]  }
 0x1cd   :  { %v5688_v60 = vld [vmem:[%s7513_s3 + $0x10] sm:$0xff]  }
 0x1ce   :  { %v5689_v61 = vld [vmem:[%s7513_s3 + $0x90] sm:$0xff]  }
 0x1cf   :  { %3528 = vmatpush1.bf16.msra.mxu0 %v5600_v62  ;;  %3856 = vmatpush1.bf16.msra.mxu1 %v5603_v63  ;;  %v5690_v62 = vld [vmem:[%s7513_s3 + $0x58] sm:$0xff]  }
 0x1d0   :  { %3529 = vmatprep.subr.bf16.mxu0 %v5608_v0  ;;  %3857 = vmatprep.subr.bf16.mxu1 %v5611_v1  ;;  %v5691_v63 = vld [vmem:[%s7513_s3 + $0xd8] sm:$0xff]  }
 0x1d1   :  { %v5692_v0 = vld [vmem:[%s7513_s3 + $0x18] sm:$0xff]  }
 0x1d2   :  { %v5693_v1 = vld [vmem:[%s7513_s3 + $0x98] sm:$0xff]  }
 0x1d3   :  { %3530 = vmatpush1.bf16.msra.mxu0 %v5606_v2  ;;  %3858 = vmatpush1.bf16.msra.mxu1 %v5609_v3  ;;  %v5694_v2 = vld [vmem:[%s7513_s3 + $0x60] sm:$0xff]  }
 0x1d4   :  { %3531 = vmatprep.subr.bf16.mxu0 %v5614_v4  ;;  %3859 = vmatprep.subr.bf16.mxu1 %v5617_v5  ;;  %v5695_v3 = vld [vmem:[%s7513_s3 + $0xe0] sm:$0xff]  }
 0x1d5   :  { %v5696_v4 = vld [vmem:[%s7513_s3 + $0x20] sm:$0xff]  }
 0x1d6   :  { %v5697_v5 = vld [vmem:[%s7513_s3 + $0xa0] sm:$0xff]  }
 0x1d7   :  { %3532 = vmatpush1.bf16.msra.mxu0 %v5612_v6  ;;  %3860 = vmatpush1.bf16.msra.mxu1 %v5615_v7  ;;  %v5698_v6 = vld [vmem:[%s7513_s3 + $0x68] sm:$0xff]  }
 0x1d8   :  { %3533 = vmatprep.subr.bf16.mxu0 %v5620_v8  ;;  %3861 = vmatprep.subr.bf16.mxu1 %v5623_v9  ;;  %v5699_v7 = vld [vmem:[%s7513_s3 + $0xe8] sm:$0xff]  }
 0x1d9   :  { %v5700_v8 = vld [vmem:[%s7513_s3 + $0x28] sm:$0xff]  }
 0x1da   :  { %v5701_v9 = vld [vmem:[%s7513_s3 + $0xa8] sm:$0xff]  }
 0x1db   :  { %3534 = vmatpush1.bf16.msra.mxu0 %v5618_v10  ;;  %3862 = vmatpush1.bf16.msra.mxu1 %v5621_v11  ;;  %v5702_v10 = vld [vmem:[%s7513_s3 + $0x70] sm:$0xff]  }
 0x1dc   :  { %3535 = vmatprep.subr.bf16.mxu0 %v5626_v12  ;;  %3863 = vmatprep.subr.bf16.mxu1 %v5629_v52  ;;  %v5703_v11 = vld [vmem:[%s7513_s3 + $0xf0] sm:$0xff]  }
 0x1dd   :  { %v5704_v12 = vld [vmem:[%s7513_s3 + $0x30] sm:$0xff]  }
 0x1de   :  { %v5705_v52 = vld [vmem:[%s7513_s3 + $0xb0] sm:$0xff]  }
 0x1df   :  { %3536 = vmatpush1.bf16.msra.mxu0 %v5624_v15  ;;  %3864 = vmatpush1.bf16.msra.mxu1 %v5627_v16  ;;  %v5706_v15 = vld [vmem:[%s7513_s3 + $0x78] sm:$0xff]  }
 0x1e0   :  { %3537 = vmatprep.subr.bf16.mxu0 %v5632_v17  ;;  %3865 = vmatprep.subr.bf16.mxu1 %v5635_v18  ;;  %v5707_v16 = vld [vmem:[%s7513_s3 + $0xf8] sm:$0xff]  }
 0x1e1   :  { %v5708_v17 = vld [vmem:[%s7513_s3 + $0x38] sm:$0xff]  }
 0x1e2   :  { %v5709_v18 = vld [vmem:[%s7513_s3 + $0xb8] sm:$0xff]  }
 0x1e3   :  { %3538 = vmatpush1.bf16.msra.mxu0 %v5630_v19  ;;  %3866 = vmatpush1.bf16.msra.mxu1 %v5633_v20  ;;  %v540_v19 = vsub.s32 0, %v5883_v42  ;;  %v548_v20 = vsub.s32 2, %v5883_v42 }
 0x1e4   :  { %3539 = vmatprep.subr.bf16.mxu0 %v5638_v22  ;;  %3867 = vmatprep.subr.bf16.mxu1 %v5641_v23  ;;  %v536_v22 = vld [vmem:[%s7512_s2] sm:$0xf]  ;;  %v544_v23 = vsub.s32 1, %v5883_v42 }
 0x1e7   :  { %3540 = vmatpush1.bf16.msra.mxu0 %v5636_v24  ;;  %3868 = vmatpush1.bf16.msra.mxu1 %v5639_v13  ;;  %v552_v24 = vsub.s32 3, %v5883_v42  ;;  %v541_v13 = vrot.slane %v536_v22, %v540_v19 }
 0x1e8   :  { %3541 = vmatprep.subr.bf16.mxu0 %v5644_v28  ;;  %3869 = vmatprep.subr.bf16.mxu1 %v5647_v29  ;;  %v549_v28 = vrot.slane %v536_v22, %v548_v20  ;;  %v545_v29 = vrot.slane %v536_v22, %v544_v23 }
 0x1eb   :  { %3542 = vmatpush1.bf16.msra.mxu0 %v5642_v14  ;;  %3870 = vmatpush1.bf16.msra.mxu1 %v5645_v30  ;;  %v553_v14 = vrot.slane %v536_v22, %v552_v24 }
 0x1ec   :  { %3543 = vmatprep.subr.bf16.mxu0 %v5650_v31  ;;  %3871 = vmatprep.subr.bf16.mxu1 %v5653_v25 }
 0x1ef   :  { %3544 = vmatpush1.bf16.msra.mxu0 %v5648_v32  ;;  %3872 = vmatpush1.bf16.msra.mxu1 %v5651_v33 }
 0x1f0   :  { %3545 = vmatprep.subr.bf16.mxu0 %v5656_v34  ;;  %3873 = vmatprep.subr.bf16.mxu1 %v5659_v26 }
 0x1f3   :  { %3546 = vmatpush1.bf16.msra.mxu0 %v5654_v36  ;;  %3874 = vmatpush1.bf16.msra.mxu1 %v5657_v38 }
 0x1f4   :  { %3547 = vmatprep.subr.bf16.mxu0 %v5662_v21  ;;  %3875 = vmatprep.subr.bf16.mxu1 %v5665_v40 }
 0x1f7   :  { %3548 = vmatpush1.bf16.msra.mxu0 %v5660_v27  ;;  %3876 = vmatpush1.bf16.msra.mxu1 %v5663_v41 }
 0x1f8   :  { %3549 = vmatprep.subr.bf16.mxu0 %v5668_v43  ;;  %3877 = vmatprep.subr.bf16.mxu1 %v5671_v44 }
 0x1fb   :  { %3550 = vmatpush1.bf16.msra.mxu0 %v5666_v35  ;;  %3878 = vmatpush1.bf16.msra.mxu1 %v5669_v45 }
 0x1fc   :  { %3551 = vmatprep.subr.bf16.mxu0 %v5674_v46  ;;  %3879 = vmatprep.subr.bf16.mxu1 %v5677_v47 }
 0x1ff   :  { %3552 = vmatpush1.bf16.msra.mxu0 %v5672_v37  ;;  %3880 = vmatpush1.bf16.msra.mxu1 %v5675_v51 }
 0x200   :  { %4802 = vmatprep.subr.bf16.mxu0 %v5678_v53  ;;  %4824 = vmatprep.subr.bf16.mxu1 %v5679_v54  ;;  %v4769_v53 = vld [vmem:[%s7514_s4] ss:$0 sm:$0xff] }
 0x202   :  { %3554 = vmatmul.mubr.bf16.vlgmr.msra.gmra.mrb[0].mxu0 %v655_v49  ;;  %3882 = vmatmul.mubr.bf16.vlgmr.msra.gmra.mrb[0].mxu1 %v655_v49 }
 0x203   :  { %4803 = vmatpush3.bf16.msra.mxu0 %v5680_v39  ;;  %4825 = vmatpush3.bf16.msra.mxu1 %v5681_v55 }
 0x204   :  { %4804 = vmatprep.subr.bf16.mxu0 %v5682_v56  ;;  %4826 = vmatprep.subr.bf16.mxu1 %v5683_v50 }
 0x207   :  { %4805 = vmatpush3.bf16.msra.mxu0 %v5684_v48  ;;  %4827 = vmatpush3.bf16.msra.mxu1 %v5685_v57 }
 0x208   :  { %4806 = vmatprep.subr.bf16.mxu0 %v5686_v58  ;;  %4828 = vmatprep.subr.bf16.mxu1 %v5687_v59 }
 0x20b   :  { %4807 = vmatpush3.bf16.msra.mxu0 %v5688_v60  ;;  %4829 = vmatpush3.bf16.msra.mxu1 %v5689_v61 }
 0x20c   :  { %4808 = vmatprep.subr.bf16.mxu0 %v5690_v62  ;;  %4830 = vmatprep.subr.bf16.mxu1 %v5691_v63 }
 0x20f   :  { %4809 = vmatpush3.bf16.msra.mxu0 %v5692_v0  ;;  %4831 = vmatpush3.bf16.msra.mxu1 %v5693_v1 }
 0x210   :  { %4810 = vmatprep.subr.bf16.mxu0 %v5694_v2  ;;  %4832 = vmatprep.subr.bf16.mxu1 %v5695_v3 }
 0x213   :  { %4811 = vmatpush3.bf16.msra.mxu0 %v5696_v4  ;;  %4833 = vmatpush3.bf16.msra.mxu1 %v5697_v5 }
 0x214   :  { %4812 = vmatprep.subr.bf16.mxu0 %v5698_v6  ;;  %4834 = vmatprep.subr.bf16.mxu1 %v5699_v7 }
 0x217   :  { %4813 = vmatpush3.bf16.msra.mxu0 %v5700_v8  ;;  %4835 = vmatpush3.bf16.msra.mxu1 %v5701_v9 }
 0x218   :  { %4814 = vmatprep.subr.bf16.mxu0 %v5702_v10  ;;  %4836 = vmatprep.subr.bf16.mxu1 %v5703_v11 }
 0x21b   :  { %4815 = vmatpush3.bf16.msra.mxu0 %v5704_v12  ;;  %4837 = vmatpush3.bf16.msra.mxu1 %v5705_v52 }
 0x21c   :  { %4816 = vmatprep.subr.bf16.mxu0 %v5706_v15  ;;  %4838 = vmatprep.subr.bf16.mxu1 %v5707_v16 }
 0x21f   :  { %4817 = vmatpush3.bf16.msra.mxu0 %v5708_v17  ;;  %4839 = vmatpush3.bf16.msra.mxu1 %v5709_v18 }
 0x2d5   :  { %v3555_v30 = vpop.f32.mrb[0].mxu0  ;;  %v3883_v31 = vpop.f32.mrb[0].mxu1 }
 0x2d6   :  { %v4846_v25 = vadd.f32 %v3555_v30, %v541_v13  ;;  %v4848_v32 = vadd.f32 %v3883_v31, %v549_v28  ;;  %v3557_v33 = vpop.f32.mrb[1].mxu0  ;;  %v3885_v34 = vpop.f32.mrb[1].mxu1 }
 0x2d7   :  { %v4847_v26 = vadd.f32 %v3557_v33, %v545_v29  ;;  %v4849_v36 = vadd.f32 %v3885_v34, %v553_v14  ;;  %v3559_v38 = vpop.f32.mrb[2].mxu0  ;;  %v3887_v21 = vpop.f32.mrb[2].mxu1 }
 0x2d8   :  { %v3890_v40 = vmax.f32 %v4846_v25, 0.0  ;;  %v3892_v27 = vmax.f32 %v4848_v32, 0.0  ;;  %v3560_v41 = vpop.f32.mrb[3].mxu0  ;;  %v3888_v43 = vpop.f32.mrb[3].mxu1 }
 0x2d9   :  { %v3891_v44 = vmax.f32 %v4847_v26, 0.0  ;;  %v3893_v42 = vmax.f32 %v4849_v36, 0.0 }
 0x2da   :  { %v3894_v46 = vpack.c.bf16 %v3890_v40, %v3890_v40  ;;  %v3896_v47 = vpack.c.bf16 %v3892_v27, %v3892_v27 }
 0x2db   :  { %v3895_v35 = vpack.c.bf16 %v3891_v44, %v3891_v44  ;;  %v3897_v45 = vpack.c.bf16 %v3893_v42, %v3893_v42 }
 0x2dd   :  { %4193 = vmatprep.mubr.bf16.mxu0 %v3895_v35  ;;  %4233 = vmatprep.mubr.bf16.mxu1 %v3897_v45 }
 0x2de   :  { %4194 = vmatmul.mubr.bf16.vlgmr.msra.gmra.mrb[4].mxu0 %v3894_v46  ;;  %4234 = vmatmul.mubr.bf16.vlgmr.msra.gmra.mrb[4].mxu1 %v3896_v47 }
 0x3b1   :  { %v4818_v37 = vpop.f32.mrb[4].mxu0  ;;  %v4840_v51 = vpop.f32.mrb[4].mxu1 }
 0x3b2   :  { %v4819_v54 = vpop.f32.mrb[5].mxu0  ;;  %v4841_v49 = vpop.f32.mrb[5].mxu1 }
 0x3b3   :  { %v4820_v39 = vadd.f32 %v4819_v54, %v4818_v37  ;;  %v4842_v55 = vadd.f32 %v4841_v49, %v4840_v51  ;;  %v4821_v56 = vpop.f32.mrb[6].mxu0  ;;  %v4843_v50 = vpop.f32.mrb[6].mxu1 }
 0x3b4   :  { %v4822_v48 = vpop.f32.mrb[7].mxu0  ;;  %v4844_v57 = vpop.f32.mrb[7].mxu1 }
 0x3b5   :  { %v4196_v58 = vadd.f32 %v4820_v39, %v4769_v53 }
 0x3b7   :  { %v4236_v59 = vadd.f32 %v4842_v55, %v4196_v58 }
 0x3b9   :  { %4242 = vst.msk [vmem:[#allocation2] sm:$0x3] %vm4241_vm0, %v4236_v59 }
 0x3ba   :  { %5721 = shalt.err (!%p5718_p4)
}
 0x3bb   :  { %s5722_s15 = scalar_lea.hbm %s7515_s5, 32 }
 0x3bc   :  { %p5723_p5 = scmp.ne.s32.totalorder %s7515_s5, %s5722_s15  ;;  %p5726_p6 = scmp.lt.u32.totalorder %s5722_s15, %s7515_s5 }
 0x3be   :  { %p5728_p7 = pnand %p5726_p6, %p5723_p5 }
 0x3c0   :  { %5731 = shalt.err (!%p5728_p7)
}
 0x3c1   :  { %4252 = dma.vmem_to_hbm [thread:$0]  %s4250_s12, 32, %s7515_s5, [#allocation3]  }
 0x3c2   :  { %5732 = dma.done.wait [#allocation3], 32  }
 0x3c3   :  { %5733 = vsyncadd [#allocation3], 4294967264 }
 0x3c4   :  { %4256 = vsyncpa [#allocation3], 1 }

</bundles_post_ra>
